<compile_context>
chip_gen: v7x
topology: tpu7x:2x2x1
jax: 0.10.0
libtpu: 0.0.40
codegen_flags: <defaults>
</compile_context>

<pallas_src>
import functools

import numpy as np
import jax
import jax.numpy as jnp
from jax import lax
from jax.experimental import pallas as pl
from jax.experimental.pallas import tpu as pltpu

KERNEL_SIZES = (1, 3, 5)
MAX_PAD = max(KERNEL_SIZES) // 2  # 2


def _msconv_kernel(x_ref, w1_ref, w3_ref, w5_ref, shift_ref, out_ref, *, H, C, tap_dtype):
    """One (b_tile*H, W*C) block per grid step; lane axis = fused (W, C).

    x_ref     : (R, WC)    original input rows (R = b_tile*H); doubles as the residual
    wK_ref    : (K, K, WC) depthwise weights; BN scale AND W-boundary mask folded in,
                           tiled over W on the lane axis
    shift_ref : (3, WC)    folded BN shift per branch, tiled over W
    out_ref   : (R, WC)
    """
    P = MAX_PAD
    R, WC = x_ref.shape
    x32 = x_ref[...].astype(jnp.float32)                  # residual / finalize term (f32)
    x = x32.astype(tap_dtype)                              # tap-chain operand

    # Row index within its image (R rows are b_tile stacked images on the sublane axis).
    row = lax.broadcasted_iota(jnp.int32, (R, 1), 0)
    if R != H:
        row = row % H                                      # only traced when b_tile > 1

    acc3 = None                                            # 3x3 branch accumulator
    acc5 = None                                            # 5x5 branch accumulator

    for dy in range(2 * P + 1):                            # outer: H shift (sublane roll)
        dyr = dy - P
        if dyr == 0:
            x_dy = x
        else:
            rolled = pltpu.roll(x, (-dyr) % R, 0)          # sublane roll rides the XLU
            keep = jnp.where((row + dyr >= 0) & (row + dyr < H), 1.0, 0.0).astype(tap_dtype)
            x_dy = rolled * keep                           # zero out-of-image rows (R,1) bcast
        for dx in range(2 * P + 1):                        # inner: W shift (lane roll)
            dxr = dx - P
            if dxr == 0:
                tap = x_dy
            else:
                # Lanes that wrapped around the image edge are killed by the zeroed
                # weight columns (W-boundary mask folded into w3/w5 in the wrapper).
                tap = pltpu.roll(x_dy, (-dxr * C) % WC, 1)
            t5 = tap * w5_ref[dy, dx, :].astype(tap_dtype)
            acc5 = t5 if acc5 is None else acc5 + t5       # first tap initializes acc
            if abs(dyr) <= 1 and abs(dxr) <= 1:
                t3 = tap * w3_ref[dyr + 1, dxr + 1, :].astype(tap_dtype)
                acc3 = t3 if acc3 is None else acc3 + t3

    # K=1 needs no halo; keep it out of the tap loop's live set.  Shift + ReLU6 clip and
    # the residual sum run in f32 regardless of tap_dtype.
    b1 = jnp.clip(x32 * w1_ref[0, 0, :] + shift_ref[0, :], 0.0, 6.0)
    b3 = jnp.clip(acc3.astype(jnp.float32) + shift_ref[1, :], 0.0, 6.0)
    b5 = jnp.clip(acc5.astype(jnp.float32) + shift_ref[2, :], 0.0, 6.0)
    out_ref[...] = (x32 + b1 + b3 + b5).astype(out_ref.dtype)


def _fold_weights(weights, scales, W, C, tap_dtype):
    """Fold BN scale AND the W-boundary validity mask into W-tiled depthwise weights."""
    cols = np.arange(W)
    fused = []
    for K, w, s in zip(KERNEL_SIZES, weights, scales):
        pad_k = K // 2
        base = w.astype(jnp.float32) * s.astype(jnp.float32)[None, None, :]     # (K, K, C)
        in_col = cols[None, :] + (np.arange(K) - pad_k)[:, None]                # (K, W)
        valid = jnp.asarray((in_col >= 0) & (in_col < W), jnp.float32)          # (K, W)
        wf = base[:, :, None, :] * valid[None, :, :, None]                      # (K, K, W, C)
        fused.append(wf.reshape(K, K, W * C))
    # 1x1 weight is only used on the f32 finalize path; the big tap weights get tap_dtype.
    return [fused[0].astype(jnp.float32),
            fused[1].astype(tap_dtype),
            fused[2].astype(tap_dtype)]


def _pick_b_tile(N, H, WC, itemsize, target_bytes=2 << 20):
    """Largest divisor of N giving >=2 grid steps, an 8-aligned sublane block dim and a
    block no larger than ~target_bytes; falls back to a single full-array step."""
    best = None
    for bt in range(1, N):                     # bt < N  =>  at least 2 grid steps
        if N % bt or (bt * H) % 8:
            continue
        if bt * H * WC * itemsize > target_bytes and best is not None:
            break
        best = bt
    return best if best is not None else N


def msconv_pallas(x_nhwc, weights, scales, shifts, *, tap_dtype=jnp.float32, b_tile=None):
    """x_nhwc: (N, H, W, C); weights: tuple of (K, K, C); scales/shifts: (3, C).

    tap_dtype=jnp.bfloat16 halves VALU work and vreg pressure of the 34-tap chain on
    v6e / v7x (bf16 VALUs); keep the f32 default on v5e (no bf16 VPU) and for tight
    tolerances.  The MXU is unused for depthwise conv, so all compute is VPU/XLU.
    """
    N, H, W, C = x_nhwc.shape
    WC = W * C
    assert WC % 128 == 0, "fused lane axis W*C must be a multiple of 128 (lane-dense stores)"
    assert W > 2 * MAX_PAD and H > 2 * MAX_PAD, "roll-based halo assumes image larger than halo"

    # Lane-dense layout: fuse (W, C) on the lane axis, (N, H) on the sublane axis.
    x2d = x_nhwc.reshape(N * H, WC)
    w1_f, w3_f, w5_f = _fold_weights(weights, scales, W, C, tap_dtype)
    shift_f = jnp.tile(shifts.astype(jnp.float32), (1, W))                      # (3, WC)

    if b_tile is None:
        b_tile = _pick_b_tile(N, H, WC, x_nhwc.dtype.itemsize)
    assert N % b_tile == 0
    R = b_tile * H
    grid = (N // b_tile,)

    kernel = functools.partial(_msconv_kernel, H=H, C=C, tap_dtype=tap_dtype)
    out = pl.pallas_call(
        kernel,
        out_shape=jax.ShapeDtypeStruct((N * H, WC), x_nhwc.dtype),
        grid=grid,
        in_specs=[
            pl.BlockSpec((R, WC), lambda i: (i, 0)),
            # Weight / shift blocks cover the full (tiny) arrays with a constant block
            # index, so they stay resident instead of being re-fetched every grid step.
            pl.BlockSpec((1, 1, WC), lambda i: (0, 0, 0)),
            pl.BlockSpec((3, 3, WC), lambda i: (0, 0, 0)),
            pl.BlockSpec((5, 5, WC), lambda i: (0, 0, 0)),
            pl.BlockSpec((len(KERNEL_SIZES), WC), lambda i: (0, 0)),
        ],
        out_specs=pl.BlockSpec((R, WC), lambda i: (i, 0)),
        compiler_params=pltpu.CompilerParams(
            dimension_semantics=("parallel",)),   # >=2 steps keeps both v7x TCs busy
        # At production H/W/C set vmem_limit_bytes explicitly (v7x scoped default is
        # 32 MiB of only 64 MiB physical); unnecessary at these block sizes.
    )(x2d, w1_f, w3_f, w5_f, shift_f)
    return out.reshape(N, H, W, C)


def msconv_reference(x_nhwc, weights, scales, shifts):
    """Pure-JAX reference (lax depthwise conv) with identical semantics."""
    N, H, W, C = x_nhwc.shape
    out = x_nhwc.astype(jnp.float32)
    for i, (K, w) in enumerate(zip(KERNEL_SIZES, weights)):
        rhs = w.reshape(K, K, 1, C)  # HWIO, feature_group_count=C
        y = lax.conv_general_dilated(
            x_nhwc.astype(jnp.float32), rhs.astype(jnp.float32),
            window_strides=(1, 1), padding="SAME",
            dimension_numbers=("NHWC", "HWIO", "NHWC"),
            feature_group_count=C)
        branch = jnp.clip(y * scales[i, :] + shifts[i, :], 0.0, 6.0)
        out = out + branch
    return out.astype(x_nhwc.dtype)


def make_params(key, dim):
    """Deterministic synthetic params; BatchNorm folded to (scale, shift) per branch."""
    weights, scales, shifts = [], [], []
    eps = 1e-5
    for K in KERNEL_SIZES:
        key, kw, kg, kb, km, kv = jax.random.split(key, 6)
        w = jax.random.normal(kw, (K, K, dim), jnp.float32) * 0.1
        gamma = jax.random.uniform(kg, (dim,), jnp.float32, 0.5, 1.5)
        beta = jax.random.normal(kb, (dim,), jnp.float32) * 0.1
        mean = jax.random.normal(km, (dim,), jnp.float32) * 0.1
        var = jax.random.uniform(kv, (dim,), jnp.float32, 0.5, 1.5)
        scale = gamma / jnp.sqrt(var + eps)
        shift = beta - mean * scale
        weights.append(w)
        scales.append(scale)
        shifts.append(shift)
    return tuple(weights), jnp.stack(scales), jnp.stack(shifts)
    # TODO(synk): BatchNorm is implemented in eval mode (folded running stats);
    # training-mode batch statistics are not computed in-kernel.


if __name__ == "__main__":
    key = jax.random.PRNGKey(0)
    k_x, k_p = jax.random.split(key)

    N, C, H, W = 2, 32, 16, 16          # PyTorch-style NCHW sizes
    x_nchw = jax.random.normal(k_x, (N, C, H, W), jnp.float32)
    x_nhwc = jnp.transpose(x_nchw, (0, 2, 3, 1))   # NHWC; (W,C) fused inside the wrapper

    weights, scales, shifts = make_params(k_p, C)

    out = msconv_pallas(x_nhwc, weights, scales, shifts)
    out = jax.block_until_ready(out)

    ref = msconv_reference(x_nhwc, weights, scales, shifts)
    assert out.shape == (N, H, W, C)
    err = jnp.max(jnp.abs(out - ref))
    assert err < 1e-3, f"mismatch vs JAX reference: {err}"

    print("KERNEL_OK")
</pallas_src>

<mosaic_0001>
module attributes {stable_mosaic.version = 11 : i64} {
  func.func @_msconv_kernel(%arg0: i32, %arg1: memref<16x512xf32, #tpu.memory_space<vmem>>, %arg2: memref<1x1x512xf32, #tpu.memory_space<vmem>>, %arg3: memref<3x3x512xf32, #tpu.memory_space<vmem>>, %arg4: memref<5x5x512xf32, #tpu.memory_space<vmem>>, %arg5: memref<3x512xf32, #tpu.memory_space<vmem>>, %arg6: memref<16x512xf32, #tpu.memory_space<vmem>>) attributes {dimension_semantics = [#tpu.dimension_semantics<parallel>], iteration_bounds = array<i64: 2>, scalar_prefetch = 0 : i64, scratch_operands = 0 : i64, tpu.core_type = #tpu.core_type<tc>, window_params = [{transform_indices = @transform_0, window_bounds = array<i64: 16, 512>}, {pipeline_mode = #tpu.pipeline_mode<synchronous>, transform_indices = @transform_1, window_bounds = array<i64: 1, 1, 512>}, {pipeline_mode = #tpu.pipeline_mode<synchronous>, transform_indices = @transform_2, window_bounds = array<i64: 3, 3, 512>}, {pipeline_mode = #tpu.pipeline_mode<synchronous>, transform_indices = @transform_3, window_bounds = array<i64: 5, 5, 512>}, {pipeline_mode = #tpu.pipeline_mode<synchronous>, transform_indices = @transform_4, window_bounds = array<i64: 3, 512>}, {transform_indices = @transform_5, window_bounds = array<i64: 16, 512>}]} {
    %c0 = arith.constant 0 : index
    %c0_0 = arith.constant 0 : index
    %0 = vector.load %arg1[%c0, %c0_0] : memref<16x512xf32, #tpu.memory_space<vmem>>, vector<16x512xf32>
    %1 = tpu.iota {dimensions = array<i32: 0>} : vector<16x1xi32>
    %c2_i32 = arith.constant 2 : i32
    %2 = tpu.dynamic_rotate %0 by %c2_i32 dim 0 : vector<16x512xf32>, i32 -> vector<16x512xf32>
    %c-2_i32 = arith.constant -2 : i32
    %3 = vector.broadcast %c-2_i32 : i32 to vector<16x1xi32>
    %4 = arith.addi %1, %3 : vector<16x1xi32>
    %c0_i32 = arith.constant 0 : i32
    %5 = vector.broadcast %c0_i32 : i32 to vector<16x1xi32>
    %6 = arith.cmpi sge, %4, %5 : vector<16x1xi32>
    %c-2_i32_1 = arith.constant -2 : i32
    %7 = vector.broadcast %c-2_i32_1 : i32 to vector<16x1xi32>
    %8 = arith.addi %1, %7 : vector<16x1xi32>
    %c16_i32 = arith.constant 16 : i32
    %9 = vector.broadcast %c16_i32 : i32 to vector<16x1xi32>
    %10 = arith.cmpi slt, %8, %9 : vector<16x1xi32>
    %11 = arith.andi %6, %10 : vector<16x1xi1>
    %cst = arith.constant 1.000000e+00 : f32
    %cst_2 = arith.constant 0.000000e+00 : f32
    %12 = vector.broadcast %cst : f32 to vector<16x1xf32>
    %13 = vector.broadcast %cst_2 : f32 to vector<16x1xf32>
    %14 = arith.select %11, %12, %13 : vector<16x1xi1>, vector<16x1xf32>
    %15 = vector.broadcast %14 : vector<16x1xf32> to vector<16x512xf32>
    %16 = arith.mulf %2, %15 : vector<16x512xf32>
    %c64_i32 = arith.constant 64 : i32
    %17 = tpu.dynamic_rotate %16 by %c64_i32 dim 1 : vector<16x512xf32>, i32 -> vector<16x512xf32>
    %c0_3 = arith.constant 0 : index
    %c0_4 = arith.constant 0 : index
    %c0_5 = arith.constant 0 : index
    %18 = vector.load %arg4[%c0_3, %c0_4, %c0_5] : memref<5x5x512xf32, #tpu.memory_space<vmem>>, vector<1x1x512xf32>
    %19 = vector.shape_cast %18 : vector<1x1x512xf32> to vector<512xf32>
    %20 = vector.shape_cast %19 : vector<512xf32> to vector<1x512xf32>
    %21 = vector.broadcast %20 : vector<1x512xf32> to vector<16x512xf32>
    %22 = arith.mulf %17, %21 : vector<16x512xf32>
    %c32_i32 = arith.constant 32 : i32
    %23 = tpu.dynamic_rotate %16 by %c32_i32 dim 1 : vector<16x512xf32>, i32 -> vector<16x512xf32>
    %c0_6 = arith.constant 0 : index
    %c1 = arith.constant 1 : index
    %c0_7 = arith.constant 0 : index
    %24 = vector.load %arg4[%c0_6, %c1, %c0_7] : memref<5x5x512xf32, #tpu.memory_space<vmem>>, vector<1x1x512xf32>
    %25 = vector.shape_cast %24 : vector<1x1x512xf32> to vector<512xf32>
    %26 = vector.shape_cast %25 : vector<512xf32> to vector<1x512xf32>
    %27 = vector.broadcast %26 : vector<1x512xf32> to vector<16x512xf32>
    %28 = arith.mulf %23, %27 : vector<16x512xf32>
    %29 = arith.addf %22, %28 : vector<16x512xf32>
    %c0_8 = arith.constant 0 : index
    %c2 = arith.constant 2 : index
    %c0_9 = arith.constant 0 : index
    %30 = vector.load %arg4[%c0_8, %c2, %c0_9] : memref<5x5x512xf32, #tpu.memory_space<vmem>>, vector<1x1x512xf32>
    %31 = vector.shape_cast %30 : vector<1x1x512xf32> to vector<512xf32>
    %32 = vector.shape_cast %31 : vector<512xf32> to vector<1x512xf32>
    %33 = vector.broadcast %32 : vector<1x512xf32> to vector<16x512xf32>
    %34 = arith.mulf %16, %33 : vector<16x512xf32>
    %35 = arith.addf %29, %34 : vector<16x512xf32>
    %c480_i32 = arith.constant 480 : i32
    %36 = tpu.dynamic_rotate %16 by %c480_i32 dim 1 : vector<16x512xf32>, i32 -> vector<16x512xf32>
    %c0_10 = arith.constant 0 : index
    %c3 = arith.constant 3 : index
    %c0_11 = arith.constant 0 : index
    %37 = vector.load %arg4[%c0_10, %c3, %c0_11] : memref<5x5x512xf32, #tpu.memory_space<vmem>>, vector<1x1x512xf32>
    %38 = vector.shape_cast %37 : vector<1x1x512xf32> to vector<512xf32>
    %39 = vector.shape_cast %38 : vector<512xf32> to vector<1x512xf32>
    %40 = vector.broadcast %39 : vector<1x512xf32> to vector<16x512xf32>
    %41 = arith.mulf %36, %40 : vector<16x512xf32>
    %42 = arith.addf %35, %41 : vector<16x512xf32>
    %c448_i32 = arith.constant 448 : i32
    %43 = tpu.dynamic_rotate %16 by %c448_i32 dim 1 : vector<16x512xf32>, i32 -> vector<16x512xf32>
    %c0_12 = arith.constant 0 : index
    %c4 = arith.constant 4 : index
    %c0_13 = arith.constant 0 : index
    %44 = vector.load %arg4[%c0_12, %c4, %c0_13] : memref<5x5x512xf32, #tpu.memory_space<vmem>>, vector<1x1x512xf32>
    %45 = vector.shape_cast %44 : vector<1x1x512xf32> to vector<512xf32>
    %46 = vector.shape_cast %45 : vector<512xf32> to vector<1x512xf32>
    %47 = vector.broadcast %46 : vector<1x512xf32> to vector<16x512xf32>
    %48 = arith.mulf %43, %47 : vector<16x512xf32>
    %49 = arith.addf %42, %48 : vector<16x512xf32>
    %c1_i32 = arith.constant 1 : i32
    %50 = tpu.dynamic_rotate %0 by %c1_i32 dim 0 : vector<16x512xf32>, i32 -> vector<16x512xf32>
    %c-1_i32 = arith.constant -1 : i32
    %51 = vector.broadcast %c-1_i32 : i32 to vector<16x1xi32>
    %52 = arith.addi %1, %51 : vector<16x1xi32>
    %c0_i32_14 = arith.constant 0 : i32
    %53 = vector.broadcast %c0_i32_14 : i32 to vector<16x1xi32>
    %54 = arith.cmpi sge, %52, %53 : vector<16x1xi32>
    %c-1_i32_15 = arith.constant -1 : i32
    %55 = vector.broadcast %c-1_i32_15 : i32 to vector<16x1xi32>
    %56 = arith.addi %1, %55 : vector<16x1xi32>
    %c16_i32_16 = arith.constant 16 : i32
    %57 = vector.broadcast %c16_i32_16 : i32 to vector<16x1xi32>
    %58 = arith.cmpi slt, %56, %57 : vector<16x1xi32>
    %59 = arith.andi %54, %58 : vector<16x1xi1>
    %cst_17 = arith.constant 1.000000e+00 : f32
    %cst_18 = arith.constant 0.000000e+00 : f32
    %60 = vector.broadcast %cst_17 : f32 to vector<16x1xf32>
    %61 = vector.broadcast %cst_18 : f32 to vector<16x1xf32>
    %62 = arith.select %59, %60, %61 : vector<16x1xi1>, vector<16x1xf32>
    %63 = vector.broadcast %62 : vector<16x1xf32> to vector<16x512xf32>
    %64 = arith.mulf %50, %63 : vector<16x512xf32>
    %c64_i32_19 = arith.constant 64 : i32
    %65 = tpu.dynamic_rotate %64 by %c64_i32_19 dim 1 : vector<16x512xf32>, i32 -> vector<16x512xf32>
    %c1_20 = arith.constant 1 : index
    %c0_21 = arith.constant 0 : index
    %c0_22 = arith.constant 0 : index
    %66 = vector.load %arg4[%c1_20, %c0_21, %c0_22] : memref<5x5x512xf32, #tpu.memory_space<vmem>>, vector<1x1x512xf32>
    %67 = vector.shape_cast %66 : vector<1x1x512xf32> to vector<512xf32>
    %68 = vector.shape_cast %67 : vector<512xf32> to vector<1x512xf32>
    %69 = vector.broadcast %68 : vector<1x512xf32> to vector<16x512xf32>
    %70 = arith.mulf %65, %69 : vector<16x512xf32>
    %71 = arith.addf %49, %70 : vector<16x512xf32>
    %c32_i32_23 = arith.constant 32 : i32
    %72 = tpu.dynamic_rotate %64 by %c32_i32_23 dim 1 : vector<16x512xf32>, i32 -> vector<16x512xf32>
    %c1_24 = arith.constant 1 : index
    %c1_25 = arith.constant 1 : index
    %c0_26 = arith.constant 0 : index
    %73 = vector.load %arg4[%c1_24, %c1_25, %c0_26] : memref<5x5x512xf32, #tpu.memory_space<vmem>>, vector<1x1x512xf32>
    %74 = vector.shape_cast %73 : vector<1x1x512xf32> to vector<512xf32>
    %75 = vector.shape_cast %74 : vector<512xf32> to vector<1x512xf32>
    %76 = vector.broadcast %75 : vector<1x512xf32> to vector<16x512xf32>
    %77 = arith.mulf %72, %76 : vector<16x512xf32>
    %78 = arith.addf %71, %77 : vector<16x512xf32>
    %c0_27 = arith.constant 0 : index
    %c0_28 = arith.constant 0 : index
    %c0_29 = arith.constant 0 : index
    %79 = vector.load %arg3[%c0_27, %c0_28, %c0_29] : memref<3x3x512xf32, #tpu.memory_space<vmem>>, vector<1x1x512xf32>
    %80 = vector.shape_cast %79 : vector<1x1x512xf32> to vector<512xf32>
    %81 = vector.shape_cast %80 : vector<512xf32> to vector<1x512xf32>
    %82 = vector.broadcast %81 : vector<1x512xf32> to vector<16x512xf32>
    %83 = arith.mulf %72, %82 : vector<16x512xf32>
    %c1_30 = arith.constant 1 : index
    %c2_31 = arith.constant 2 : index
    %c0_32 = arith.constant 0 : index
    %84 = vector.load %arg4[%c1_30, %c2_31, %c0_32] : memref<5x5x512xf32, #tpu.memory_space<vmem>>, vector<1x1x512xf32>
    %85 = vector.shape_cast %84 : vector<1x1x512xf32> to vector<512xf32>
    %86 = vector.shape_cast %85 : vector<512xf32> to vector<1x512xf32>
    %87 = vector.broadcast %86 : vector<1x512xf32> to vector<16x512xf32>
    %88 = arith.mulf %64, %87 : vector<16x512xf32>
    %89 = arith.addf %78, %88 : vector<16x512xf32>
    %c0_33 = arith.constant 0 : index
    %c1_34 = arith.constant 1 : index
    %c0_35 = arith.constant 0 : index
    %90 = vector.load %arg3[%c0_33, %c1_34, %c0_35] : memref<3x3x512xf32, #tpu.memory_space<vmem>>, vector<1x1x512xf32>
    %91 = vector.shape_cast %90 : vector<1x1x512xf32> to vector<512xf32>
    %92 = vector.shape_cast %91 : vector<512xf32> to vector<1x512xf32>
    %93 = vector.broadcast %92 : vector<1x512xf32> to vector<16x512xf32>
    %94 = arith.mulf %64, %93 : vector<16x512xf32>
    %95 = arith.addf %83, %94 : vector<16x512xf32>
    %c480_i32_36 = arith.constant 480 : i32
    %96 = tpu.dynamic_rotate %64 by %c480_i32_36 dim 1 : vector<16x512xf32>, i32 -> vector<16x512xf32>
    %c1_37 = arith.constant 1 : index
    %c3_38 = arith.constant 3 : index
    %c0_39 = arith.constant 0 : index
    %97 = vector.load %arg4[%c1_37, %c3_38, %c0_39] : memref<5x5x512xf32, #tpu.memory_space<vmem>>, vector<1x1x512xf32>
    %98 = vector.shape_cast %97 : vector<1x1x512xf32> to vector<512xf32>
    %99 = vector.shape_cast %98 : vector<512xf32> to vector<1x512xf32>
    %100 = vector.broadcast %99 : vector<1x512xf32> to vector<16x512xf32>
    %101 = arith.mulf %96, %100 : vector<16x512xf32>
    %102 = arith.addf %89, %101 : vector<16x512xf32>
    %c0_40 = arith.constant 0 : index
    %c2_41 = arith.constant 2 : index
    %c0_42 = arith.constant 0 : index
    %103 = vector.load %arg3[%c0_40, %c2_41, %c0_42] : memref<3x3x512xf32, #tpu.memory_space<vmem>>, vector<1x1x512xf32>
    %104 = vector.shape_cast %103 : vector<1x1x512xf32> to vector<512xf32>
    %105 = vector.shape_cast %104 : vector<512xf32> to vector<1x512xf32>
    %106 = vector.broadcast %105 : vector<1x512xf32> to vector<16x512xf32>
    %107 = arith.mulf %96, %106 : vector<16x512xf32>
    %108 = arith.addf %95, %107 : vector<16x512xf32>
    %c448_i32_43 = arith.constant 448 : i32
    %109 = tpu.dynamic_rotate %64 by %c448_i32_43 dim 1 : vector<16x512xf32>, i32 -> vector<16x512xf32>
    %c1_44 = arith.constant 1 : index
    %c4_45 = arith.constant 4 : index
    %c0_46 = arith.constant 0 : index
    %110 = vector.load %arg4[%c1_44, %c4_45, %c0_46] : memref<5x5x512xf32, #tpu.memory_space<vmem>>, vector<1x1x512xf32>
    %111 = vector.shape_cast %110 : vector<1x1x512xf32> to vector<512xf32>
    %112 = vector.shape_cast %111 : vector<512xf32> to vector<1x512xf32>
    %113 = vector.broadcast %112 : vector<1x512xf32> to vector<16x512xf32>
    %114 = arith.mulf %109, %113 : vector<16x512xf32>
    %115 = arith.addf %102, %114 : vector<16x512xf32>
    %c64_i32_47 = arith.constant 64 : i32
    %116 = tpu.dynamic_rotate %0 by %c64_i32_47 dim 1 : vector<16x512xf32>, i32 -> vector<16x512xf32>
    %c2_48 = arith.constant 2 : index
    %c0_49 = arith.constant 0 : index
    %c0_50 = arith.constant 0 : index
    %117 = vector.load %arg4[%c2_48, %c0_49, %c0_50] : memref<5x5x512xf32, #tpu.memory_space<vmem>>, vector<1x1x512xf32>
    %118 = vector.shape_cast %117 : vector<1x1x512xf32> to vector<512xf32>
    %119 = vector.shape_cast %118 : vector<512xf32> to vector<1x512xf32>
    %120 = vector.broadcast %119 : vector<1x512xf32> to vector<16x512xf32>
    %121 = arith.mulf %116, %120 : vector<16x512xf32>
    %122 = arith.addf %115, %121 : vector<16x512xf32>
    %c32_i32_51 = arith.constant 32 : i32
    %123 = tpu.dynamic_rotate %0 by %c32_i32_51 dim 1 : vector<16x512xf32>, i32 -> vector<16x512xf32>
    %c2_52 = arith.constant 2 : index
    %c1_53 = arith.constant 1 : index
    %c0_54 = arith.constant 0 : index
    %124 = vector.load %arg4[%c2_52, %c1_53, %c0_54] : memref<5x5x512xf32, #tpu.memory_space<vmem>>, vector<1x1x512xf32>
    %125 = vector.shape_cast %124 : vector<1x1x512xf32> to vector<512xf32>
    %126 = vector.shape_cast %125 : vector<512xf32> to vector<1x512xf32>
    %127 = vector.broadcast %126 : vector<1x512xf32> to vector<16x512xf32>
    %128 = arith.mulf %123, %127 : vector<16x512xf32>
    %129 = arith.addf %122, %128 : vector<16x512xf32>
    %c1_55 = arith.constant 1 : index
    %c0_56 = arith.constant 0 : index
    %c0_57 = arith.constant 0 : index
    %130 = vector.load %arg3[%c1_55, %c0_56, %c0_57] : memref<3x3x512xf32, #tpu.memory_space<vmem>>, vector<1x1x512xf32>
    %131 = vector.shape_cast %130 : vector<1x1x512xf32> to vector<512xf32>
    %132 = vector.shape_cast %131 : vector<512xf32> to vector<1x512xf32>
    %133 = vector.broadcast %132 : vector<1x512xf32> to vector<16x512xf32>
    %134 = arith.mulf %123, %133 : vector<16x512xf32>
    %135 = arith.addf %108, %134 : vector<16x512xf32>
    %c2_58 = arith.constant 2 : index
    %c2_59 = arith.constant 2 : index
    %c0_60 = arith.constant 0 : index
    %136 = vector.load %arg4[%c2_58, %c2_59, %c0_60] : memref<5x5x512xf32, #tpu.memory_space<vmem>>, vector<1x1x512xf32>
    %137 = vector.shape_cast %136 : vector<1x1x512xf32> to vector<512xf32>
    %138 = vector.shape_cast %137 : vector<512xf32> to vector<1x512xf32>
    %139 = vector.broadcast %138 : vector<1x512xf32> to vector<16x512xf32>
    %140 = arith.mulf %0, %139 : vector<16x512xf32>
    %141 = arith.addf %129, %140 : vector<16x512xf32>
    %c1_61 = arith.constant 1 : index
    %c1_62 = arith.constant 1 : index
    %c0_63 = arith.constant 0 : index
    %142 = vector.load %arg3[%c1_61, %c1_62, %c0_63] : memref<3x3x512xf32, #tpu.memory_space<vmem>>, vector<1x1x512xf32>
    %143 = vector.shape_cast %142 : vector<1x1x512xf32> to vector<512xf32>
    %144 = vector.shape_cast %143 : vector<512xf32> to vector<1x512xf32>
    %145 = vector.broadcast %144 : vector<1x512xf32> to vector<16x512xf32>
    %146 = arith.mulf %0, %145 : vector<16x512xf32>
    %147 = arith.addf %135, %146 : vector<16x512xf32>
    %c480_i32_64 = arith.constant 480 : i32
    %148 = tpu.dynamic_rotate %0 by %c480_i32_64 dim 1 : vector<16x512xf32>, i32 -> vector<16x512xf32>
    %c2_65 = arith.constant 2 : index
    %c3_66 = arith.constant 3 : index
    %c0_67 = arith.constant 0 : index
    %149 = vector.load %arg4[%c2_65, %c3_66, %c0_67] : memref<5x5x512xf32, #tpu.memory_space<vmem>>, vector<1x1x512xf32>
    %150 = vector.shape_cast %149 : vector<1x1x512xf32> to vector<512xf32>
    %151 = vector.shape_cast %150 : vector<512xf32> to vector<1x512xf32>
    %152 = vector.broadcast %151 : vector<1x512xf32> to vector<16x512xf32>
    %153 = arith.mulf %148, %152 : vector<16x512xf32>
    %154 = arith.addf %141, %153 : vector<16x512xf32>
    %c1_68 = arith.constant 1 : index
    %c2_69 = arith.constant 2 : index
    %c0_70 = arith.constant 0 : index
    %155 = vector.load %arg3[%c1_68, %c2_69, %c0_70] : memref<3x3x512xf32, #tpu.memory_space<vmem>>, vector<1x1x512xf32>
    %156 = vector.shape_cast %155 : vector<1x1x512xf32> to vector<512xf32>
    %157 = vector.shape_cast %156 : vector<512xf32> to vector<1x512xf32>
    %158 = vector.broadcast %157 : vector<1x512xf32> to vector<16x512xf32>
    %159 = arith.mulf %148, %158 : vector<16x512xf32>
    %160 = arith.addf %147, %159 : vector<16x512xf32>
    %c448_i32_71 = arith.constant 448 : i32
    %161 = tpu.dynamic_rotate %0 by %c448_i32_71 dim 1 : vector<16x512xf32>, i32 -> vector<16x512xf32>
    %c2_72 = arith.constant 2 : index
    %c4_73 = arith.constant 4 : index
    %c0_74 = arith.constant 0 : index
    %162 = vector.load %arg4[%c2_72, %c4_73, %c0_74] : memref<5x5x512xf32, #tpu.memory_space<vmem>>, vector<1x1x512xf32>
    %163 = vector.shape_cast %162 : vector<1x1x512xf32> to vector<512xf32>
    %164 = vector.shape_cast %163 : vector<512xf32> to vector<1x512xf32>
    %165 = vector.broadcast %164 : vector<1x512xf32> to vector<16x512xf32>
    %166 = arith.mulf %161, %165 : vector<16x512xf32>
    %167 = arith.addf %154, %166 : vector<16x512xf32>
    %c15_i32 = arith.constant 15 : i32
    %168 = tpu.dynamic_rotate %0 by %c15_i32 dim 0 : vector<16x512xf32>, i32 -> vector<16x512xf32>
    %c1_i32_75 = arith.constant 1 : i32
    %169 = vector.broadcast %c1_i32_75 : i32 to vector<16x1xi32>
    %170 = arith.addi %1, %169 : vector<16x1xi32>
    %c0_i32_76 = arith.constant 0 : i32
    %171 = vector.broadcast %c0_i32_76 : i32 to vector<16x1xi32>
    %172 = arith.cmpi sge, %170, %171 : vector<16x1xi32>
    %c1_i32_77 = arith.constant 1 : i32
    %173 = vector.broadcast %c1_i32_77 : i32 to vector<16x1xi32>
    %174 = arith.addi %1, %173 : vector<16x1xi32>
    %c16_i32_78 = arith.constant 16 : i32
    %175 = vector.broadcast %c16_i32_78 : i32 to vector<16x1xi32>
    %176 = arith.cmpi slt, %174, %175 : vector<16x1xi32>
    %177 = arith.andi %172, %176 : vector<16x1xi1>
    %cst_79 = arith.constant 1.000000e+00 : f32
    %cst_80 = arith.constant 0.000000e+00 : f32
    %178 = vector.broadcast %cst_79 : f32 to vector<16x1xf32>
    %179 = vector.broadcast %cst_80 : f32 to vector<16x1xf32>
    %180 = arith.select %177, %178, %179 : vector<16x1xi1>, vector<16x1xf32>
    %181 = vector.broadcast %180 : vector<16x1xf32> to vector<16x512xf32>
    %182 = arith.mulf %168, %181 : vector<16x512xf32>
    %c64_i32_81 = arith.constant 64 : i32
    %183 = tpu.dynamic_rotate %182 by %c64_i32_81 dim 1 : vector<16x512xf32>, i32 -> vector<16x512xf32>
    %c3_82 = arith.constant 3 : index
    %c0_83 = arith.constant 0 : index
    %c0_84 = arith.constant 0 : index
    %184 = vector.load %arg4[%c3_82, %c0_83, %c0_84] : memref<5x5x512xf32, #tpu.memory_space<vmem>>, vector<1x1x512xf32>
    %185 = vector.shape_cast %184 : vector<1x1x512xf32> to vector<512xf32>
    %186 = vector.shape_cast %185 : vector<512xf32> to vector<1x512xf32>
    %187 = vector.broadcast %186 : vector<1x512xf32> to vector<16x512xf32>
    %188 = arith.mulf %183, %187 : vector<16x512xf32>
    %189 = arith.addf %167, %188 : vector<16x512xf32>
    %c32_i32_85 = arith.constant 32 : i32
    %190 = tpu.dynamic_rotate %182 by %c32_i32_85 dim 1 : vector<16x512xf32>, i32 -> vector<16x512xf32>
    %c3_86 = arith.constant 3 : index
    %c1_87 = arith.constant 1 : index
    %c0_88 = arith.constant 0 : index
    %191 = vector.load %arg4[%c3_86, %c1_87, %c0_88] : memref<5x5x512xf32, #tpu.memory_space<vmem>>, vector<1x1x512xf32>
    %192 = vector.shape_cast %191 : vector<1x1x512xf32> to vector<512xf32>
    %193 = vector.shape_cast %192 : vector<512xf32> to vector<1x512xf32>
    %194 = vector.broadcast %193 : vector<1x512xf32> to vector<16x512xf32>
    %195 = arith.mulf %190, %194 : vector<16x512xf32>
    %196 = arith.addf %189, %195 : vector<16x512xf32>
    %c2_89 = arith.constant 2 : index
    %c0_90 = arith.constant 0 : index
    %c0_91 = arith.constant 0 : index
    %197 = vector.load %arg3[%c2_89, %c0_90, %c0_91] : memref<3x3x512xf32, #tpu.memory_space<vmem>>, vector<1x1x512xf32>
    %198 = vector.shape_cast %197 : vector<1x1x512xf32> to vector<512xf32>
    %199 = vector.shape_cast %198 : vector<512xf32> to vector<1x512xf32>
    %200 = vector.broadcast %199 : vector<1x512xf32> to vector<16x512xf32>
    %201 = arith.mulf %190, %200 : vector<16x512xf32>
    %202 = arith.addf %160, %201 : vector<16x512xf32>
    %c3_92 = arith.constant 3 : index
    %c2_93 = arith.constant 2 : index
    %c0_94 = arith.constant 0 : index
    %203 = vector.load %arg4[%c3_92, %c2_93, %c0_94] : memref<5x5x512xf32, #tpu.memory_space<vmem>>, vector<1x1x512xf32>
    %204 = vector.shape_cast %203 : vector<1x1x512xf32> to vector<512xf32>
    %205 = vector.shape_cast %204 : vector<512xf32> to vector<1x512xf32>
    %206 = vector.broadcast %205 : vector<1x512xf32> to vector<16x512xf32>
    %207 = arith.mulf %182, %206 : vector<16x512xf32>
    %208 = arith.addf %196, %207 : vector<16x512xf32>
    %c2_95 = arith.constant 2 : index
    %c1_96 = arith.constant 1 : index
    %c0_97 = arith.constant 0 : index
    %209 = vector.load %arg3[%c2_95, %c1_96, %c0_97] : memref<3x3x512xf32, #tpu.memory_space<vmem>>, vector<1x1x512xf32>
    %210 = vector.shape_cast %209 : vector<1x1x512xf32> to vector<512xf32>
    %211 = vector.shape_cast %210 : vector<512xf32> to vector<1x512xf32>
    %212 = vector.broadcast %211 : vector<1x512xf32> to vector<16x512xf32>
    %213 = arith.mulf %182, %212 : vector<16x512xf32>
    %214 = arith.addf %202, %213 : vector<16x512xf32>
    %c480_i32_98 = arith.constant 480 : i32
    %215 = tpu.dynamic_rotate %182 by %c480_i32_98 dim 1 : vector<16x512xf32>, i32 -> vector<16x512xf32>
    %c3_99 = arith.constant 3 : index
    %c3_100 = arith.constant 3 : index
    %c0_101 = arith.constant 0 : index
    %216 = vector.load %arg4[%c3_99, %c3_100, %c0_101] : memref<5x5x512xf32, #tpu.memory_space<vmem>>, vector<1x1x512xf32>
    %217 = vector.shape_cast %216 : vector<1x1x512xf32> to vector<512xf32>
    %218 = vector.shape_cast %217 : vector<512xf32> to vector<1x512xf32>
    %219 = vector.broadcast %218 : vector<1x512xf32> to vector<16x512xf32>
    %220 = arith.mulf %215, %219 : vector<16x512xf32>
    %221 = arith.addf %208, %220 : vector<16x512xf32>
    %c2_102 = arith.constant 2 : index
    %c2_103 = arith.constant 2 : index
    %c0_104 = arith.constant 0 : index
    %222 = vector.load %arg3[%c2_102, %c2_103, %c0_104] : memref<3x3x512xf32, #tpu.memory_space<vmem>>, vector<1x1x512xf32>
    %223 = vector.shape_cast %222 : vector<1x1x512xf32> to vector<512xf32>
    %224 = vector.shape_cast %223 : vector<512xf32> to vector<1x512xf32>
    %225 = vector.broadcast %224 : vector<1x512xf32> to vector<16x512xf32>
    %226 = arith.mulf %215, %225 : vector<16x512xf32>
    %227 = arith.addf %214, %226 : vector<16x512xf32>
    %c448_i32_105 = arith.constant 448 : i32
    %228 = tpu.dynamic_rotate %182 by %c448_i32_105 dim 1 : vector<16x512xf32>, i32 -> vector<16x512xf32>
    %c3_106 = arith.constant 3 : index
    %c4_107 = arith.constant 4 : index
    %c0_108 = arith.constant 0 : index
    %229 = vector.load %arg4[%c3_106, %c4_107, %c0_108] : memref<5x5x512xf32, #tpu.memory_space<vmem>>, vector<1x1x512xf32>
    %230 = vector.shape_cast %229 : vector<1x1x512xf32> to vector<512xf32>
    %231 = vector.shape_cast %230 : vector<512xf32> to vector<1x512xf32>
    %232 = vector.broadcast %231 : vector<1x512xf32> to vector<16x512xf32>
    %233 = arith.mulf %228, %232 : vector<16x512xf32>
    %234 = arith.addf %221, %233 : vector<16x512xf32>
    %c14_i32 = arith.constant 14 : i32
    %235 = tpu.dynamic_rotate %0 by %c14_i32 dim 0 : vector<16x512xf32>, i32 -> vector<16x512xf32>
    %c2_i32_109 = arith.constant 2 : i32
    %236 = vector.broadcast %c2_i32_109 : i32 to vector<16x1xi32>
    %237 = arith.addi %1, %236 : vector<16x1xi32>
    %c0_i32_110 = arith.constant 0 : i32
    %238 = vector.broadcast %c0_i32_110 : i32 to vector<16x1xi32>
    %239 = arith.cmpi sge, %237, %238 : vector<16x1xi32>
    %c2_i32_111 = arith.constant 2 : i32
    %240 = vector.broadcast %c2_i32_111 : i32 to vector<16x1xi32>
    %241 = arith.addi %1, %240 : vector<16x1xi32>
    %c16_i32_112 = arith.constant 16 : i32
    %242 = vector.broadcast %c16_i32_112 : i32 to vector<16x1xi32>
    %243 = arith.cmpi slt, %241, %242 : vector<16x1xi32>
    %244 = arith.andi %239, %243 : vector<16x1xi1>
    %cst_113 = arith.constant 1.000000e+00 : f32
    %cst_114 = arith.constant 0.000000e+00 : f32
    %245 = vector.broadcast %cst_113 : f32 to vector<16x1xf32>
    %246 = vector.broadcast %cst_114 : f32 to vector<16x1xf32>
    %247 = arith.select %244, %245, %246 : vector<16x1xi1>, vector<16x1xf32>
    %248 = vector.broadcast %247 : vector<16x1xf32> to vector<16x512xf32>
    %249 = arith.mulf %235, %248 : vector<16x512xf32>
    %c64_i32_115 = arith.constant 64 : i32
    %250 = tpu.dynamic_rotate %249 by %c64_i32_115 dim 1 : vector<16x512xf32>, i32 -> vector<16x512xf32>
    %c4_116 = arith.constant 4 : index
    %c0_117 = arith.constant 0 : index
    %c0_118 = arith.constant 0 : index
    %251 = vector.load %arg4[%c4_116, %c0_117, %c0_118] : memref<5x5x512xf32, #tpu.memory_space<vmem>>, vector<1x1x512xf32>
    %252 = vector.shape_cast %251 : vector<1x1x512xf32> to vector<512xf32>
    %253 = vector.shape_cast %252 : vector<512xf32> to vector<1x512xf32>
    %254 = vector.broadcast %253 : vector<1x512xf32> to vector<16x512xf32>
    %255 = arith.mulf %250, %254 : vector<16x512xf32>
    %256 = arith.addf %234, %255 : vector<16x512xf32>
    %c32_i32_119 = arith.constant 32 : i32
    %257 = tpu.dynamic_rotate %249 by %c32_i32_119 dim 1 : vector<16x512xf32>, i32 -> vector<16x512xf32>
    %c4_120 = arith.constant 4 : index
    %c1_121 = arith.constant 1 : index
    %c0_122 = arith.constant 0 : index
    %258 = vector.load %arg4[%c4_120, %c1_121, %c0_122] : memref<5x5x512xf32, #tpu.memory_space<vmem>>, vector<1x1x512xf32>
    %259 = vector.shape_cast %258 : vector<1x1x512xf32> to vector<512xf32>
    %260 = vector.shape_cast %259 : vector<512xf32> to vector<1x512xf32>
    %261 = vector.broadcast %260 : vector<1x512xf32> to vector<16x512xf32>
    %262 = arith.mulf %257, %261 : vector<16x512xf32>
    %263 = arith.addf %256, %262 : vector<16x512xf32>
    %c4_123 = arith.constant 4 : index
    %c2_124 = arith.constant 2 : index
    %c0_125 = arith.constant 0 : index
    %264 = vector.load %arg4[%c4_123, %c2_124, %c0_125] : memref<5x5x512xf32, #tpu.memory_space<vmem>>, vector<1x1x512xf32>
    %265 = vector.shape_cast %264 : vector<1x1x512xf32> to vector<512xf32>
    %266 = vector.shape_cast %265 : vector<512xf32> to vector<1x512xf32>
    %267 = vector.broadcast %266 : vector<1x512xf32> to vector<16x512xf32>
    %268 = arith.mulf %249, %267 : vector<16x512xf32>
    %269 = arith.addf %263, %268 : vector<16x512xf32>
    %c480_i32_126 = arith.constant 480 : i32
    %270 = tpu.dynamic_rotate %249 by %c480_i32_126 dim 1 : vector<16x512xf32>, i32 -> vector<16x512xf32>
    %c4_127 = arith.constant 4 : index
    %c3_128 = arith.constant 3 : index
    %c0_129 = arith.constant 0 : index
    %271 = vector.load %arg4[%c4_127, %c3_128, %c0_129] : memref<5x5x512xf32, #tpu.memory_space<vmem>>, vector<1x1x512xf32>
    %272 = vector.shape_cast %271 : vector<1x1x512xf32> to vector<512xf32>
    %273 = vector.shape_cast %272 : vector<512xf32> to vector<1x512xf32>
    %274 = vector.broadcast %273 : vector<1x512xf32> to vector<16x512xf32>
    %275 = arith.mulf %270, %274 : vector<16x512xf32>
    %276 = arith.addf %269, %275 : vector<16x512xf32>
    %c448_i32_130 = arith.constant 448 : i32
    %277 = tpu.dynamic_rotate %249 by %c448_i32_130 dim 1 : vector<16x512xf32>, i32 -> vector<16x512xf32>
    %c4_131 = arith.constant 4 : index
    %c4_132 = arith.constant 4 : index
    %c0_133 = arith.constant 0 : index
    %278 = vector.load %arg4[%c4_131, %c4_132, %c0_133] : memref<5x5x512xf32, #tpu.memory_space<vmem>>, vector<1x1x512xf32>
    %279 = vector.shape_cast %278 : vector<1x1x512xf32> to vector<512xf32>
    %280 = vector.shape_cast %279 : vector<512xf32> to vector<1x512xf32>
    %281 = vector.broadcast %280 : vector<1x512xf32> to vector<16x512xf32>
    %282 = arith.mulf %277, %281 : vector<16x512xf32>
    %283 = arith.addf %276, %282 : vector<16x512xf32>
    %c0_134 = arith.constant 0 : index
    %c0_135 = arith.constant 0 : index
    %c0_136 = arith.constant 0 : index
    %284 = vector.load %arg2[%c0_134, %c0_135, %c0_136] : memref<1x1x512xf32, #tpu.memory_space<vmem>>, vector<1x1x512xf32>
    %285 = vector.shape_cast %284 : vector<1x1x512xf32> to vector<512xf32>
    %286 = vector.shape_cast %285 : vector<512xf32> to vector<1x512xf32>
    %287 = vector.broadcast %286 : vector<1x512xf32> to vector<16x512xf32>
    %288 = arith.mulf %0, %287 : vector<16x512xf32>
    %c0_137 = arith.constant 0 : index
    %c0_138 = arith.constant 0 : index
    %289 = vector.load %arg5[%c0_137, %c0_138] : memref<3x512xf32, #tpu.memory_space<vmem>>, vector<1x512xf32>
    %290 = vector.shape_cast %289 : vector<1x512xf32> to vector<512xf32>
    %291 = vector.shape_cast %290 : vector<512xf32> to vector<1x512xf32>
    %292 = vector.broadcast %291 : vector<1x512xf32> to vector<16x512xf32>
    %293 = arith.addf %288, %292 : vector<16x512xf32>
    %cst_139 = arith.constant 0.000000e+00 : f32
    %cst_140 = arith.constant 6.000000e+00 : f32
    %294 = vector.broadcast %cst_139 : f32 to vector<16x512xf32>
    %295 = arith.maximumf %294, %293 : vector<16x512xf32>
    %296 = vector.broadcast %cst_140 : f32 to vector<16x512xf32>
    %297 = arith.minimumf %296, %295 : vector<16x512xf32>
    %c1_141 = arith.constant 1 : index
    %c0_142 = arith.constant 0 : index
    %298 = vector.load %arg5[%c1_141, %c0_142] : memref<3x512xf32, #tpu.memory_space<vmem>>, vector<1x512xf32>
    %299 = vector.shape_cast %298 : vector<1x512xf32> to vector<512xf32>
    %300 = vector.shape_cast %299 : vector<512xf32> to vector<1x512xf32>
    %301 = vector.broadcast %300 : vector<1x512xf32> to vector<16x512xf32>
    %302 = arith.addf %227, %301 : vector<16x512xf32>
    %cst_143 = arith.constant 0.000000e+00 : f32
    %cst_144 = arith.constant 6.000000e+00 : f32
    %303 = vector.broadcast %cst_143 : f32 to vector<16x512xf32>
    %304 = arith.maximumf %303, %302 : vector<16x512xf32>
    %305 = vector.broadcast %cst_144 : f32 to vector<16x512xf32>
    %306 = arith.minimumf %305, %304 : vector<16x512xf32>
    %c2_145 = arith.constant 2 : index
    %c0_146 = arith.constant 0 : index
    %307 = vector.load %arg5[%c2_145, %c0_146] : memref<3x512xf32, #tpu.memory_space<vmem>>, vector<1x512xf32>
    %308 = vector.shape_cast %307 : vector<1x512xf32> to vector<512xf32>
    %309 = vector.shape_cast %308 : vector<512xf32> to vector<1x512xf32>
    %310 = vector.broadcast %309 : vector<1x512xf32> to vector<16x512xf32>
    %311 = arith.addf %283, %310 : vector<16x512xf32>
    %cst_147 = arith.constant 0.000000e+00 : f32
    %cst_148 = arith.constant 6.000000e+00 : f32
    %312 = vector.broadcast %cst_147 : f32 to vector<16x512xf32>
    %313 = arith.maximumf %312, %311 : vector<16x512xf32>
    %314 = vector.broadcast %cst_148 : f32 to vector<16x512xf32>
    %315 = arith.minimumf %314, %313 : vector<16x512xf32>
    %316 = arith.addf %0, %297 : vector<16x512xf32>
    %317 = arith.addf %316, %306 : vector<16x512xf32>
    %318 = arith.addf %317, %315 : vector<16x512xf32>
    %c0_149 = arith.constant 0 : index
    %c0_150 = arith.constant 0 : index
    %319 = vector.load %arg6[%c0_149, %c0_150] : memref<16x512xf32, #tpu.memory_space<vmem>>, vector<16x512xf32>
    tpu.vector_store %arg6[%c0_149, %c0_150], %318 {strides = array<i32>} : memref<16x512xf32, #tpu.memory_space<vmem>>, vector<16x512xf32>,
    return
  }
  func.func @transform_0(%arg0: i32) -> (i32, i32) {
    %c0_i32 = arith.constant 0 : i32
    %c0_i32_0 = arith.constant 0 : i32
    return %arg0, %c0_i32 : i32, i32
  }
  func.func @transform_1(%arg0: i32) -> (i32, i32, i32) {
    %c0_i32 = arith.constant 0 : i32
    %c0_i32_0 = arith.constant 0 : i32
    %c0_i32_1 = arith.constant 0 : i32
    %c0_i32_2 = arith.constant 0 : i32
    return %c0_i32, %c0_i32_0, %c0_i32_1 : i32, i32, i32
  }
  func.func @transform_2(%arg0: i32) -> (i32, i32, i32) {
    %c0_i32 = arith.constant 0 : i32
    %c0_i32_0 = arith.constant 0 : i32
    %c0_i32_1 = arith.constant 0 : i32
    %c0_i32_2 = arith.constant 0 : i32
    return %c0_i32, %c0_i32_0, %c0_i32_1 : i32, i32, i32
  }
  func.func @transform_3(%arg0: i32) -> (i32, i32, i32) {
    %c0_i32 = arith.constant 0 : i32
    %c0_i32_0 = arith.constant 0 : i32
    %c0_i32_1 = arith.constant 0 : i32
    %c0_i32_2 = arith.constant 0 : i32
    return %c0_i32, %c0_i32_0, %c0_i32_1 : i32, i32, i32
  }
  func.func @transform_4(%arg0: i32) -> (i32, i32) {
    %c0_i32 = arith.constant 0 : i32
    %c0_i32_0 = arith.constant 0 : i32
    %c0_i32_1 = arith.constant 0 : i32
    return %c0_i32, %c0_i32_0 : i32, i32
  }
  func.func @transform_5(%arg0: i32) -> (i32, i32) {
    %c0_i32 = arith.constant 0 : i32
    %c0_i32_0 = arith.constant 0 : i32
    return %arg0, %c0_i32 : i32, i32
  }
}

</mosaic_0001>

<bundles_post_ra>
// kernel: tpu_custom_call.1
= control target key start
LH: loop header
LB: loop body
LE: loop exit
PB: predicated region body
PF: predicated region fallthrough
CT: control target
= control target key end

     0   :  { %10 = vsyncpa [#allocation3], 0  ;;  %s5403_s0 = inlined_call_operand.hbm [shape: f32[32,512], index: 0, kind: input, shape index: {}]   ;;  %s5404_s1 = inlined_call_operand.hbm [shape: f32[1,1,512], index: 1, kind: input, shape index: {}]   ;;  %s5405_s2 = inlined_call_operand.hbm [shape: f32[3,3,512], index: 2, kind: input, shape index: {}]   ;;  %s5406_s3 = inlined_call_operand.hbm [shape: f32[5,5,512], index: 3, kind: input, shape index: {}]   ;;  %s5407_s4 = inlined_call_operand.hbm [shape: f32[3,512], index: 4, kind: input, shape index: {}]   ;;  %s5408_s5 = inlined_call_operand.hbm [shape: f32[32,512], index: 5, kind: output, shape index: {}]  }
   0x1   :  { %12 = vsyncpa [#allocation3 + $0x1], 0 }
   0x2   :  { %13 = vsyncpa [#allocation6], 0 }
   0x3   :  { %14 = vsyncpa [#allocation9], 0 }
   0x4   :  { %15 = vsyncpa [#allocation4], 0 }
   0x5   :  { %17 = vsyncpa [#allocation4 + $0x1], 0  ;;  %s2867_s18 = smov 0   ;;  %s2869_s19 = smov 0  }
   0x6   :  { %s2871_s20 = smov 0   ;;  %s2873_s21 = smov 0  }
   0x7 LB: > { %s2888_s22 = sadd.s32 4294967295, %s2820_s21   ;;  %s2472_s23 = sadd.s32 4294967294, %s2820_s21   ;;  %s2820_s21 = sphi %s2873_s21, %s5786_s21   ;;  %s2816_s20 = sphi %s2871_s20, %s5785_s20   ;;  %s2812_s19 = sphi %s2869_s19, %s5784_s19   ;;  %s2808_s18 = sphi %s2867_s18, %s5783_s18  }
   0x8   : > { %p43_p0 = scmp.ne.s32.totalorder %s2812_s19, %s2808_s18  ;;  %p5409_p1 = scmp.eq.s32.totalorder %s2888_s22, 0 }
   0x9   : > { %p157_p3 = scmp.eq.s32.totalorder %s2472_s23, 1  ;;  %p2473_p5 = scmp.ge.s32.totalorder %s2820_s21, 1 }
   0xa   : > { %p2897_p4 = por %p5409_p1, %p43_p0  ;;  %p164_p7 = scmp.lt.s32.totalorder %s2820_s21, 3 }
   0xb   : > { %p2902_p6 = por %p157_p3, %p43_p0  ;;  %s2822_s27 = smov [#allocation5]  }
   0xc   : > { %s5524_s24 = scalar_select %p2897_p4, 1, 0 }
   0xd   : > { %s5525_s25 = scalar_select %p2902_p6, 1, 0 }
   0xe   : > { %p2907_p8 = pnand %p2473_p5, %p164_p7  ;;  %s177_s28 = sshll.u32 %s2822_s27, 4  ;;  %s178_s28 = int_to_ptr.vmem [resolvable:$true] %s177_s28 }
   0xf   : > { %s2823_s29 = smov [#allocation8]   ;;  %s2824_s7 = smov [#allocation7]  }
  0x10   : > { %s5526_s26 = scalar_select %p2907_p8, 1, 0 }
  0x11   : > { %p2520_p10 = pneg %p2907_p8  ;;  %s200_s30 = sshll.u32 %s2823_s29, 4  ;;  %s2920_s30 = int_to_ptr.vmem [resolvable:$true] %s200_s30 }
  0x12   : > { %s2922_s8 = sshll.u32 %s2824_s7, 4  ;;  %s2604_s11 = scalar_lea.hbm %s5404_s1, 64  ;;  %s188_s8 = int_to_ptr.vmem [resolvable:$true] %s2922_s8 }
  0x13   : > { %p2916_p11 = pnand %p2520_p10, %p5409_p1  ;;  %p2605_p12 = scmp.ne.s32.totalorder %s5404_s1, %s2604_s11 }
  0x14   : > { %p2611_p5 = scmp.lt.u32.totalorder %s2604_s11, %s5404_s1 }
  0x15   : > { %p2932_p13 = pneg %p2916_p11 }
  0x17   : > { %p2607_p0 = pnand %p2932_p13, %p2605_p12 }
  0x19   : > { %p2608_p3 = pneg %p2607_p0 }
  0x1b   : > { %p2613_p7 = pnand %p2611_p5, %p2608_p3 }
  0x1d   : > { %2616 = shalt.err (!%p2613_p7)
}
  0x1e   : > { %s2617_s17 = scalar_lea.vmem %s178_s28, 64  ;;  %p2625_p2 = scmp.lt.s32.totalorder %s178_s28, %s178_s28 }
  0x1f   : > { %p2618_p10 = scmp.ne.s32.totalorder %s178_s28, %s2617_s17  ;;  %p2626_p6 = scmp.lt.s32.totalorder %s2617_s17, %s2617_s17 }
  0x21   : > { %p2620_p9 = pnand %p2618_p10, %p2932_p13  ;;  %p2627_p4 = por %p2626_p6, %p2625_p2 }
  0x23   : > { %p2621_p1 = pneg %p2620_p9 }
  0x25   : > { %p2628_p8 = pnand %p2627_p4, %p2621_p1 }
  0x27   : > { %2631 = shalt.err (!%p2628_p8)
}
  0x28   : > { %2523 = dma.hbm_to_vmem [thread:$0]  (!%p2916_p11), %s5404_s1, 64, %s178_s28, [#allocation6]  }
  0x29   : > { %s2632_s9 = scalar_lea.hbm %s5406_s3, 2560 }
  0x2a   : > { %p2633_p9 = scmp.ne.s32.totalorder %s5406_s3, %s2632_s9  ;;  %p2639_p1 = scmp.lt.u32.totalorder %s2632_s9, %s5406_s3 }
  0x2c   : > { %p2635_p12 = pnand %p2633_p9, %p2932_p13 }
  0x2e   : > { %p2636_p2 = pneg %p2635_p12 }
  0x30   : > { %p2641_p4 = pnand %p2639_p1, %p2636_p2 }
  0x32   : > { %2644 = shalt.err (!%p2641_p4)
}
  0x33   : > { %s2645_s28 = scalar_lea.vmem %s2920_s30, 2560  ;;  %p2653_p3 = scmp.lt.s32.totalorder %s2920_s30, %s2920_s30 }
  0x34   : > { %p2646_p6 = scmp.ne.s32.totalorder %s2920_s30, %s2645_s28  ;;  %p2654_p5 = scmp.lt.s32.totalorder %s2645_s28, %s2645_s28 }
  0x36   : > { %p2648_p8 = pnand %p2646_p6, %p2932_p13  ;;  %p2655_p7 = por %p2654_p5, %p2653_p3 }
  0x38   : > { %p2649_p0 = pneg %p2648_p8 }
  0x3a   : > { %p2656_p10 = pnand %p2655_p7, %p2649_p0 }
  0x3c   : > { %2659 = shalt.err (!%p2656_p10)
}
  0x3d   : > { %s5412_s15 = smov 512   ;;  %s2826_s16 = smov 32  }
  0x3e   : > { %2529 = dma.hbm_to_vmem [thread:$0]  (!%p2916_p11), %s5406_s3, 2560, %s2920_s30, [#allocation9], %s5412_s15, %s5412_s15, %s2826_s16  }
  0x3f   : > { %s2660_s7 = scalar_lea.hbm %s5405_s2, 768 }
  0x40   : > { %p2661_p9 = scmp.ne.s32.totalorder %s5405_s2, %s2660_s7  ;;  %p2667_p1 = scmp.lt.u32.totalorder %s2660_s7, %s5405_s2 }
  0x42   : > { %p2663_p12 = pnand %p2661_p9, %p2932_p13 }
  0x44   : > { %p2664_p2 = pneg %p2663_p12 }
  0x46   : > { %p2669_p4 = pnand %p2667_p1, %p2664_p2 }
  0x48   : > { %2672 = shalt.err (!%p2669_p4)
}
  0x49   : > { %s2673_s13 = scalar_lea.vmem %s188_s8, 768  ;;  %p2681_p3 = scmp.lt.s32.totalorder %s188_s8, %s188_s8 }
  0x4a   : > { %p2674_p6 = scmp.ne.s32.totalorder %s188_s8, %s2673_s13  ;;  %p2682_p5 = scmp.lt.s32.totalorder %s2673_s13, %s2673_s13 }
  0x4c   : > { %p2676_p8 = pnand %p2674_p6, %p2932_p13  ;;  %p2683_p7 = por %p2682_p5, %p2681_p3 }
  0x4e   : > { %p2677_p0 = pneg %p2676_p8 }
  0x50   : > { %p2684_p10 = pnand %p2683_p7, %p2677_p0 }
  0x52   : > { %2687 = shalt.err (!%p2684_p10)
}
  0x53   : > { %s2827_s30 = smov 256   ;;  %s2828_s28 = smov 16  }
  0x54   : > { %2526 = dma.hbm_to_vmem [thread:$0]  (!%p2916_p11), %s5405_s2, 768, %s188_s8, [#allocation6], %s2827_s30, %s2827_s30, %s2828_s28  }
  0x55   : > { %s2829_s27 = smov [#allocation10]   ;;  %s2688_s10 = scalar_lea.hbm %s5407_s4, 256 }
  0x56   : > { %s214_s29 = sshll.u32 %s2829_s27, 4  ;;  %p2689_p9 = scmp.ne.s32.totalorder %s5407_s4, %s2688_s10  ;;  %s215_s29 = int_to_ptr.vmem [resolvable:$true] %s214_s29 }
  0x57   : > { %p2695_p1 = scmp.lt.u32.totalorder %s2688_s10, %s5407_s4 }
  0x58   : > { %p2691_p12 = pnand %p2689_p9, %p2932_p13 }
  0x5a   : > { %p2692_p2 = pneg %p2691_p12 }
  0x5c   : > { %p2697_p4 = pnand %p2695_p1, %p2692_p2 }
  0x5e   : > { %2700 = shalt.err (!%p2697_p4)
}
  0x5f   : > { %s2701_s8 = scalar_lea.vmem %s215_s29, 256  ;;  %p2709_p3 = scmp.lt.s32.totalorder %s215_s29, %s215_s29 }
  0x60   : > { %p2702_p6 = scmp.ne.s32.totalorder %s215_s29, %s2701_s8  ;;  %p2710_p5 = scmp.lt.s32.totalorder %s2701_s8, %s2701_s8 }
  0x62   : > { %p2704_p8 = pnand %p2702_p6, %p2932_p13  ;;  %p2711_p7 = por %p2710_p5, %p2709_p3 }
  0x64   : > { %p2705_p0 = pneg %p2704_p8 }
  0x66   : > { %p2712_p10 = pnand %p2711_p7, %p2705_p0 }
  0x68   : > { %2715 = shalt.err (!%p2712_p10)
}
  0x69   : > { %2532 = dma.hbm_to_vmem [thread:$0]  (!%p2916_p11), %s5407_s4, 256, %s215_s29, [#allocation9]  }
  0x6a   : > { %s3012_s14 = sadd.s32 1, %s2820_s21   ;;  %s30_s15 = sadd.s32 1, %s2816_s20 }
  0x6b   : > { %s27_s6 = ssub.s32 %s2820_s21, %s3012_s14  ;;  %p37_p13 = scmp.ne.s32.totalorder %s2816_s20, %s2812_s19 }
  0x6c   : > { %p28_p9 = scmp.eq.s32.totalorder %s27_s6, 0  ;;  %p38_p12 = scmp.eq.s32.totalorder %s2820_s21, 0 }
  0x6d   : > { %p5529_p2 = scmp.eq.s32.totalorder %s2888_s22, 1  ;;  %p2545_p4 = scmp.lt.s32.totalorder %s2820_s21, 2 }
  0x6e   : > { %s3028_s23 = scalar_select %p28_p9, %s2816_s20, %s30_s15  }
  0x6f   : > { %p3022_p1 = por %p5529_p2, %p37_p13  ;;  %p39_p6 = por %p38_p12, %p37_p13 }
  0x70   : > { %s225_s27 = sand.u32 1, %s2816_s20   ;;  %s2497_s29 = sshll.u32 %s2820_s21, 10 }
  0x71   : > { %s2479_s7 = sshll.u32 %s225_s27, 6  ;;  %s3035_s11 = scalar_lea.hbm %s5403_s0, %s2497_s29 }
  0x72   : > { %s229_s12 = scalar_lea.vmem [#allocation2], %s2479_s7  ;;  %p3039_p11 = pnand %p2545_p4, %p39_p6 }
  0x73   : > { %s237_s13 = sshll.u32 %s229_s12, 4  ;;  %s3043_s30 = scalar_lea.sflag [#allocation3], %s225_s27  ;;  %s3037_s13 = int_to_ptr.vmem [resolvable:$true] %s237_s13 }
  0x74   : > { %s2716_s28 = scalar_lea.hbm %s3035_s11, 1024  ;;  %p2718_p0 = pneg %p3039_p11 }
  0x75   : > { %p2717_p8 = scmp.ne.s32.totalorder %s3035_s11, %s2716_s28  ;;  %s2721_s7 = scalar_lea.hbm %s5403_s0, 2048 }
  0x76   : > { %p2722_p7 = scmp.lt.u32.totalorder %s3035_s11, %s5403_s0  ;;  %p2723_p10 = scmp.lt.u32.totalorder %s2721_s7, %s2716_s28 }
  0x77   : > { %p2719_p3 = pnand %p2718_p0, %p2717_p8  ;;  %p2725_p9 = scmp.lt.u32.totalorder %s2716_s28, %s3035_s11 }
  0x78   : > { %p2724_p13 = por %p2723_p10, %p2722_p7 }
  0x79   : > { %p2720_p5 = pneg %p2719_p3 }
  0x7a   : > { %p2726_p12 = por %p2725_p9, %p2724_p13 }
  0x7c   : > { %p2727_p2 = pnand %p2726_p12, %p2720_p5 }
  0x7e   : > { %2730 = shalt.err (!%p2727_p2)
}
  0x7f   : > { %s2731_s27 = scalar_lea.vmem %s3037_s13, 1024  ;;  %s2830_s10 = smov [#allocation2]  }
  0x80   : > { %p2732_p4 = scmp.ne.s32.totalorder %s3037_s13, %s2731_s27  ;;  %s2736_s12 = sshll.u32 %s2830_s10, 4  ;;  %s2737_s12 = int_to_ptr.vmem [resolvable:$false] %s2736_s12 }
  0x81   : > { %s2738_s15 = scalar_lea.vmem %s2737_s12, 2048  ;;  %p2739_p3 = scmp.lt.s32.totalorder %s3037_s13, %s2737_s12 }
  0x82   : > { %p2734_p6 = pnand %p2732_p4, %p2718_p0  ;;  %p2740_p7 = scmp.lt.s32.totalorder %s2738_s15, %s2731_s27 }
  0x84   : > { %p2735_p8 = pneg %p2734_p6  ;;  %p2741_p10 = por %p2740_p7, %p2739_p3 }
  0x86   : > { %p2742_p13 = pnand %p2741_p10, %p2735_p8 }
  0x88   : > { %2745 = shalt.err (!%p2742_p13)
}
  0x89   : > { %s5532_s28 = smov 512   ;;  %p5533_p0 = scmp.ne.s32.totalorder %s5526_s26, 0 }
  0x8a   : > { %2536 = dma.hbm_to_vmem [thread:$0]  (!%p3039_p11), %s3035_s11, 1024, %s3037_s13, %s3043_s30, %s5532_s28, %s5532_s28, %s2826_s16  }
  0x8b   : > { %249 = sbr.rel (%p5533_p0) target bundleno = 557 (0x22d), region = 40 }
  0x92   : > { %s3077_s6 = sand.u32 1, %s2812_s19   ;;  %p5534_p5 = scmp.ne.s32.totalorder %s5524_s24, 0 }
  0x93   : > { %s2484_s7 = sshll.u32 %s3077_s6, 6  ;;  %s252_s29 = scalar_lea.sflag [#allocation3], %s3077_s6 }
  0x94   : > { %s3083_s8 = scalar_lea.vmem [#allocation2], %s2484_s7 }
  0x95   : > { %2791 = dma.done.wait (%p5534_p5), %s252_s29, 1024  }
  0x96   : > { %2793 = vsyncadd (%p5534_p5), %s252_s29, 4294966272  ;;  %p5535_p11 = scmp.eq.s32.totalorder %s2888_s22, 0 }
  0x98   : > { %2795 = dma.done.wait (%p5535_p11), [#allocation6], 832   ;;  %p5536_p9 = pmov %p5535_p11 }
  0x9a   : > { %2797 = vsyncadd (%p5536_p9), [#allocation6], 4294966464  ;;  %p5537_p12 = pmov %p5536_p9 }
  0x9b   : > { %p5538_p2 = pmov %p5536_p9 }
  0x9c   : > { %2799 = dma.done.wait (%p5537_p12), [#allocation9], 2816  }
  0x9d   : > { %2801 = vsyncadd (%p5538_p2), [#allocation9], 4294964480  ;;  %v308_v0 = vlaneseq  ;;  %v3102_v3 = vld [vmem:[%s3083_s8 + $0x8] sm:$0xff]  ;;  %v3111_v7 = vld [vmem:[%s3083_s8] sm:$0xff]  ;;  %s2831_s24 = smov 64   ;;  %v5413_v20 = vmov 0.0  }
  0x9e   : > { %v3105_v4 = vld [vmem:[%s3083_s8 + $0x28] sm:$0xff]  ;;  %v312_v5 = vrot.slane %v3102_v3, 6  ;;  %v3114_v8 = vld [vmem:[%s3083_s8 + $0x20] sm:$0xff]  ;;  %v3117_v9 = vld [vmem:[%s3083_s8 + $0x10] sm:$0xff]  ;;  %v311_v10 = vrot.slane %v3111_v7, 6  ;;  %s2833_s26 = smov 32  }
  0x9f   : > { %v3098_v1 = vshrl.u32 %v308_v0, 7  ;;  %5539 = vst [vmem:[#allocation16_spill] sm:$0xff] %v3105_v4  ;;  %v316_v6 = vrot.slane %v3105_v4, 6  ;;  %5540 = vst [vmem:[#allocation17_spill] sm:$0xff] %v3117_v9  ;;  %v315_v11 = vrot.slane %v3114_v8, 6  ;;  %v3122_v12 = vld [vmem:[%s3083_s8 + $0x30] sm:$0xff] }
  0xa0   : > { %5541 = vst [vmem:[#allocation18_spill] sm:$0xff] %v3122_v12  ;;  %v313_v13 = vrot.slane %v3117_v9, 6  ;;  %v3126_v14 = vld [vmem:[%s3083_s8 + $0x18] sm:$0xff]  ;;  %v317_v17 = vrot.slane %v3122_v12, 6  ;;  %s2834_s16 = smov 96   ;;  %v609_v34 = vrot.slane %v3111_v7, 7 }
  0xa1   : > { %v328_v2 = vadd.s32 4294967294, %v3098_v1  ;;  %vm319_vm0 = vcmp.lt.s32.totalorder %v3098_v1, 2  ;;  %5542 = vst [vmem:[#allocation19_spill] sm:$0xff] %v3126_v14  ;;  %v3129_v15 = vld [vmem:[%s3083_s8 + $0x38] sm:$0xff]  ;;  %v314_v24 = vrot.slane %v3126_v14, 6  ;;  %v626_v33 = vadd.s32 4294967295, %v3098_v1 }
  0xa2   : > { %5543 = vst [vmem:[#allocation20_spill] sm:$0xff] %v3129_v15  ;;  %v3133_v16 = vsel %vm319_vm0, %v312_v5, %v316_v6  ;;  %v3140_v18 = vsel %vm319_vm0, %v311_v10, %v315_v11  ;;  %v324_v19 = vsel %vm319_vm0, %v315_v11, %v311_v10  ;;  %v3149_v22 = vsel %vm319_vm0, %v313_v13, %v317_v17  ;;  %v468_v60 = vld [vmem:[#allocation8 + $0x2] ss:$8 sm:$0xf]  ;;  %s5325_s11 = scalar_lea.vmem [#allocation11], %s2484_s7  ;;  %s2499_s13 = sshll.u32 %s2888_s22, 10 }
  0xa3   : > { %vm330_vm1 = vcmp.ge.s32.totalorder %v328_v2, 0  ;;  %352 = vrot.lane.b32.xlu1 %v3133_v16, %s2831_s24  ;;  %348 = vrot.lane.b32.xlu0 %v3140_v18, %s2831_s24  ;;  %v318_v25 = vrot.slane %v3129_v15, 6  ;;  %v326_v26 = vsel %vm319_vm0, %v317_v17, %v313_v13  ;;  %v325_v29 = vsel %vm319_vm0, %v316_v6, %v312_v5  ;;  %s2341_s30 = sshll.u32 %s5325_s11, 4  ;;  %s5354_s10 = scalar_lea.hbm %s5408_s5, %s2499_s13  ;;  %s5356_s30 = int_to_ptr.vmem [resolvable:$true] %s2341_s30 }
  0xa4   : > { %v336_v21 = vsel %vm330_vm1, 1.0, %v5413_v20  ;;  %v613_v35 = vrot.slane %v3114_v8, 7  ;;  %vm617_vm2 = vcmp.lt.s32.totalorder %v3098_v1, 1  ;;  %vm628_vm3 = vcmp.ge.s32.totalorder %v626_v33, 0  ;;  %s2327_s22 = scalar_lea.sflag [#allocation4], %s3077_s6  ;;  %s2746_s12 = scalar_lea.vmem %s5356_s30, 1024 }
  0xa5   : > { %v3151_v23 = vmul.f32 %v336_v21, %v324_v19  ;;  %v3163_v27 = vsel %vm319_vm0, %v314_v24, %v318_v25  ;;  %v3165_v28 = vmul.f32 %v336_v21, %v326_v26  ;;  %v327_v30 = vsel %vm319_vm0, %v318_v25, %v314_v24  ;;  %v429_v26 = vld [vmem:[#allocation8 + $0x1] ss:$8 sm:$0xf]  ;;  %p2747_p4 = scmp.ne.s32.totalorder %s5356_s30, %s2746_s12  ;;  %s2835_s15 = smov [#allocation11]  }
  0xa6   : > { %v3173_v31 = vmul.f32 %v336_v21, %v325_v29  ;;  %v3177_v32 = vmul.f32 %v336_v21, %v327_v30  ;;  %v622_v36 = vsel %vm617_vm2, %v613_v35, %v609_v34  ;;  %v634_v37 = vsel %vm628_vm3, 1.0, %v5413_v20  ;;  %v373_v21 = vld [vmem:[#allocation8] ss:$8 sm:$0xf]  ;;  %s2750_s28 = sshll.u32 %s2835_s15, 4  ;;  %s2751_s28 = int_to_ptr.vmem [resolvable:$false] %s2750_s28 }
  0xa7   : > { %356 = vrot.lane.b32.xlu1 %v3149_v22, %s2831_s24  ;;  %346 = vrot.lane.b32.xlu0 %v3151_v23, %s2831_s24  ;;  %v610_v38 = vrot.slane %v3102_v3, 7  ;;  %v614_v39 = vrot.slane %v3105_v4, 7  ;;  %v3226_v40 = vsel %vm617_vm2, %v609_v34, %v613_v35  ;;  %v3228_v41 = vmul.f32 %v634_v37, %v622_v36  ;;  %p2748_p6 = pnand %p2747_p4, %p3022_p1  ;;  %s2752_s7 = scalar_lea.vmem %s2751_s28, 2048 }
  0xa8   : > { %5544 = vst [vmem:[#allocation21_spill] sm:$0xff] %v3226_v40  ;;  %v611_v43 = vrot.slane %v3117_v9, 7  ;;  %v615_v44 = vrot.slane %v3122_v12, 7  ;;  %v612_v48 = vrot.slane %v3126_v14, 7  ;;  %v616_v49 = vrot.slane %v3129_v15, 7  ;;  %p2753_p3 = scmp.lt.s32.totalorder %s5356_s30, %s2751_s28  ;;  %p2754_p7 = scmp.lt.s32.totalorder %s2752_s7, %s2746_s12 }
  0xa9   : > { %5545 = vst [vmem:[#allocation22_spill] sm:$0xff] %v3228_v41  ;;  %v623_v42 = vsel %vm617_vm2, %v614_v39, %v610_v38  ;;  %v3240_v45 = vsel %vm617_vm2, %v610_v38, %v614_v39  ;;  %v3341_v59 = vadd.s32 8, %v3098_v1  ;;  %v3348_v62 = vand.u32 127, %v308_v0  ;;  %p2749_p8 = pneg %p2748_p6 }
  0xaa   : > { %v3242_v46 = vmul.f32 %v634_v37, %v623_v42  ;;  %v624_v47 = vsel %vm617_vm2, %v615_v44, %v611_v43  ;;  %v3254_v50 = vsel %vm617_vm2, %v611_v43, %v615_v44  ;;  %v625_v52 = vsel %vm617_vm2, %v616_v49, %v612_v48  ;;  %p2755_p10 = por %p2754_p7, %p2753_p3 }
  0xab   : > { %360 = vrot.lane.b32.xlu1 %v3163_v27, %s2831_s24  ;;  %354 = vrot.lane.b32.xlu0 %v3165_v28, %s2831_s24  ;;  %v3256_v51 = vmul.f32 %v634_v37, %v624_v47  ;;  %v3266_v53 = vsel %vm617_vm2, %v612_v48, %v616_v49  ;;  %v3268_v54 = vmul.f32 %v634_v37, %v625_v52  ;;  %v3351_v63 = vsub.s32 0, %v3098_v1 }
  0xac   : > { %5547 = vst [vmem:[#allocation24_spill] sm:$0xff] %v3266_v53  ;;  %v3354_v2 = vsub.s32 1, %v3098_v1  ;;  %v3357_v5 = vsub.s32 2, %v3098_v1  ;;  %v3362_v10 = vsub.s32 3, %v3098_v1  ;;  %v1421_v0 = vadd.s32 1, %v3341_v59  ;;  %p2756_p13 = pnand %p2755_p10, %p2749_p8 }
  0xad   : > { %5546 = vst [vmem:[#allocation23_spill] sm:$0xff] %v3256_v51  ;;  %5548 = vst [vmem:[#allocation25_spill] sm:$0xff] %v3268_v54  ;;  %v473_v13 = vrot.slane %v468_v60, %v3351_v63  ;;  %vm364_vm4 = vcmp.lt.s32.totalorder %v3348_v62, 64  ;;  %v1403_v29 = vrot.slane %v3111_v7, 1  ;;  %v1407_v30 = vrot.slane %v3114_v8, 1 }
  0xae   : > { %5549 = vst [vmem:[#allocation26_spill] sm:$0xff] %v3351_v63  ;;  %5550 = vst [vmem:[#allocation27_spill] sm:$0xff] %v3362_v10  ;;  %v477_v11 = vrot.slane %v468_v60, %v3354_v2  ;;  %v481_v17 = vrot.slane %v468_v60, %v3357_v5  ;;  %v485_v19 = vrot.slane %v468_v60, %v3362_v10  ;;  %vm1411_vm5 = vcmp.lt.s32.totalorder %v3098_v1, 7 }
  0xaf   : > { %350 = vrot.lane.b32.xlu1 %v3173_v31, %s2831_s24  ;;  %358 = vrot.lane.b32.xlu0 %v3177_v32, %s2831_s24  ;;  %vm1425_vm6 = vcmp.lt.s32.totalorder %v1421_v0, 16  ;;  %v5416_v33 = vrot.slane %v3102_v3, 1  ;;  %v5417_v34 = vrot.slane %v3105_v4, 1  ;;  %vm419_vm7 = vcmp.lt.s32.totalorder %v3348_v62, 32 }
  0xb0   : > { %v495_v35 = vmul.f32 %v477_v11, %v3133_v16  ;;  %v3386_v36 = vmul.f32 %v473_v13, %v3140_v18  ;;  %v3389_v37 = vmul.f32 %v481_v17, %v3149_v22  ;;  %v3394_v38 = vmul.f32 %v485_v19, %v3163_v27 }
  0xb1   : > { %v382_v39 = vrot.slane %v373_v21, %v3354_v2  ;;  %v386_v42 = vrot.slane %v373_v21, %v3357_v5  ;;  %v378_v43 = vrot.slane %v373_v21, %v3351_v63  ;;  %v1416_v47 = vsel %vm1411_vm5, %v1407_v30, %v1403_v29 }
  0xb2   : > { %v442_v48 = vrot.slane %v429_v26, %v3357_v5  ;;  %v3415_v49 = vrot.slane %v429_v26, %v3351_v63  ;;  %v1417_v52 = vsel %vm1411_vm5, %v5417_v34, %v5416_v33  ;;  %v491_v60 = vmul.f32 %v477_v11, %v3173_v31 }
  0xb3   : > { %405 = vrot.lane.b32.xlu1 %v3140_v18, %s2833_s26  ;;  %403 = vrot.lane.b32.xlu0 %v3151_v23, %s2833_s26  ;;  %v3445_v34 = vsel %vm1411_vm5, %v1403_v29, %v1407_v30  ;;  %vm522_vm8 = vcmp.lt.s32.totalorder %v3348_v62, 96  ;;  %vm1830_vm9 = vcmp.lt.s32.totalorder %v3098_v1, 6 }
  0xb4   : > { %5552 = vst [vmem:[#allocation29_spill] sm:$0xff] %v3445_v34 }
  0xb7   : > { %409 = vrot.lane.b32.xlu1 %v3133_v16, %s2833_s26  ;;  %407 = vrot.lane.b32.xlu0 %v3173_v31, %s2833_s26 }
  0xbb   : > { %413 = vrot.lane.b32.xlu1 %v3149_v22, %s2833_s26  ;;  %411 = vrot.lane.b32.xlu0 %v3165_v28, %s2833_s26 }
  0xbf   : > { %417 = vrot.lane.b32.xlu1 %v3163_v27, %s2833_s26  ;;  %415 = vrot.lane.b32.xlu0 %v3177_v32, %s2833_s26 }
  0xc3   : > { %508 = vrot.lane.b32.xlu1 %v3140_v18, %s2834_s16  ;;  %506 = vrot.lane.b32.xlu0 %v3151_v23, %s2834_s16 }
  0xc7   : > { %512 = vrot.lane.b32.xlu1 %v3133_v16, %s2834_s16  ;;  %510 = vrot.lane.b32.xlu0 %v3173_v31, %s2834_s16  ;;  %v390_v16 = vrot.slane %v373_v21, %v3362_v10  ;;  %v446_v21 = vrot.slane %v429_v26, %v3362_v10 }
  0xcb   : > { %516 = vrot.lane.b32.xlu1 %v3149_v22, %s2834_s16  ;;  %514 = vrot.lane.b32.xlu0 %v3165_v28, %s2834_s16  ;;  %v438_v22 = vrot.slane %v429_v26, %v3354_v2 }
  0xcf   : > { %520 = vrot.lane.b32.xlu1 %v3163_v27, %s2834_s16  ;;  %518 = vrot.lane.b32.xlu0 %v3177_v32, %s2834_s16  ;;  %v3409_v27 = vsel %vm1425_vm6, 1.0, %v5413_v20 }
  0xd0   : > { %v3441_v11 = vmul.f32 %v3409_v27, %v1416_v47  ;;  %v3458_v47 = vmul.f32 %v3409_v27, %v1417_v52 }
  0xd2   : > { %5551 = vst [vmem:[#allocation28_spill] sm:$0xff] %v3441_v11  ;;  %5553 = vst [vmem:[#allocation30_spill] sm:$0xff] %v3458_v47 }
  0xd3   : > { %646 = vrot.lane.b32.xlu1 %v3226_v40, %s2831_s24  ;;  %644 = vrot.lane.b32.xlu0 %v3228_v41, %s2831_s24 }
  0xd7   : > { %650 = vrot.lane.b32.xlu1 %v3240_v45, %s2831_s24  ;;  %648 = vrot.lane.b32.xlu0 %v3242_v46, %s2831_s24 }
  0xdb   : > { %654 = vrot.lane.b32.xlu1 %v3254_v50, %s2831_s24  ;;  %652 = vrot.lane.b32.xlu0 %v3256_v51, %s2831_s24 }
  0xdf   : > { %658 = vrot.lane.b32.xlu1 %v3266_v53, %s2831_s24  ;;  %656 = vrot.lane.b32.xlu0 %v3268_v54, %s2831_s24 }
  0xe3   : > { %709 = vrot.lane.b32.xlu1 %v3226_v40, %s2833_s26  ;;  %707 = vrot.lane.b32.xlu0 %v3228_v41, %s2833_s26 }
  0xe7   : > { %713 = vrot.lane.b32.xlu1 %v3240_v45, %s2833_s26  ;;  %711 = vrot.lane.b32.xlu0 %v3242_v46, %s2833_s26 }
  0xeb   : > { %717 = vrot.lane.b32.xlu1 %v3254_v50, %s2833_s26  ;;  %715 = vrot.lane.b32.xlu0 %v3256_v51, %s2833_s26 }
  0xef   : > { %721 = vrot.lane.b32.xlu1 %v3266_v53, %s2833_s26  ;;  %719 = vrot.lane.b32.xlu0 %v3268_v54, %s2833_s26 }
  0xf3   : > { %880 = vrot.lane.b32.xlu1 %v3226_v40, %s2834_s16  ;;  %878 = vrot.lane.b32.xlu0 %v3228_v41, %s2834_s16  ;;  %v492_v41 = vmul.f32 %v481_v17, %v3165_v28 }
  0xf7   : > { %884 = vrot.lane.b32.xlu1 %v3240_v45, %s2834_s16  ;;  %882 = vrot.lane.b32.xlu0 %v3242_v46, %s2834_s16 }
  0xfb   : > { %888 = vrot.lane.b32.xlu1 %v3254_v50, %s2834_s16  ;;  %886 = vrot.lane.b32.xlu0 %v3256_v51, %s2834_s16 }
  0xff   : > { %892 = vrot.lane.b32.xlu1 %v3266_v53, %s2834_s16  ;;  %890 = vrot.lane.b32.xlu0 %v3268_v54, %s2834_s16  ;;  %v3461_v53 = vmul.f32 %v473_v13, %v3151_v23  ;;  %v5554_v23 = vrot.slane %v3117_v9, 1 }
 0x103   : > { %1021 = vrot.lane.b32.xlu1 %v3114_v8, %s2831_s24  ;;  %1019 = vrot.lane.b32.xlu0 %v3111_v7, %s2831_s24 }
 0x107   : > { %1025 = vrot.lane.b32.xlu1 %v3105_v4, %s2831_s24  ;;  %1023 = vrot.lane.b32.xlu0 %v3102_v3, %s2831_s24 }
 0x10b   : > { %1029 = vrot.lane.b32.xlu1 %v3122_v12, %s2831_s24  ;;  %1027 = vrot.lane.b32.xlu0 %v3117_v9, %s2831_s24 }
 0x10f   : > { %1033 = vrot.lane.b32.xlu1 %v3129_v15, %s2831_s24  ;;  %1031 = vrot.lane.b32.xlu0 %v3126_v14, %s2831_s24 }
 0x113   : > { %1084 = vrot.lane.b32.xlu1 %v3114_v8, %s2833_s26  ;;  %1082 = vrot.lane.b32.xlu0 %v3111_v7, %s2833_s26 }
 0x115   : > { %v3326_v55 = vpop.permute.xlu1 %352  ;;  %v3328_v56 = vpop.permute.xlu0 %348 }
 0x116   : > { %v3428_v0 = vsel %vm364_vm4, %v3328_v56, %v3326_v55 }
 0x117   : > { %1088 = vrot.lane.b32.xlu1 %v3105_v4, %s2833_s26  ;;  %1086 = vrot.lane.b32.xlu0 %v3102_v3, %s2833_s26  ;;  %v400_v29 = vmul.f32 %v382_v39, %v3428_v0 }
 0x119   : > { %v3334_v57 = vpop.permute.xlu1 %356  ;;  %v3336_v58 = vpop.permute.xlu0 %346 }
 0x11a   : > { %v3452_v26 = vsel %vm364_vm4, %v3326_v55, %v3334_v57  ;;  %v3470_v55 = vmul.f32 %v485_v19, %v3177_v32 }
 0x11b   : > { %1092 = vrot.lane.b32.xlu1 %v3122_v12, %s2833_s26  ;;  %1090 = vrot.lane.b32.xlu0 %v3117_v9, %s2833_s26  ;;  %v401_v51 = vmul.f32 %v386_v42, %v3452_v26 }
 0x11d   : > { %v3345_v61 = vpop.permute.xlu1 %360  ;;  %v3359_v6 = vpop.permute.xlu0 %354 }
 0x11e   : > { %v3487_v32 = vsel %vm364_vm4, %v3334_v57, %v3345_v61 }
 0x11f   : > { %1096 = vrot.lane.b32.xlu1 %v3129_v15, %s2833_s26  ;;  %1094 = vrot.lane.b32.xlu0 %v3126_v14, %s2833_s26 }
 0x121   : > { %v351_v24 = vpop.permute.xlu1 %350  ;;  %v3374_v25 = vpop.permute.xlu0 %358 }
 0x122   : > { %v3438_v33 = vsel %vm364_vm4, %v3336_v58, %v351_v24  ;;  %v3492_v19 = vsel %vm364_vm4, %v351_v24, %v3359_v6 }
 0x123   : > { %1264 = vrot.lane.b32.xlu1 %v3114_v8, %s2834_s16  ;;  %1262 = vrot.lane.b32.xlu0 %v3111_v7, %s2834_s16  ;;  %v396_v30 = vmul.f32 %v382_v39, %v3438_v33 }
 0x125   : > { %v3399_v44 = vpop.permute.xlu1 %405  ;;  %v3402_v18 = vpop.permute.xlu0 %403 }
 0x127   : > { %1268 = vrot.lane.b32.xlu1 %v3105_v4, %s2834_s16  ;;  %1266 = vrot.lane.b32.xlu0 %v3102_v3, %s2834_s16 }
 0x129   : > { %v410_v31 = vpop.permute.xlu1 %409  ;;  %v408_v20 = vpop.permute.xlu0 %407 }
 0x12a   : > { %v425_v54 = vsel %vm419_vm7, %v3399_v44, %v410_v31  ;;  %v424_v17 = vsel %vm419_vm7, %v3402_v18, %v408_v20 }
 0x12b   : > { %v456_v28 = vmul.f32 %v438_v22, %v425_v54  ;;  %1272 = vrot.lane.b32.xlu1 %v3122_v12, %s2834_s16  ;;  %v452_v52 = vmul.f32 %v438_v22, %v424_v17  ;;  %1270 = vrot.lane.b32.xlu0 %v3117_v9, %s2834_s16  ;;  %v5555_v54 = vrot.slane %v3122_v12, 1  ;;  %v3498_v17 = vsel %vm364_vm4, %v3345_v61, %v3328_v56 }
 0x12c   : > { %v397_v61 = vmul.f32 %v386_v42, %v3492_v19 }
 0x12d   : > { %v1418_v13 = vsel %vm1411_vm5, %v5555_v54, %v5554_v23  ;;  %v464_v39 = vadd.f32 %v456_v28, %v400_v29  ;;  %v414_v22 = vpop.permute.xlu1 %413  ;;  %v3504_v23 = vsel %vm364_vm4, %v3374_v25, %v3336_v58  ;;  %v460_v57 = vadd.f32 %v452_v52, %v396_v30  ;;  %v412_v24 = vpop.permute.xlu0 %411 }
 0x12e   : > { %v423_v54 = vsel %vm419_vm7, %v410_v31, %v414_v22  ;;  %v3512_v29 = vsel %vm364_vm4, %v3359_v6, %v3374_v25  ;;  %v422_v56 = vsel %vm419_vm7, %v408_v20, %v412_v24  ;;  %v1410_v6 = vrot.slane %v3129_v15, 1 }
 0x12f   : > { %v457_v28 = vmul.f32 %v442_v48, %v423_v54  ;;  %1276 = vrot.lane.b32.xlu1 %v3129_v15, %s2834_s16  ;;  %v3518_v58 = vadd.f32 %v495_v35, %v464_v39  ;;  %v453_v30 = vmul.f32 %v442_v48, %v422_v56  ;;  %1274 = vrot.lane.b32.xlu0 %v3126_v14, %s2834_s16 }
 0x130   : > { %v3523_v31 = vadd.f32 %v491_v60, %v460_v57  ;;  %v399_v25 = vmul.f32 %v378_v43, %v3498_v17  ;;  %v402_v52 = vmul.f32 %v390_v16, %v3487_v32  ;;  %v395_v20 = vmul.f32 %v378_v43, %v3504_v23  ;;  %v532_v43 = vld [vmem:[#allocation8 + $0x3] ss:$8 sm:$0xf] }
 0x131   : > { %v465_v54 = vadd.f32 %v457_v28, %v401_v51  ;;  %v418_v40 = vpop.permute.xlu1 %417  ;;  %v398_v35 = vmul.f32 %v390_v16, %v3512_v29  ;;  %v461_v39 = vadd.f32 %v453_v30, %v397_v61  ;;  %v416_v60 = vpop.permute.xlu0 %415  ;;  %v5557_v30 = vrot.slane %v3102_v3, 1 }
 0x132   : > { %v421_v42 = vsel %vm419_vm7, %v414_v22, %v418_v40  ;;  %v427_v48 = vsel %vm419_vm7, %v418_v40, %v3399_v44  ;;  %v420_v15 = vsel %vm419_vm7, %v412_v24, %v416_v60  ;;  %v426_v51 = vsel %vm419_vm7, %v416_v60, %v3402_v18 }
 0x133   : > { %v455_v57 = vmul.f32 %v3415_v49, %v427_v48  ;;  %v458_v56 = vmul.f32 %v446_v21, %v421_v42  ;;  %1440 = vrot.lane.b32.xlu1 %v3441_v11, %s2831_s24  ;;  %v451_v16 = vmul.f32 %v3415_v49, %v426_v51  ;;  %v454_v22 = vmul.f32 %v446_v21, %v420_v15  ;;  %v571_v15 = vld [vmem:[#allocation8 + $0x4] ss:$8 sm:$0xf] }
 0x134   : > { %1438 = vrot.lane.b32.xlu0 %v3445_v34, %s2831_s24  ;;  %v3547_v40 = vadd.f32 %v3389_v37, %v465_v54  ;;  %v3549_v44 = vadd.f32 %v492_v41, %v461_v39  ;;  %v5556_v18 = vrot.slane %v3105_v4, 1  ;;  %v537_v41 = vrot.slane %v532_v43, %v3351_v63 }
 0x135   : > { %v463_v24 = vadd.f32 %v455_v57, %v399_v25  ;;  %v466_v28 = vadd.f32 %v458_v56, %v402_v52  ;;  %v3551_v61 = vpop.permute.xlu1 %508  ;;  %v459_v21 = vadd.f32 %v451_v16, %v395_v20  ;;  %v462_v37 = vadd.f32 %v454_v22, %v398_v35  ;;  %v3562_v54 = vpop.permute.xlu0 %506  ;;  %v3597_v16 = vld [vmem:[#allocation8 + $0x24] ss:$8 sm:$0xf] }
 0x136   : > { %v3559_v49 = vsel %vm1411_vm5, %v5557_v30, %v5556_v18  ;;  %v3569_v52 = vmul.f32 %v3409_v27, %v1418_v13  ;;  %v5560_v39 = vrot.slane %v3126_v14, 1  ;;  %v580_v13 = vrot.slane %v571_v15, %v3354_v2 }
 0x137   : > { %5558 = vst [vmem:[#allocation31_spill] sm:$0xff] %v3559_v49  ;;  %1444 = vrot.lane.b32.xlu1 %v3458_v47, %s2831_s24  ;;  %v502_v25 = vadd.f32 %v3386_v36, %v463_v24  ;;  %v3576_v20 = vadd.f32 %v3394_v38, %v466_v28  ;;  %v498_v35 = vadd.f32 %v3461_v53, %v459_v21  ;;  %v5561_v56 = vrot.slane %v3122_v12, 1  ;;  %v669_v53 = vld [vmem:[#allocation8 + $0x20] ss:$8 sm:$0xf] }
 0x138   : > { %5559 = vst [vmem:[#allocation32_spill] sm:$0xff] %v3569_v52  ;;  %v1419_v42 = vsel %vm1411_vm5, %v1410_v6, %v5560_v39  ;;  %1442 = vrot.lane.b32.xlu0 %v3559_v49, %s2831_s24  ;;  %v3582_v48 = vadd.f32 %v3470_v55, %v462_v37  ;;  %v576_v36 = vrot.slane %v571_v15, %v3351_v63  ;;  %v5562_v38 = vrot.slane %v3117_v9, 1 }
 0x139   : > { %v3587_v60 = vrot.slane %v571_v15, %v3357_v5  ;;  %v513_v57 = vpop.permute.xlu1 %512  ;;  %v3600_v55 = vrot.slane %v571_v15, %v3362_v10  ;;  %v511_v24 = vpop.permute.xlu0 %510  ;;  %v541_v28 = vrot.slane %v532_v43, %v3354_v2  ;;  %v3607_v18 = vmul.f32 %v3409_v27, %v1419_v42 }
 0x13a   : > { %v3595_v51 = vsel %vm1411_vm5, %v5562_v38, %v5561_v56  ;;  %v528_v22 = vsel %vm522_vm8, %v3551_v61, %v513_v57  ;;  %v527_v21 = vsel %vm522_vm8, %v3562_v54, %v511_v24  ;;  %v5565_v15 = vmov %v5560_v39 }
 0x13b   : > { %5563 = vst [vmem:[#allocation33_spill] sm:$0xff] %v3595_v51  ;;  %5564 = vst [vmem:[#allocation34_spill] sm:$0xff] %v3607_v18  ;;  %v558_v30 = vmul.f32 %v537_v41, %v528_v22  ;;  %1448 = vrot.lane.b32.xlu1 %v3569_v52, %s2831_s24  ;;  %v3618_v37 = vsel %vm1411_vm5, %v5565_v15, %v1410_v6  ;;  %v545_v39 = vrot.slane %v532_v43, %v3357_v5 }
 0x13c   : > { %5566 = vst [vmem:[#allocation35_spill] sm:$0xff] %v3618_v37  ;;  %v554_v56 = vmul.f32 %v537_v41, %v527_v21  ;;  %1446 = vrot.lane.b32.xlu0 %v3595_v51, %s2831_s24  ;;  %v549_v27 = vrot.slane %v532_v43, %v3362_v10  ;;  %v3625_v42 = vrot.slane %v669_v53, %v3354_v2  ;;  %v3639_v21 = vld [vmem:[#allocation7 + $0x1] ss:$4 sm:$0xf] }
 0x13d   : > { %v3629_v38 = vrot.slane %v3597_v16, %v3351_v63  ;;  %v597_v22 = vmul.f32 %v576_v36, %v3428_v0  ;;  %v566_v14 = vadd.f32 %v558_v30, %v502_v25  ;;  %v517_v6 = vpop.permute.xlu1 %516  ;;  %v3633_v15 = vrot.slane %v669_v53, %v3357_v5  ;;  %v3647_v25 = vld [vmem:[#allocation8 + $0x22] ss:$8 sm:$0xf] }
 0x13e   : > { %v3637_v41 = vrot.slane %v3597_v16, %v3354_v2  ;;  %v593_v43 = vmul.f32 %v576_v36, %v3438_v33  ;;  %v562_v12 = vadd.f32 %v554_v56, %v498_v35  ;;  %v526_v9 = vsel %vm522_vm8, %v513_v57, %v517_v6 }
 0x13f   : > { %5567 = vst [vmem:[#allocation36_spill] sm:$0xff] %v3629_v38  ;;  %v515_v38 = vpop.permute.xlu0 %514  ;;  %v3645_v0 = vrot.slane %v669_v53, %v3351_v63  ;;  %v559_v30 = vmul.f32 %v541_v28, %v526_v9  ;;  %1452 = vrot.lane.b32.xlu1 %v3607_v18, %s2831_s24  ;;  %v3656_v33 = vadd.f32 %v597_v22, %v566_v14 }
 0x140   : > { %5568 = vst [vmem:[#allocation37_spill] sm:$0xff] %v3637_v41  ;;  %v525_v4 = vsel %vm522_vm8, %v511_v24, %v515_v38  ;;  %v3654_v41 = vrot.slane %v669_v53, %v3362_v10  ;;  %1450 = vrot.lane.b32.xlu0 %v3618_v37, %s2831_s24  ;;  %v3662_v36 = vrot.slane %v3597_v16, %v3357_v5 }
 0x141   : > { %v555_v35 = vmul.f32 %v541_v28, %v525_v4  ;;  %v3664_v9 = vadd.f32 %v593_v43, %v562_v12  ;;  %v849_v57 = vrot.slane %v3639_v21, %v3354_v2  ;;  %v598_v24 = vmul.f32 %v580_v13, %v3452_v26  ;;  %v521_v56 = vpop.permute.xlu1 %520 }
 0x142   : > { %5569 = vst [vmem:[#allocation38_spill] sm:$0xff] %v3662_v36  ;;  %v567_v53 = vadd.f32 %v559_v30, %v3518_v58  ;;  %v853_v4 = vrot.slane %v3639_v21, %v3357_v5  ;;  %v810_v14 = vrot.slane %v3647_v25, %v3354_v2  ;;  %v594_v28 = vmul.f32 %v580_v13, %v3492_v19 }
 0x143   : > { %5570 = vst [vmem:[#allocation39_spill] sm:$0xff] %v3664_v9  ;;  %v563_v22 = vadd.f32 %v555_v35, %v3523_v31  ;;  %v524_v12 = vsel %vm522_vm8, %v517_v6, %v521_v56  ;;  %v530_v26 = vsel %vm522_vm8, %v521_v56, %v3551_v61  ;;  %v519_v43 = vpop.permute.xlu0 %518  ;;  %1503 = vrot.lane.b32.xlu1 %v3441_v11, %s2833_s26  ;;  %v732_v6 = vld [vmem:[#allocation8 + $0x21] ss:$8 sm:$0xf] }
 0x144   : > { %v560_v58 = vmul.f32 %v545_v39, %v524_v12  ;;  %v561_v30 = vmul.f32 %v549_v27, %v530_v26  ;;  %v523_v36 = vsel %vm522_vm8, %v515_v38, %v519_v43  ;;  %v529_v9 = vsel %vm522_vm8, %v519_v43, %v3562_v54  ;;  %1501 = vrot.lane.b32.xlu0 %v3445_v34, %s2833_s26 }
 0x145   : > { %v556_v19 = vmul.f32 %v545_v39, %v523_v36  ;;  %v557_v31 = vmul.f32 %v549_v27, %v529_v9  ;;  %v606_v13 = vadd.f32 %v598_v24, %v567_v53  ;;  %v602_v61 = vadd.f32 %v594_v28, %v563_v22  ;;  %v3696_v12 = vpop.permute.xlu1 %646  ;;  %v770_v39 = vld [vmem:[#allocation7] ss:$4 sm:$0xf] }
 0x146   : > { %v599_v35 = vmul.f32 %v3587_v60, %v3487_v32  ;;  %v600_v38 = vmul.f32 %v3600_v55, %v3498_v17  ;;  %v568_v56 = vadd.f32 %v560_v58, %v3547_v40  ;;  %v569_v54 = vadd.f32 %v561_v30, %v3576_v20 }
 0x147   : > { %v595_v27 = vmul.f32 %v3587_v60, %v3512_v29  ;;  %v596_v36 = vmul.f32 %v3600_v55, %v3504_v23  ;;  %v564_v9 = vadd.f32 %v556_v19, %v3549_v44  ;;  %v565_v32 = vadd.f32 %v557_v31, %v3582_v48  ;;  %v3704_v24 = vpop.permute.xlu0 %644  ;;  %1507 = vrot.lane.b32.xlu1 %v3458_v47, %s2833_s26 }
 0x148   : > { %v607_v17 = vadd.f32 %v599_v35, %v568_v56  ;;  %v3710_v40 = vrot.slane %v3597_v16, %v3362_v10  ;;  %v3712_v20 = vadd.f32 %v600_v38, %v569_v54  ;;  %v3715_v29 = vrot.slane %v732_v6, %v3354_v2  ;;  %1505 = vrot.lane.b32.xlu0 %v3559_v49, %s2833_s26 }
 0x149   : > { %v603_v23 = vadd.f32 %v595_v27, %v564_v9  ;;  %v3719_v44 = vadd.f32 %v596_v36, %v565_v32  ;;  %v3722_v48 = vrot.slane %v770_v39, %v3354_v2  ;;  %v3725_v60 = vmul.f32 %v849_v57, %v3240_v45  ;;  %v651_v55 = vpop.permute.xlu1 %650 }
 0x14a   : > { %5571 = vst [vmem:[#allocation40_spill] sm:$0xff] %v3710_v40  ;;  %v3728_v16 = vmul.f32 %v849_v57, %v3242_v46  ;;  %v3731_v53 = vrot.slane %v732_v6, %v3357_v5  ;;  %v3734_v28 = vrot.slane %v770_v39, %v3357_v5  ;;  %v1840_v22 = vadd.s32 2, %v3341_v59 }
 0x14b   : > { %v3740_v26 = vsel %vm364_vm4, %v3696_v12, %v651_v55  ;;  %v649_v43 = vpop.permute.xlu0 %648  ;;  %v3743_v58 = vmul.f32 %v853_v4, %v3254_v50  ;;  %v3746_v57 = vmul.f32 %v810_v14, %v3240_v45  ;;  %v3749_v30 = vmul.f32 %v810_v14, %v3242_v46  ;;  %1511 = vrot.lane.b32.xlu1 %v3569_v52, %s2833_s26  ;;  %v5574_v46 = vld [vmem:[#allocation23_spill] sm:$0xff] }
 0x14c   : > { %5572 = vst [vmem:[#allocation41_spill] sm:$0xff] %v3740_v26  ;;  %v696_v19 = vmul.f32 %v3625_v42, %v3740_v26  ;;  %v3756_v59 = vsel %vm364_vm4, %v3704_v24, %v649_v43  ;;  %v1822_v31 = vrot.slane %v3111_v7, 2  ;;  %v1826_v35 = vrot.slane %v3114_v8, 2  ;;  %1509 = vrot.lane.b32.xlu0 %v3595_v51, %s2833_s26  ;;  %v5582_v26 = vld [vmem:[#allocation24_spill] sm:$0xff] }
 0x14d   : > { %5573 = vst [vmem:[#allocation42_spill] sm:$0xff] %v3756_v59  ;;  %v692_v45 = vmul.f32 %v3625_v42, %v3756_v59  ;;  %v3767_v14 = vmul.f32 %v853_v4, %v5574_v46  ;;  %v3770_v38 = vrot.slane %v732_v6, %v3351_v63  ;;  %v655_v54 = vpop.permute.xlu1 %654  ;;  %v845_v7 = vrot.slane %v3639_v21, %v3351_v63 }
 0x14e   : > { %v3773_v56 = vadd.f32 %v696_v19, %v606_v13  ;;  %v857_v8 = vrot.slane %v3639_v21, %v3362_v10  ;;  %vm1844_vm10 = vcmp.lt.s32.totalorder %v1840_v22, 16  ;;  %v3783_v4 = vsel %vm364_vm4, %v651_v55, %v655_v54  ;;  %v5579_v19 = vld [vmem:[#allocation16_spill] sm:$0xff] }
 0x14f   : > { %v3779_v42 = vadd.f32 %v692_v45, %v602_v61  ;;  %5575 = vst [vmem:[#allocation23_spill] sm:$0xff] %v3783_v4  ;;  %v653_v27 = vpop.permute.xlu0 %652  ;;  %v3786_v36 = vrot.slane %v732_v6, %v3362_v10  ;;  %v3789_v13 = vrot.slane %v770_v39, %v3351_v63  ;;  %v697_v9 = vmul.f32 %v3633_v15, %v3783_v4  ;;  %v5580_v4 = vld [vmem:[#allocation21_spill] sm:$0xff] }
 0x150   : > { %v3795_v21 = vsel %vm364_vm4, %v649_v43, %v653_v27  ;;  %1515 = vrot.lane.b32.xlu1 %v3607_v18, %s2833_s26  ;;  %v3800_v61 = vrot.slane %v770_v39, %v3362_v10  ;;  %v1835_v6 = vsel %vm1830_vm9, %v1826_v35, %v1822_v31  ;;  %1513 = vrot.lane.b32.xlu0 %v3618_v37, %s2833_s26  ;;  %v5578_v55 = vmov 0.0  }
 0x151   : > { %5576 = vst [vmem:[#allocation43_spill] sm:$0xff] %v3795_v21  ;;  %v693_v32 = vmul.f32 %v3633_v15, %v3795_v21  ;;  %v3809_v22 = vsel %vm1844_vm10, 1.0, %v5578_v55  ;;  %v1823_v43 = vrot.slane %v3102_v3, 2  ;;  %v1827_v45 = vrot.slane %v5579_v19, 2  ;;  %v659_v39 = vpop.permute.xlu1 %658 }
 0x152   : > { %5577 = vst [vmem:[#allocation44_spill] sm:$0xff] %v3800_v61  ;;  %v3813_v40 = vadd.f32 %v697_v9, %v607_v17  ;;  %v3816_v59 = vmul.f32 %v845_v7, %v5580_v4  ;;  %v3819_v61 = vmul.f32 %v857_v8, %v5582_v26  ;;  %v814_v15 = vrot.slane %v3647_v25, %v3357_v5  ;;  %v5586_v9 = vld [vmem:[#allocation22_spill] sm:$0xff] }
 0x153   : > { %v3823_v21 = vadd.f32 %v693_v32, %v603_v23  ;;  %v3827_v55 = vsel %vm364_vm4, %v655_v54, %v659_v39  ;;  %v3832_v3 = vsel %vm364_vm4, %v659_v39, %v3696_v12  ;;  %v657_v17 = vpop.permute.xlu0 %656  ;;  %v3835_v19 = vmul.f32 %v845_v7, %v5586_v9  ;;  %v5588_v54 = vld [vmem:[#allocation25_spill] sm:$0xff] }
 0x154   : > { %5581 = vst [vmem:[#allocation16_spill] sm:$0xff] %v3816_v59  ;;  %5583 = vst [vmem:[#allocation21_spill] sm:$0xff] %v3819_v61  ;;  %v695_v61 = vmul.f32 %v3645_v0, %v3832_v3  ;;  %v698_v23 = vmul.f32 %v3654_v41, %v3827_v55  ;;  %1683 = vrot.lane.b32.xlu1 %v3441_v11, %s2834_s16  ;;  %v3844_v32 = vmul.f32 %v857_v8, %v5588_v54  ;;  %v3849_v12 = vld [vmem:[#allocation8 + $0x82] ss:$8 sm:$0xf] }
 0x155   : > { %5584 = vst [vmem:[#allocation24_spill] sm:$0xff] %v3827_v55  ;;  %5585 = vst [vmem:[#allocation45_spill] sm:$0xff] %v3832_v3  ;;  %v3847_v59 = vmul.f32 %v3809_v22, %v1835_v6  ;;  %v3853_v7 = vsel %vm364_vm4, %v653_v27, %v657_v17  ;;  %v3858_v39 = vsel %vm364_vm4, %v657_v17, %v3704_v24  ;;  %1681 = vrot.lane.b32.xlu0 %v3445_v34, %s2834_s16  ;;  %v3876_v17 = vpop.permute.xlu1 %709 }
 0x156   : > { %5587 = vst [vmem:[#allocation22_spill] sm:$0xff] %v3835_v19  ;;  %5589 = vst [vmem:[#allocation25_spill] sm:$0xff] %v3844_v32  ;;  %v1836_v8 = vsel %vm1830_vm9, %v1827_v45, %v1823_v43  ;;  %v806_v6 = vrot.slane %v3647_v25, %v3351_v63  ;;  %v3867_v11 = vadd.f32 %v695_v61, %v3656_v33  ;;  %v3894_v61 = vld [vmem:[#allocation7 + $0x2] ss:$4 sm:$0xf]  ;;  %v5598_v32 = vld [vmem:[#allocation18_spill] sm:$0xff] }
 0x157   : > { %5590 = vst [vmem:[#allocation46_spill] sm:$0xff] %v3847_v59  ;;  %5591 = vst [vmem:[#allocation47_spill] sm:$0xff] %v3853_v7  ;;  %v3870_v27 = vadd.f32 %v698_v23, %v3712_v20  ;;  %v691_v3 = vmul.f32 %v3645_v0, %v3858_v39  ;;  %v694_v24 = vmul.f32 %v3654_v41, %v3853_v7  ;;  %v3878_v34 = vpop.permute.xlu0 %707  ;;  %v3892_v0 = vld [vmem:[#allocation8 + $0x23] ss:$8 sm:$0xf]  ;;  %v1828_v19 = vrot.slane %v5598_v32, 2 }
 0x158   : > { %5592 = vst [vmem:[#allocation48_spill] sm:$0xff] %v3858_v39  ;;  %v3882_v55 = vsel %vm1830_vm9, %v1822_v31, %v1826_v35  ;;  %v3886_v33 = vrot.slane %v3849_v12, %v3351_v63  ;;  %v3890_v20 = vrot.slane %v3849_v12, %v3354_v2  ;;  %v818_v41 = vrot.slane %v3647_v25, %v3362_v10  ;;  %v5596_v23 = vld [vmem:[#allocation39_spill] sm:$0xff]  ;;  %v5597_v35 = vld [vmem:[#allocation17_spill] sm:$0xff] }
 0x159   : > { %5593 = vst [vmem:[#allocation49_spill] sm:$0xff] %v3870_v27  ;;  %v3899_v39 = vadd.f32 %v691_v3, %v5596_v23  ;;  %v3902_v31 = vadd.f32 %v694_v24, %v3719_v44  ;;  %1687 = vrot.lane.b32.xlu1 %v3458_v47, %s2834_s16  ;;  %v1824_v7 = vrot.slane %v5597_v35, 2  ;;  %1685 = vrot.lane.b32.xlu0 %v3559_v49, %s2834_s16  ;;  %v714_v24 = vpop.permute.xlu1 %713  ;;  %v5602_v47 = vld [vmem:[#allocation19_spill] sm:$0xff] }
 0x15a   : > { %5594 = vst [vmem:[#allocation50_spill] sm:$0xff] %v3886_v33  ;;  %5595 = vst [vmem:[#allocation51_spill] sm:$0xff] %v3890_v20  ;;  %v3911_v27 = vmul.f32 %v3809_v22, %v1836_v8  ;;  %v3915_v25 = vsel %vm1830_vm9, %v1823_v43, %v1827_v45  ;;  %v829_v44 = vmul.f32 %v814_v15, %v3254_v50 }
 0x15b   : > { %v825_v3 = vmul.f32 %v814_v15, %v5574_v46  ;;  %v3920_v23 = vmul.f32 %v806_v6, %v5580_v4  ;;  %v3924_v32 = vrot.slane %v3892_v0, %v3351_v63  ;;  %v3928_v8 = vrot.slane %v3894_v61, %v3351_v63  ;;  %v712_v46 = vpop.permute.xlu0 %711  ;;  %v5603_v63 = vld [vmem:[#allocation20_spill] sm:$0xff] }
 0x15c   : > { %5599 = vst [vmem:[#allocation39_spill] sm:$0xff] %v3911_v27  ;;  %v3931_v35 = vmul.f32 %v806_v6, %v5586_v9  ;;  %v728_v50 = vsel %vm419_vm7, %v3876_v17, %v714_v24  ;;  %v3938_v4 = vmul.f32 %v3886_v33, %v3882_v55  ;;  %v3942_v43 = vmul.f32 %v3890_v20, %v3915_v25 }
 0x15d   : > { %v3945_v45 = vmul.f32 %v818_v41, %v5582_v26  ;;  %v759_v15 = vmul.f32 %v3715_v29, %v728_v50  ;;  %v797_v9 = vmul.f32 %v3722_v48, %v728_v50  ;;  %v727_v6 = vsel %vm419_vm7, %v3878_v34, %v712_v46  ;;  %1691 = vrot.lane.b32.xlu1 %v3569_v52, %s2834_s16  ;;  %v718_v49 = vpop.permute.xlu1 %717 }
 0x15e   : > { %5600 = vst [vmem:[#allocation17_spill] sm:$0xff] %v3938_v4  ;;  %5601 = vst [vmem:[#allocation18_spill] sm:$0xff] %v3942_v43  ;;  %v1837_v4 = vsel %vm1830_vm9, %v1828_v19, %v1824_v7  ;;  %v755_v33 = vmul.f32 %v3715_v29, %v727_v6  ;;  %v793_v43 = vmul.f32 %v3722_v48, %v727_v6  ;;  %1689 = vrot.lane.b32.xlu0 %v3595_v51, %s2834_s16 }
 0x15f   : > { %v3962_v26 = vsel %vm1830_vm9, %v1824_v7, %v1828_v19  ;;  %v3965_v50 = vmul.f32 %v818_v41, %v5588_v54  ;;  %v767_v20 = vadd.f32 %v759_v15, %v3773_v56  ;;  %v3969_v52 = vadd.f32 %v3725_v60, %v797_v9  ;;  %v716_v54 = vpop.permute.xlu0 %715 }
 0x160   : > { %v1825_v29 = vrot.slane %v5602_v47, 2  ;;  %v1829_v48 = vrot.slane %v5603_v63, 2  ;;  %v763_v6 = vadd.f32 %v755_v33, %v3779_v42  ;;  %v3975_v51 = vadd.f32 %v3728_v16, %v793_v43 }
 0x161   : > { %v726_v19 = vsel %vm419_vm7, %v714_v24, %v718_v49  ;;  %v3980_v7 = vmul.f32 %v3809_v22, %v1837_v4  ;;  %v725_v47 = vsel %vm419_vm7, %v712_v46, %v716_v54  ;;  %1695 = vrot.lane.b32.xlu1 %v3607_v18, %s2834_s16  ;;  %v3989_v63 = vadd.f32 %v3746_v57, %v767_v20  ;;  %v722_v57 = vpop.permute.xlu1 %721 }
 0x162   : > { %v760_v60 = vmul.f32 %v3731_v53, %v726_v19  ;;  %v798_v56 = vmul.f32 %v3734_v28, %v726_v19  ;;  %v756_v16 = vmul.f32 %v3731_v53, %v725_v47  ;;  %v794_v42 = vmul.f32 %v3734_v28, %v725_v47  ;;  %1693 = vrot.lane.b32.xlu0 %v3618_v37, %s2834_s16 }
 0x163   : > { %5604 = vst [vmem:[#allocation19_spill] sm:$0xff] %v3980_v7  ;;  %v3997_v33 = vrot.slane %v3849_v12, %v3357_v5  ;;  %v4000_v41 = vadd.f32 %v3749_v30, %v763_v6  ;;  %v4008_v53 = vrot.slane %v3892_v0, %v3354_v2  ;;  %v1838_v28 = vsel %vm1830_vm9, %v1829_v48, %v1825_v29  ;;  %v5606_v6 = vld [vmem:[#allocation44_spill] sm:$0xff] }
 0x164   : > { %v768_v24 = vadd.f32 %v760_v60, %v3813_v40  ;;  %v4004_v46 = vadd.f32 %v3743_v58, %v798_v56  ;;  %v764_v20 = vadd.f32 %v756_v16, %v3823_v21  ;;  %v4014_v4 = vadd.f32 %v3767_v14, %v794_v42  ;;  %v720_v58 = vpop.permute.xlu0 %719  ;;  %v5607_v56 = vld [vmem:[#allocation49_spill] sm:$0xff]  ;;  %v5608_v16 = vld [vmem:[#allocation16_spill] sm:$0xff] }
 0x165   : > { %5605 = vst [vmem:[#allocation20_spill] sm:$0xff] %v3997_v33  ;;  %v724_v30 = vsel %vm419_vm7, %v718_v49, %v722_v57  ;;  %v730_v40 = vsel %vm419_vm7, %v722_v57, %v3876_v17  ;;  %1859 = vrot.lane.b32.xlu1 %v3847_v59, %s2831_s24  ;;  %v723_v14 = vsel %vm419_vm7, %v716_v54, %v720_v58  ;;  %v5609_v57 = vld [vmem:[#allocation21_spill] sm:$0xff]  ;;  %v4044_v54 = vpop.permute.xlu1 %880 }
 0x166   : > { %v758_v43 = vmul.f32 %v3770_v38, %v730_v40  ;;  %v761_v15 = vmul.f32 %v3786_v36, %v724_v30  ;;  %v796_v9 = vmul.f32 %v3789_v13, %v730_v40  ;;  %v799_v19 = vmul.f32 %v5606_v6, %v724_v30  ;;  %1857 = vrot.lane.b32.xlu0 %v3882_v55, %s2831_s24 }
 0x167   : > { %v729_v49 = vsel %vm419_vm7, %v720_v58, %v3878_v34  ;;  %v4034_v21 = vadd.f32 %v829_v44, %v768_v24  ;;  %v4036_v17 = vadd.f32 %v825_v3, %v764_v20  ;;  %v757_v40 = vmul.f32 %v3786_v36, %v723_v14 }
 0x168   : > { %v766_v60 = vadd.f32 %v758_v43, %v3867_v11  ;;  %v769_v47 = vadd.f32 %v761_v15, %v5607_v56  ;;  %v874_v42 = vadd.f32 %v5608_v16, %v796_v9  ;;  %v4042_v30 = vadd.f32 %v5609_v57, %v799_v19  ;;  %v4050_v24 = vpop.permute.xlu0 %878  ;;  %v5611_v43 = vld [vmem:[#allocation22_spill] sm:$0xff]  ;;  %v5612_v9 = vld [vmem:[#allocation25_spill] sm:$0xff]  ;;  %v5616_v57 = vld [vmem:[#allocation36_spill] sm:$0xff] }
 0x169   : > { %v754_v34 = vmul.f32 %v3770_v38, %v729_v49  ;;  %v792_v44 = vmul.f32 %v3789_v13, %v729_v49  ;;  %v795_v3 = vmul.f32 %v5606_v6, %v723_v14  ;;  %1863 = vrot.lane.b32.xlu1 %v3911_v27, %s2831_s24  ;;  %v4057_v20 = vmul.f32 %v3997_v33, %v3962_v26  ;;  %v4085_v14 = vld [vmem:[#allocation8 + $0x40] ss:$8 sm:$0xf] }
 0x16a   : > { %v835_v11 = vadd.f32 %v3920_v23, %v766_v60  ;;  %v951_v38 = vrot.slane %v3894_v61, %v3354_v2  ;;  %v4062_v36 = vadd.f32 %v3945_v45, %v769_v47  ;;  %v765_v58 = vadd.f32 %v757_v40, %v3902_v31  ;;  %1861 = vrot.lane.b32.xlu0 %v3915_v25, %s2831_s24  ;;  %v885_v23 = vpop.permute.xlu1 %884  ;;  %v5615_v16 = vld [vmem:[#allocation41_spill] sm:$0xff]  ;;  %v5617_v40 = vld [vmem:[#allocation42_spill] sm:$0xff] }
 0x16b   : > { %5610 = vst [vmem:[#allocation44_spill] sm:$0xff] %v4057_v20  ;;  %v762_v13 = vadd.f32 %v754_v34, %v3899_v39  ;;  %v870_v15 = vadd.f32 %v5611_v43, %v792_v44  ;;  %v4068_v6 = vadd.f32 %v5612_v9, %v795_v3  ;;  %v4073_v19 = vmul.f32 %v3809_v22, %v1838_v28 }
 0x16c   : > { %v4077_v45 = vsel %vm1830_vm9, %v1825_v29, %v1829_v48  ;;  %v4081_v39 = vrot.slane %v3849_v12, %v3362_v10  ;;  %v916_v31 = vrot.slane %v3892_v0, %v3357_v5  ;;  %v899_v49 = vsel %vm522_vm8, %v4044_v54, %v885_v23  ;;  %v883_v28 = vpop.permute.xlu0 %882 }
 0x16d   : > { %5613 = vst [vmem:[#allocation49_spill] sm:$0xff] %v4073_v19  ;;  %v831_v22 = vadd.f32 %v3931_v35, %v762_v13  ;;  %v920_v1 = vrot.slane %v3892_v0, %v3362_v10  ;;  %v4094_v29 = vadd.f32 %v3965_v50, %v765_v58  ;;  %v929_v12 = vmul.f32 %v3924_v32, %v899_v49  ;;  %v5618_v13 = vld [vmem:[#allocation23_spill] sm:$0xff]  ;;  %v5619_v58 = vld [vmem:[#allocation37_spill] sm:$0xff] }
 0x16e   : > { %5614 = vst [vmem:[#allocation16_spill] sm:$0xff] %v4081_v39  ;;  %v968_v48 = vmul.f32 %v3928_v8, %v899_v49  ;;  %v898_v60 = vsel %vm522_vm8, %v4050_v24, %v883_v28  ;;  %1867 = vrot.lane.b32.xlu1 %v3980_v7, %s2831_s24  ;;  %v955_v35 = vrot.slane %v3894_v61, %v3357_v5 }
 0x16f   : > { %v925_v56 = vmul.f32 %v3924_v32, %v898_v60  ;;  %v964_v0 = vmul.f32 %v3928_v8, %v898_v60  ;;  %1865 = vrot.lane.b32.xlu0 %v3962_v26, %s2831_s24  ;;  %v959_v50 = vrot.slane %v3894_v61, %v3362_v10  ;;  %v4113_v47 = vrot.slane %v4085_v14, %v3354_v2  ;;  %v889_v8 = vpop.permute.xlu1 %888 }
 0x170   : > { %v1007_v34 = vmul.f32 %v5616_v57, %v5615_v16  ;;  %v1003_v44 = vmul.f32 %v5616_v57, %v5617_v40  ;;  %v937_v3 = vadd.f32 %v929_v12, %v835_v11  ;;  %v4119_v32 = vadd.f32 %v968_v48, %v874_v42  ;;  %v887_v60 = vpop.permute.xlu0 %886  ;;  %v5621_v11 = vld [vmem:[#allocation43_spill] sm:$0xff]  ;;  %v5622_v48 = vld [vmem:[#allocation24_spill] sm:$0xff] }
 0x171   : > { %v1008_v43 = vmul.f32 %v5619_v58, %v5618_v13  ;;  %v933_v9 = vadd.f32 %v925_v56, %v831_v22  ;;  %v4123_v49 = vadd.f32 %v964_v0, %v870_v15  ;;  %v897_v61 = vsel %vm522_vm8, %v885_v23, %v889_v8  ;;  %v5623_v56 = vld [vmem:[#allocation38_spill] sm:$0xff]  ;;  %v5625_v40 = vld [vmem:[#allocation40_spill] sm:$0xff] }
 0x172   : > { %v930_v20 = vmul.f32 %v4008_v53, %v897_v61  ;;  %v969_v16 = vmul.f32 %v951_v38, %v897_v61  ;;  %v896_v57 = vsel %vm522_vm8, %v883_v28, %v887_v60  ;;  %1871 = vrot.lane.b32.xlu1 %v4073_v19, %s2831_s24  ;;  %v4132_v42 = vadd.f32 %v1007_v34, %v937_v3  ;;  %v5624_v28 = vld [vmem:[#allocation45_spill] sm:$0xff] }
 0x173   : > { %5620 = vst [vmem:[#allocation21_spill] sm:$0xff] %v4123_v49  ;;  %v1004_v22 = vmul.f32 %v5619_v58, %v5621_v11  ;;  %v926_v15 = vmul.f32 %v4008_v53, %v896_v57  ;;  %v965_v12 = vmul.f32 %v951_v38, %v896_v57  ;;  %1869 = vrot.lane.b32.xlu0 %v4077_v45, %s2831_s24  ;;  %v893_v58 = vpop.permute.xlu1 %892  ;;  %v1326_v49 = vld [vmem:[#allocation7 + $0x12] ss:$4 sm:$0xf] }
 0x174   : > { %v4139_v23 = vadd.f32 %v1003_v44, %v933_v9  ;;  %v1009_v0 = vmul.f32 %v5623_v56, %v5622_v48  ;;  %v1010_v13 = vmul.f32 %v5625_v40, %v5624_v28  ;;  %v938_v34 = vadd.f32 %v930_v20, %v3989_v63  ;;  %v891_v61 = vpop.permute.xlu0 %890 }
 0x175   : > { %v4147_v3 = vadd.f32 %v969_v16, %v3969_v52  ;;  %v934_v53 = vadd.f32 %v926_v15, %v4000_v41  ;;  %v4151_v38 = vadd.f32 %v965_v12, %v3975_v51  ;;  %v895_v44 = vsel %vm522_vm8, %v889_v8, %v893_v58 }
 0x176   : > { %v901_v9 = vsel %vm522_vm8, %v893_v58, %v4044_v54  ;;  %v931_v57 = vmul.f32 %v916_v31, %v895_v44  ;;  %v970_v63 = vmul.f32 %v955_v35, %v895_v44  ;;  %1922 = vrot.lane.b32.xlu1 %v3847_v59, %s2833_s26  ;;  %v894_v52 = vsel %vm522_vm8, %v887_v60, %v891_v61 }
 0x177   : > { %v932_v11 = vmul.f32 %v920_v1, %v901_v9  ;;  %v971_v20 = vmul.f32 %v959_v50, %v901_v9  ;;  %v900_v51 = vsel %vm522_vm8, %v891_v61, %v4050_v24  ;;  %1920 = vrot.lane.b32.xlu0 %v3882_v55, %s2833_s26  ;;  %v1016_v41 = vadd.f32 %v1008_v43, %v938_v34  ;;  %v4175_v60 = vpop.permute.xlu1 %1021  ;;  %v1365_v43 = vld [vmem:[#allocation8 + $0x44] ss:$8 sm:$0xf] }
 0x178   : > { %v1012_v54 = vadd.f32 %v1004_v22, %v934_v53  ;;  %v939_v8 = vadd.f32 %v931_v57, %v4034_v21  ;;  %v4170_v15 = vadd.f32 %v970_v63, %v4004_v46  ;;  %v927_v48 = vmul.f32 %v916_v31, %v894_v52  ;;  %v4177_v44 = vpop.permute.xlu0 %1019  ;;  %v5626_v22 = vld [vmem:[#allocation47_spill] sm:$0xff]  ;;  %v5627_v34 = vld [vmem:[#allocation48_spill] sm:$0xff] }
 0x179   : > { %v940_v16 = vadd.f32 %v932_v11, %v4062_v36  ;;  %v4173_v12 = vadd.f32 %v971_v20, %v4042_v30  ;;  %v928_v28 = vmul.f32 %v920_v1, %v900_v51  ;;  %v966_v24 = vmul.f32 %v955_v35, %v894_v52  ;;  %v4187_v53 = vld [vmem:[#allocation8 + $0x42] ss:$8 sm:$0xf]  ;;  %v1107_v11 = vld [vmem:[#allocation8 + $0x41] ss:$8 sm:$0xf] }
 0x17a   : > { %v967_v58 = vmul.f32 %v959_v50, %v900_v51  ;;  %v1005_v21 = vmul.f32 %v5623_v56, %v5626_v22  ;;  %v1006_v36 = vmul.f32 %v5625_v40, %v5627_v34  ;;  %1926 = vrot.lane.b32.xlu1 %v3911_v27, %s2833_s26  ;;  %v1017_v46 = vadd.f32 %v1009_v0, %v939_v8  ;;  %v4199_v56 = vld [vmem:[#allocation7 + $0x11] ss:$4 sm:$0xf]  ;;  %v1146_v63 = vld [vmem:[#allocation7 + $0x10] ss:$4 sm:$0xf] }
 0x17b   : > { %v4185_v30 = vadd.f32 %v1010_v13, %v940_v16  ;;  %v935_v31 = vadd.f32 %v927_v48, %v4036_v17  ;;  %v936_v1 = vadd.f32 %v928_v28, %v4094_v29  ;;  %v4192_v35 = vadd.f32 %v966_v24, %v4014_v4  ;;  %1924 = vrot.lane.b32.xlu0 %v3915_v25, %s2833_s26  ;;  %v5630_v40 = vld [vmem:[#allocation26_spill] sm:$0xff]  ;;  %v1026_v17 = vpop.permute.xlu1 %1025 }
 0x17c   : > { %v4195_v50 = vadd.f32 %v967_v58, %v4068_v6  ;;  %v4203_v0 = vmul.f32 %v4081_v39, %v4077_v45  ;;  %v4206_v13 = vrot.slane %v1365_v43, %v5630_v40  ;;  %v1057_v4 = vrot.slane %v4085_v14, %v3357_v5  ;;  %v1024_v9 = vpop.permute.xlu0 %1023 }
 0x17d   : > { %v4211_v29 = vrot.slane %v1365_v43, %v3354_v2  ;;  %v4216_v6 = vsel %vm364_vm4, %v4175_v60, %v1026_v17  ;;  %v1013_v61 = vadd.f32 %v1005_v21, %v935_v31  ;;  %v4218_v57 = vadd.f32 %v1006_v36, %v936_v1  ;;  %v4268_v1 = vld [vmem:[%s3083_s8 + $0x28] sm:$0xff] }
 0x17e   : > { %5628 = vst [vmem:[#allocation22_spill] sm:$0xff] %v4195_v50  ;;  %5629 = vst [vmem:[#allocation25_spill] sm:$0xff] %v4203_v0  ;;  %v1194_v20 = vrot.slane %v4187_v53, %v3354_v2  ;;  %v1071_v52 = vmul.f32 %v4113_v47, %v4216_v6  ;;  %v4227_v51 = vsel %vm364_vm4, %v4177_v44, %v1024_v9  ;;  %1930 = vrot.lane.b32.xlu1 %v3980_v7, %s2833_s26 }
 0x17f   : > { %v1049_v8 = vrot.slane %v4085_v14, %v5630_v40  ;;  %v1233_v16 = vrot.slane %v4199_v56, %v3354_v2  ;;  %v1067_v48 = vmul.f32 %v4113_v47, %v4227_v51  ;;  %1928 = vrot.lane.b32.xlu0 %v3962_v26, %s2833_s26  ;;  %v1061_v28 = vrot.slane %v4085_v14, %v3362_v10  ;;  %v1030_v21 = vpop.permute.xlu1 %1029 }
 0x180   : > { %v4242_v24 = vrot.slane %v1365_v43, %v3357_v5  ;;  %v4245_v58 = vrot.slane %v1365_v43, %v3362_v10  ;;  %v4247_v22 = vadd.f32 %v1071_v52, %v1016_v41  ;;  %v4250_v34 = vrot.slane %v1107_v11, %v3354_v2  ;;  %v1028_v43 = vpop.permute.xlu0 %1027  ;;  %5632 = vst [vmem:[#allocation36_spill] sm:$0xff] %v4268_v1 }
 0x181   : > { %v4253_v47 = vrot.slane %v1146_v63, %v3354_v2  ;;  %v4256_v36 = vrot.slane %v1107_v11, %v3357_v5  ;;  %v4258_v14 = vadd.f32 %v1067_v48, %v1012_v54  ;;  %v4262_v31 = vsel %vm364_vm4, %v1026_v17, %v1030_v21  ;;  %v4284_v17 = vld [vmem:[%s3083_s8 + $0x8] sm:$0xff] }
 0x182   : > { %5631 = vst [vmem:[#allocation41_spill] sm:$0xff] %v4245_v58  ;;  %v4265_v41 = vrot.slane %v1146_v63, %v3357_v5  ;;  %v4271_v52 = vmul.f32 %v4268_v1, %v1194_v20  ;;  %v1072_v0 = vmul.f32 %v1057_v4, %v4262_v31  ;;  %v4276_v39 = vsel %vm364_vm4, %v1024_v9, %v1028_v43 }
 0x183   : > { %1934 = vrot.lane.b32.xlu1 %v4073_v19, %s2833_s26  ;;  %v4281_v54 = vmul.f32 %v4268_v1, %v1233_v16  ;;  %5635 = vst [vmem:[#allocation37_spill] sm:$0xff] %v4284_v17  ;;  %v4287_v48 = vmul.f32 %v4284_v17, %v1194_v20  ;;  %v1068_v33 = vmul.f32 %v1057_v4, %v4276_v39 }
 0x184   : > { %5633 = vst [vmem:[#allocation42_spill] sm:$0xff] %v4271_v52  ;;  %1932 = vrot.lane.b32.xlu0 %v4077_v45, %s2833_s26  ;;  %v4293_v37 = vrot.slane %v1107_v11, %v5630_v40  ;;  %v4296_v9 = vrot.slane %v1107_v11, %v3362_v10  ;;  %v4299_v18 = vmul.f32 %v4284_v17, %v1233_v16  ;;  %v1034_v52 = vpop.permute.xlu1 %1033 }
 0x185   : > { %5634 = vst [vmem:[#allocation23_spill] sm:$0xff] %v4281_v54  ;;  %5636 = vst [vmem:[#allocation43_spill] sm:$0xff] %v4287_v48  ;;  %v4301_v1 = vadd.f32 %v1072_v0, %v1017_v46  ;;  %v4304_v20 = vrot.slane %v1146_v63, %v5630_v40  ;;  %v4307_v4 = vrot.slane %v1146_v63, %v3362_v10  ;;  %v1032_v0 = vpop.permute.xlu0 %1031 }
 0x186   : > { %5637 = vst [vmem:[#allocation24_spill] sm:$0xff] %v4299_v18  ;;  %v1198_v48 = vrot.slane %v4187_v53, %v3357_v5  ;;  %v4311_v54 = vadd.f32 %v1068_v33, %v1013_v61  ;;  %v4315_v11 = vsel %vm364_vm4, %v1030_v21, %v1034_v52  ;;  %v4320_v46 = vsel %vm364_vm4, %v1034_v52, %v4175_v60 }
 0x187   : > { %v1237_v16 = vrot.slane %v4199_v56, %v3357_v5  ;;  %v1070_v63 = vmul.f32 %v1049_v8, %v4320_v46  ;;  %v1073_v17 = vmul.f32 %v1061_v28, %v4315_v11  ;;  %2024 = vrot.lane.b32.xlu1 %v3847_v59, %s2834_s16  ;;  %v1190_v33 = vrot.slane %v4187_v53, %v5630_v40 }
 0x188   : > { %v1229_v61 = vrot.slane %v4199_v56, %v5630_v40  ;;  %v4334_v60 = vsel %vm364_vm4, %v1028_v43, %v1032_v0  ;;  %v4339_v21 = vsel %vm364_vm4, %v1032_v0, %v4177_v44  ;;  %2022 = vrot.lane.b32.xlu0 %v3882_v55, %s2834_s16  ;;  %v1202_v52 = vrot.slane %v4187_v53, %v3362_v10  ;;  %v4355_v0 = vpop.permute.xlu1 %1084  ;;  %v1287_v55 = vld [vmem:[#allocation8 + $0x43] ss:$8 sm:$0xf] }
 0x189   : > { %5638 = vst [vmem:[#allocation38_spill] sm:$0xff] %v4334_v60  ;;  %5639 = vst [vmem:[#allocation45_spill] sm:$0xff] %v4339_v21  ;;  %v1241_v59 = vrot.slane %v4199_v56, %v3362_v10  ;;  %v4348_v18 = vadd.f32 %v1070_v63, %v4132_v42  ;;  %v4351_v43 = vadd.f32 %v1073_v17, %v4185_v30  ;;  %v4357_v58 = vpop.permute.xlu0 %1082  ;;  %v4360_v53 = vld [vmem:[%s3083_s8 + $0x30] sm:$0xff] }
 0x18a   : > { %v1066_v50 = vmul.f32 %v1049_v8, %v4339_v21  ;;  %v1069_v44 = vmul.f32 %v1061_v28, %v4334_v60  ;;  %5640 = vst [vmem:[#allocation40_spill] sm:$0xff] %v4360_v53  ;;  %v4363_v42 = vmul.f32 %v4360_v53, %v1198_v48  ;;  %v4366_v30 = vmul.f32 %v4360_v53, %v1237_v16  ;;  %v4369_v56 = vld [vmem:[%s3083_s8 + $0x10] sm:$0xff]  ;;  %v4386_v53 = vld [vmem:[%s3083_s8 + $0x20] sm:$0xff] }
 0x18b   : > { %5641 = vst [vmem:[#allocation47_spill] sm:$0xff] %v4369_v56  ;;  %v4372_v8 = vmul.f32 %v4369_v56, %v1198_v48  ;;  %v4375_v28 = vmul.f32 %v4369_v56, %v1237_v16  ;;  %2028 = vrot.lane.b32.xlu1 %v3911_v27, %s2834_s16  ;;  %5644 = vst [vmem:[#allocation53_spill] sm:$0xff] %v4386_v53  ;;  %v4389_v21 = vmul.f32 %v4386_v53, %v1190_v33  ;;  %v4412_v56 = vld [vmem:[%s3083_s8 + $0x38] sm:$0xff] }
 0x18c   : > { %v4378_v17 = vadd.f32 %v1066_v50, %v4139_v23  ;;  %v4381_v63 = vadd.f32 %v1069_v44, %v4218_v57  ;;  %v4392_v48 = vmul.f32 %v4386_v53, %v1229_v61  ;;  %2026 = vrot.lane.b32.xlu0 %v3915_v25, %s2834_s16  ;;  %v4397_v23 = vrot.slane %v1287_v55, %v5630_v40  ;;  %v4403_v57 = vld [vmem:[%s3083_s8] sm:$0xff]  ;;  %v1089_v27 = vpop.permute.xlu1 %1088 }
 0x18d   : > { %5642 = vst [vmem:[#allocation48_spill] sm:$0xff] %v4372_v8  ;;  %5643 = vst [vmem:[#allocation52_spill] sm:$0xff] %v4375_v28  ;;  %v4400_v50 = vrot.slane %v1326_v49, %v5630_v40  ;;  %v4406_v16 = vmul.f32 %v4403_v57, %v1190_v33  ;;  %v4409_v44 = vmul.f32 %v4403_v57, %v1229_v61  ;;  %v4421_v28 = vld [vmem:[%s3083_s8 + $0x18] sm:$0xff] }
 0x18e   : > { %5646 = vst [vmem:[#allocation55_spill] sm:$0xff] %v4403_v57  ;;  %5649 = vst [vmem:[#allocation58_spill] sm:$0xff] %v4412_v56  ;;  %v4415_v60 = vmul.f32 %v4412_v56, %v1202_v52  ;;  %v4418_v25 = vmul.f32 %v4412_v56, %v1241_v59  ;;  %v4424_v8 = vmul.f32 %v4421_v28, %v1202_v52  ;;  %v1087_v57 = vpop.permute.xlu0 %1086  ;;  %v4443_v52 = vld [vmem:[#allocation5] sm:$0xf] }
 0x18f   : > { %5645 = vst [vmem:[#allocation54_spill] sm:$0xff] %v4400_v50  ;;  %5647 = vst [vmem:[#allocation56_spill] sm:$0xff] %v4406_v16  ;;  %v4427_v33 = vmul.f32 %v4421_v28, %v1241_v59  ;;  %v1103_v61 = vsel %vm419_vm7, %v4355_v0, %v1089_v27  ;;  %v4439_v56 = vrot.slane %v1287_v55, %v3357_v5  ;;  %2032 = vrot.lane.b32.xlu1 %v3980_v7, %s2834_s16 }
 0x190   : > { %5648 = vst [vmem:[#allocation57_spill] sm:$0xff] %v4409_v44  ;;  %5650 = vst [vmem:[#allocation59_spill] sm:$0xff] %v4415_v60  ;;  %v4433_v44 = vrot.slane %v1287_v55, %v3354_v2  ;;  %v4436_v60 = vrot.slane %v1326_v49, %v3354_v2  ;;  %v1134_v59 = vmul.f32 %v4250_v34, %v1103_v61  ;;  %2030 = vrot.lane.b32.xlu0 %v3962_v26, %s2834_s16 }
 0x191   : > { %5651 = vst [vmem:[#allocation60_spill] sm:$0xff] %v4418_v25  ;;  %5652 = vst [vmem:[#allocation61_spill] sm:$0xff] %v4421_v28  ;;  %v4441_v25 = vld [vmem:[#allocation8 + $0x60] ss:$8 sm:$0xf]  ;;  %v1173_v28 = vmul.f32 %v4253_v47, %v1103_v61  ;;  %v4462_v61 = vrot.slane %v1326_v49, %v3357_v5  ;;  %v4465_v16 = vrot.slane %v1326_v49, %v3362_v10 }
 0x192   : > { %5653 = vst [vmem:[#allocation62_spill] sm:$0xff] %v4424_v8  ;;  %5654 = vst [vmem:[#allocation63_spill] sm:$0xff] %v4427_v33  ;;  %v1102_v33 = vsel %vm419_vm7, %v4357_v58, %v1087_v57  ;;  %v4453_v8 = vrot.slane %v1287_v55, %v3362_v10  ;;  %v1142_v7 = vadd.f32 %v1134_v59, %v4247_v22  ;;  %v4485_v22 = vld [vmem:[#allocation10] ss:$4 sm:$0xf] }
 0x193   : > { %5655 = vst [vmem:[#allocation64_spill] sm:$0xff] %v4433_v44  ;;  %5656 = vst [vmem:[#allocation65_spill] sm:$0xff] %v4436_v60  ;;  %v4455_v60 = vld [vmem:[#allocation8 + $0x64] ss:$8 sm:$0xf]  ;;  %v1169_v44 = vmul.f32 %v4253_v47, %v1102_v33  ;;  %v1181_v55 = vadd.f32 %v1173_v28, %v4147_v3  ;;  %v4471_v50 = vrot.slane %v4441_v25, %v3354_v2  ;;  %2036 = vrot.lane.b32.xlu1 %v4073_v19, %s2834_s16 }
 0x194   : > { %5657 = vst [vmem:[#allocation66_spill] sm:$0xff] %v4439_v56  ;;  %5658 = vst [vmem:[#allocation67_spill] sm:$0xff] %v4443_v52  ;;  %v1130_v56 = vmul.f32 %v4250_v34, %v1102_v33  ;;  %v4475_v34 = vrot.slane %v4443_v52, %v5630_v40  ;;  %v1091_v33 = vpop.permute.xlu0 %1090  ;;  %v4483_v3 = vrot.slane %v4455_v60, %v5630_v40  ;;  %2034 = vrot.lane.b32.xlu0 %v4077_v45, %s2834_s16 }
 0x195   : > { %5659 = vst [vmem:[#allocation68_spill] sm:$0xff] %v4453_v8  ;;  %v1093_v8 = vpop.permute.xlu1 %1092  ;;  %v1177_v47 = vadd.f32 %v1169_v44, %v4151_v38  ;;  %5661 = vst [vmem:[#allocation70_spill] sm:$0xff] %v4485_v22  ;;  %v1100_v52 = vsel %vm419_vm7, %v1087_v57, %v1091_v33  ;;  %v4507_v57 = vrot.slane %v4441_v25, %v5630_v40 }
 0x196   : > { %v1138_v26 = vadd.f32 %v1130_v56, %v4258_v14  ;;  %v1101_v49 = vsel %vm419_vm7, %v1089_v27, %v1093_v8  ;;  %5660 = vst [vmem:[#allocation69_spill] sm:$0xff] %v4483_v3  ;;  %v4495_v27 = vrot.slane %v4441_v25, %v3357_v5  ;;  %v1131_v38 = vmul.f32 %v4256_v36, %v1100_v52 }
 0x197   : > { %v1135_v28 = vmul.f32 %v4256_v36, %v1101_v49  ;;  %v1174_v59 = vmul.f32 %v4265_v41, %v1101_v49  ;;  %v1170_v14 = vmul.f32 %v4265_v41, %v1100_v52  ;;  %v4503_v56 = vrot.slane %v4455_v60, %v3354_v2 }
 0x198   : > { %v4513_v36 = vmul.f32 %v4386_v53, %v4475_v34  ;;  %v4517_v45 = vrot.slane %v4485_v22, %v5630_v40  ;;  %v1139_v41 = vadd.f32 %v1131_v38, %v4311_v54  ;;  %v1387_v54 = vmul.f32 %v4206_v13, %v4227_v51 }
 0x199   : > { %5662 = vst [vmem:[#allocation71_spill] sm:$0xff] %v4503_v56  ;;  %v1143_v44 = vadd.f32 %v1135_v28, %v4301_v1  ;;  %v1182_v49 = vadd.f32 %v1174_v59, %v4170_v15  ;;  %v1097_v19 = vpop.permute.xlu1 %1096  ;;  %v4521_v52 = vadd.f32 %v1170_v14, %v4192_v35  ;;  %v1095_v1 = vpop.permute.xlu0 %1094  ;;  %v1391_v35 = vmul.f32 %v4206_v13, %v4216_v6 }
 0x19a   : > { %v1099_v56 = vsel %vm419_vm7, %v1093_v8, %v1097_v19  ;;  %v1105_v15 = vsel %vm419_vm7, %v1097_v19, %v4355_v0  ;;  %v1098_v8 = vsel %vm419_vm7, %v1091_v33, %v1095_v1  ;;  %v1104_v19 = vsel %vm419_vm7, %v1095_v1, %v4357_v58  ;;  %v5666_v1 = vld [vmem:[#allocation23_spill] sm:$0xff] }
 0x19b   : > { %v1133_v28 = vmul.f32 %v4293_v37, %v1105_v15  ;;  %v1136_v59 = vmul.f32 %v4296_v9, %v1099_v56  ;;  %v1172_v3 = vmul.f32 %v4304_v20, %v1105_v15  ;;  %v1175_v22 = vmul.f32 %v4307_v4, %v1099_v56 }
 0x19c   : > { %v1129_v6 = vmul.f32 %v4293_v37, %v1104_v19  ;;  %v1132_v13 = vmul.f32 %v4296_v9, %v1098_v8  ;;  %v1168_v51 = vmul.f32 %v4304_v20, %v1104_v19  ;;  %v1171_v33 = vmul.f32 %v4307_v4, %v1098_v8  ;;  %v5664_v4 = vld [vmem:[#allocation21_spill] sm:$0xff]  ;;  %v5669_v8 = vld [vmem:[#allocation24_spill] sm:$0xff] }
 0x19d   : > { %v1141_v0 = vadd.f32 %v1133_v28, %v4348_v18  ;;  %v1144_v38 = vadd.f32 %v1136_v59, %v4351_v43  ;;  %v1180_v14 = vadd.f32 %v1172_v3, %v4119_v32  ;;  %v1183_v56 = vadd.f32 %v1175_v22, %v4173_v12  ;;  %v1265_v15 = vpop.permute.xlu1 %1264  ;;  %v1263_v53 = vpop.permute.xlu0 %1262  ;;  %v5663_v12 = vld [vmem:[#allocation41_spill] sm:$0xff]  ;;  %v5665_v3 = vld [vmem:[#allocation22_spill] sm:$0xff]  ;;  %v5668_v59 = vld [vmem:[#allocation43_spill] sm:$0xff] }
 0x19e   : > { %v1392_v58 = vmul.f32 %v4211_v29, %v4262_v31  ;;  %v1388_v18 = vmul.f32 %v4211_v29, %v4276_v39  ;;  %v4555_v32 = vmul.f32 %v4242_v24, %v4315_v11  ;;  %v4559_v37 = vmul.f32 %v5663_v12, %v4320_v46  ;;  %v5667_v39 = vld [vmem:[#allocation42_spill] sm:$0xff] }
 0x19f   : > { %v1137_v9 = vadd.f32 %v1129_v6, %v4378_v17  ;;  %v1140_v20 = vadd.f32 %v1132_v13, %v4381_v63  ;;  %v1176_v43 = vadd.f32 %v1168_v51, %v5664_v4  ;;  %v1179_v22 = vadd.f32 %v1171_v33, %v5665_v3  ;;  %v5670_v33 = vld [vmem:[#allocation54_spill] sm:$0xff] }
 0x1a0   : > { %v1259_v28 = vadd.f32 %v5666_v1, %v1181_v55  ;;  %v1220_v29 = vadd.f32 %v5667_v39, %v1142_v7  ;;  %v1216_v11 = vadd.f32 %v5668_v59, %v1138_v26  ;;  %v1255_v19 = vadd.f32 %v5669_v8, %v1177_v47  ;;  %v5671_v47 = vld [vmem:[#allocation56_spill] sm:$0xff] }
 0x1a1   : > { %v1269_v31 = vpop.permute.xlu1 %1268  ;;  %v1258_v46 = vadd.f32 %v4392_v48, %v1180_v14  ;;  %v1267_v6 = vpop.permute.xlu0 %1266  ;;  %v1221_v63 = vadd.f32 %v4363_v42, %v1143_v44  ;;  %v1260_v13 = vadd.f32 %v4366_v30, %v1182_v49  ;;  %v1219_v51 = vadd.f32 %v4389_v21, %v1141_v0  ;;  %v5672_v48 = vld [vmem:[#allocation57_spill] sm:$0xff]  ;;  %v5673_v21 = vld [vmem:[#allocation60_spill] sm:$0xff]  ;;  %v5674_v0 = vld [vmem:[#allocation59_spill] sm:$0xff] }
 0x1a2   : > { %v1283_v17 = vsel %vm522_vm8, %v1265_v15, %v1269_v31  ;;  %v1282_v26 = vsel %vm522_vm8, %v1263_v53, %v1267_v6  ;;  %v1215_v4 = vadd.f32 %v5671_v47, %v1137_v9  ;;  %v1254_v14 = vadd.f32 %v5672_v48, %v1176_v43  ;;  %v5675_v43 = vld [vmem:[#allocation48_spill] sm:$0xff] }
 0x1a3   : > { %v1313_v55 = vmul.f32 %v4397_v23, %v1283_v17  ;;  %v1352_v7 = vmul.f32 %v5670_v33, %v1283_v17  ;;  %v1309_v3 = vmul.f32 %v4397_v23, %v1282_v26  ;;  %v1348_v1 = vmul.f32 %v5670_v33, %v1282_v26  ;;  %v5676_v23 = vld [vmem:[#allocation64_spill] sm:$0xff]  ;;  %v5677_v33 = vld [vmem:[#allocation65_spill] sm:$0xff] }
 0x1a4   : > { %v1261_v49 = vadd.f32 %v5673_v21, %v1183_v56  ;;  %v1222_v39 = vadd.f32 %v5674_v0, %v1144_v38  ;;  %v1217_v47 = vadd.f32 %v5675_v43, %v1139_v41  ;;  %v5680_v21 = vld [vmem:[#allocation63_spill] sm:$0xff] }
 0x1a5   : > { %v1321_v42 = vadd.f32 %v1313_v55, %v1219_v51  ;;  %v4583_v44 = vadd.f32 %v1352_v7, %v1258_v46  ;;  %v1273_v30 = vpop.permute.xlu1 %1272  ;;  %v1317_v59 = vadd.f32 %v1309_v3, %v1215_v4  ;;  %v4587_v8 = vadd.f32 %v1348_v1, %v1254_v14  ;;  %v1271_v17 = vpop.permute.xlu0 %1270  ;;  %v5678_v7 = vld [vmem:[#allocation52_spill] sm:$0xff]  ;;  %v5679_v3 = vld [vmem:[#allocation62_spill] sm:$0xff] }
 0x1a6   : > { %v1281_v9 = vsel %vm522_vm8, %v1269_v31, %v1273_v30  ;;  %v1280_v46 = vsel %vm522_vm8, %v1267_v6, %v1271_v17  ;;  %v1256_v26 = vadd.f32 %v5678_v7, %v4521_v52  ;;  %v1218_v1 = vadd.f32 %v5679_v3, %v1140_v20 }
 0x1a7   : > { %v1314_v48 = vmul.f32 %v5676_v23, %v1281_v9  ;;  %v1353_v51 = vmul.f32 %v5677_v33, %v1281_v9  ;;  %v4596_v55 = vadd.f32 %v1391_v35, %v1321_v42  ;;  %v1310_v38 = vmul.f32 %v5676_v23, %v1280_v46 }
 0x1a8   : > { %v1349_v56 = vmul.f32 %v5677_v33, %v1280_v46  ;;  %v4602_v31 = vadd.f32 %v1387_v54, %v1317_v59  ;;  %v1257_v0 = vadd.f32 %v5680_v21, %v1179_v22  ;;  %v5681_v54 = vld [vmem:[#allocation66_spill] sm:$0xff] }
 0x1a9   : > { %v1322_v4 = vadd.f32 %v1314_v48, %v1220_v29  ;;  %v4604_v41 = vadd.f32 %v1353_v51, %v1259_v28  ;;  %v1277_v14 = vpop.permute.xlu1 %1276  ;;  %v1318_v6 = vadd.f32 %v1310_v38, %v1216_v11  ;;  %v1275_v52 = vpop.permute.xlu0 %1274  ;;  %v5682_v29 = vld [vmem:[#allocation68_spill] sm:$0xff] }
 0x1aa   : > { %v4608_v35 = vadd.f32 %v1349_v56, %v1255_v19  ;;  %v1279_v42 = vsel %vm522_vm8, %v1273_v30, %v1277_v14  ;;  %v1285_v9 = vsel %vm522_vm8, %v1277_v14, %v1265_v15  ;;  %v1278_v22 = vsel %vm522_vm8, %v1271_v17, %v1275_v52  ;;  %v1604_v21 = vld [vmem:[#allocation8 + $0x62] ss:$8 sm:$0xf] }
 0x1ab   : > { %v1315_v59 = vmul.f32 %v5681_v54, %v1279_v42  ;;  %v1316_v28 = vmul.f32 %v5682_v29, %v1285_v9  ;;  %v1354_v43 = vmul.f32 %v4462_v61, %v1279_v42  ;;  %v1355_v20 = vmul.f32 %v4465_v16, %v1285_v9 }
 0x1ac   : > { %v1284_v11 = vsel %vm522_vm8, %v1275_v52, %v1263_v53  ;;  %v1400_v19 = vadd.f32 %v1392_v58, %v1322_v4  ;;  %v1396_v30 = vadd.f32 %v1388_v18, %v1318_v6  ;;  %v1311_v46 = vmul.f32 %v5681_v54, %v1278_v22  ;;  %v1526_v53 = vld [vmem:[#allocation8 + $0x61] ss:$8 sm:$0xf]  ;;  %v1565_v4 = vld [vmem:[#allocation7 + $0x20] ss:$4 sm:$0xf] }
 0x1ad   : > { %v1323_v23 = vadd.f32 %v1315_v59, %v1221_v63  ;;  %v1324_v48 = vadd.f32 %v1316_v28, %v1222_v39  ;;  %v4622_v15 = vadd.f32 %v1354_v43, %v1260_v13  ;;  %v4624_v33 = vadd.f32 %v1355_v20, %v1261_v49  ;;  %v4626_v51 = vpop.permute.xlu1 %1440  ;;  %v4632_v7 = vpop.permute.xlu0 %1438  ;;  %v5683_v58 = vld [vmem:[#allocation38_spill] sm:$0xff]  ;;  %v5684_v63 = vld [vmem:[#allocation45_spill] sm:$0xff] }
 0x1ae   : > { %v1312_v38 = vmul.f32 %v5682_v29, %v1284_v11  ;;  %v1350_v56 = vmul.f32 %v4462_v61, %v1278_v22  ;;  %v1351_v17 = vmul.f32 %v4465_v16, %v1284_v11  ;;  %v1389_v18 = vmul.f32 %v4242_v24, %v5683_v58  ;;  %v4646_v6 = vld [vmem:[#allocation7 + $0x21] ss:$4 sm:$0xf] }
 0x1af   : > { %v1390_v13 = vmul.f32 %v5663_v12, %v5684_v63  ;;  %v1401_v49 = vadd.f32 %v4555_v32, %v1323_v23  ;;  %v4640_v39 = vadd.f32 %v4559_v37, %v1324_v48  ;;  %v1319_v14 = vadd.f32 %v1311_v46, %v1217_v47 }
 0x1b0   : > { %v1320_v3 = vadd.f32 %v1312_v38, %v1218_v1  ;;  %v4642_v61 = vadd.f32 %v1350_v56, %v1256_v26  ;;  %v4644_v16 = vadd.f32 %v1351_v17, %v1257_v0  ;;  %v1480_v24 = vrot.slane %v4441_v25, %v3362_v10  ;;  %v4711_v56 = vld [vmem:[#allocation7 + $0x22] ss:$4 sm:$0xf]  ;;  %v5691_v17 = vld [vmem:[#allocation55_spill] sm:$0xff] }
 0x1b1   : > { %v1445_v42 = vpop.permute.xlu1 %1444  ;;  %v4652_v32 = vrot.slane %v4455_v60, %v3357_v5  ;;  %v4656_v12 = vrot.slane %v4455_v60, %v3362_v10  ;;  %v4659_v37 = vrot.slane %v1526_v53, %v3354_v2  ;;  %v1443_v26 = vpop.permute.xlu0 %1442  ;;  %v1397_v1 = vadd.f32 %v1389_v18, %v1319_v14  ;;  %5690 = vst [vmem:[#allocation43_spill] sm:$0xff] %v4711_v56  ;;  %v5693_v18 = vld [vmem:[#allocation30_spill] sm:$0xff] }
 0x1b2   : > { %v4664_v47 = vsel %vm364_vm4, %v4626_v51, %v1445_v42  ;;  %v1398_v0 = vadd.f32 %v1390_v13, %v1320_v3  ;;  %v4667_v25 = vrot.slane %v1565_v4, %v3354_v2  ;;  %v4674_v60 = vsel %vm364_vm4, %v4632_v7, %v1443_v26 }
 0x1b3   : > { %5685 = vst [vmem:[#allocation41_spill] sm:$0xff] %v4652_v32  ;;  %5686 = vst [vmem:[#allocation21_spill] sm:$0xff] %v4656_v12  ;;  %v1490_v9 = vmul.f32 %v4471_v50, %v4664_v47  ;;  %v1613_v52 = vrot.slane %v1604_v21, %v3354_v2  ;;  %v1652_v54 = vrot.slane %v4646_v6, %v3354_v2 }
 0x1b4   : > { %5687 = vst [vmem:[#allocation22_spill] sm:$0xff] %v4664_v47  ;;  %5688 = vst [vmem:[#allocation23_spill] sm:$0xff] %v4674_v60  ;;  %v1486_v59 = vmul.f32 %v4471_v50, %v4674_v60  ;;  %v4682_v29 = vrot.slane %v1526_v53, %v3357_v5  ;;  %v4685_v28 = vrot.slane %v1565_v4, %v3357_v5 }
 0x1b5   : > { %v2180_v43 = vadd.f32 %v4517_v45, %v4513_v36  ;;  %v4689_v20 = vadd.f32 %v1490_v9, %v1400_v19  ;;  %v1449_v22 = vpop.permute.xlu1 %1448  ;;  %v4692_v11 = vrot.slane %v1526_v53, %v5630_v40  ;;  %v4695_v23 = vrot.slane %v1526_v53, %v3362_v10  ;;  %v1447_v38 = vpop.permute.xlu0 %1446  ;;  %v4709_v19 = vld [vmem:[#allocation8 + $0x63] ss:$8 sm:$0xf] }
 0x1b6   : > { %v4698_v50 = vrot.slane %v1565_v4, %v5630_v40  ;;  %v4700_v48 = vadd.f32 %v1486_v59, %v1396_v30  ;;  %v4704_v46 = vsel %vm364_vm4, %v1445_v42, %v1449_v22  ;;  %v4707_v36 = vrot.slane %v1565_v4, %v3362_v10 }
 0x1b7   : > { %5689 = vst [vmem:[#allocation42_spill] sm:$0xff] %v4704_v46  ;;  %v2146_v53 = vmul.f32 %v5691_v17, %v4475_v34  ;;  %v1491_v58 = vmul.f32 %v4495_v27, %v4704_v46  ;;  %v4719_v30 = vsel %vm364_vm4, %v1443_v26, %v1447_v38  ;;  %v4722_v63 = vmul.f32 %v1613_v52, %v5693_v18  ;;  %v5694_v34 = vld [vmem:[#allocation31_spill] sm:$0xff]  ;;  %v5702_v17 = vld [vmem:[#allocation28_spill] sm:$0xff] }
 0x1b8   : > { %5692 = vst [vmem:[#allocation24_spill] sm:$0xff] %v4719_v30  ;;  %v4725_v13 = vmul.f32 %v1652_v54, %v5693_v18  ;;  %v1487_v4 = vmul.f32 %v4495_v27, %v4719_v30  ;;  %v1609_v14 = vrot.slane %v1604_v21, %v5630_v40  ;;  %v2188_v3 = vmax.f32 %v2180_v43, 0.0  ;;  %v4760_v46 = vld [vmem:[#allocation10 + $0x1] ss:$4 sm:$0xf] }
 0x1b9   : > { %v4731_v42 = vmul.f32 %v1613_v52, %v5694_v34  ;;  %v4733_v9 = vadd.f32 %v1491_v58, %v1401_v49  ;;  %v1453_v59 = vpop.permute.xlu1 %1452  ;;  %v1648_v26 = vrot.slane %v4646_v6, %v5630_v40  ;;  %v4739_v12 = vrot.slane %v4709_v19, %v5630_v40  ;;  %v1451_v43 = vpop.permute.xlu0 %1450  ;;  %5699 = vst [vmem:[#allocation59_spill] sm:$0xff] %v4760_v46 }
 0x1ba   : > { %v4743_v18 = vrot.slane %v4711_v56, %v5630_v40  ;;  %v4745_v27 = vadd.f32 %v1487_v4, %v1397_v1  ;;  %v4749_v52 = vsel %vm364_vm4, %v1449_v22, %v1453_v59  ;;  %v4754_v49 = vsel %vm364_vm4, %v1453_v59, %v4626_v51 }
 0x1bb   : > { %5695 = vst [vmem:[#allocation54_spill] sm:$0xff] %v4739_v12  ;;  %5697 = vst [vmem:[#allocation57_spill] sm:$0xff] %v4749_v52  ;;  %v2176_v58 = vadd.f32 %v4517_v45, %v2146_v53  ;;  %v1489_v32 = vmul.f32 %v4507_v57, %v4754_v49  ;;  %v1492_v30 = vmul.f32 %v1480_v24, %v4749_v52  ;;  %v2196_v51 = vmin.f32 %v2188_v3, 6.0 }
 0x1bc   : > { %5696 = vst [vmem:[#allocation56_spill] sm:$0xff] %v4743_v18  ;;  %5698 = vst [vmem:[#allocation60_spill] sm:$0xff] %v4754_v49  ;;  %v4763_v1 = vmul.f32 %v1652_v54, %v5694_v34  ;;  %v1617_v22 = vrot.slane %v1604_v21, %v3357_v5  ;;  %v4768_v4 = vsel %vm364_vm4, %v1447_v38, %v1451_v43 }
 0x1bd   : > { %5700 = vst [vmem:[#allocation48_spill] sm:$0xff] %v4768_v4  ;;  %v4773_v45 = vsel %vm364_vm4, %v1451_v43, %v4632_v7  ;;  %v1621_v53 = vrot.slane %v1604_v21, %v3362_v10  ;;  %v4777_v59 = vadd.f32 %v1489_v32, %v4596_v55  ;;  %v4780_v54 = vadd.f32 %v1492_v30, %v4640_v39  ;;  %v1504_v49 = vpop.permute.xlu1 %1503  ;;  %v4785_v52 = vpop.permute.xlu0 %1501  ;;  %v5706_v43 = vld [vmem:[#allocation67_spill] sm:$0xff] }
 0x1be   : > { %5701 = vst [vmem:[#allocation64_spill] sm:$0xff] %v4773_v45  ;;  %v1485_v34 = vmul.f32 %v4507_v57, %v4773_v45  ;;  %v1488_v38 = vmul.f32 %v1480_v24, %v4768_v4  ;;  %v4788_v7 = vmul.f32 %v1609_v14, %v5702_v17  ;;  %v4791_v3 = vmul.f32 %v1648_v26, %v5702_v17  ;;  %v5704_v24 = vld [vmem:[#allocation29_spill] sm:$0xff]  ;;  %v5707_v45 = vld [vmem:[#allocation32_spill] sm:$0xff] }
 0x1bf   : > { %v4795_v55 = vrot.slane %v4760_v46, %v5630_v40  ;;  %v2184_v39 = vmax.f32 %v2176_v58, 0.0  ;;  %v4803_v32 = vmul.f32 %v1609_v14, %v5704_v24  ;;  %v4806_v30 = vmul.f32 %v1648_v26, %v5704_v24  ;;  %v5708_v40 = vld [vmem:[#allocation34_spill] sm:$0xff]  ;;  %v5709_v58 = vld [vmem:[#allocation53_spill] sm:$0xff] }
 0x1c0   : > { %v4798_v21 = vadd.f32 %v1485_v34, %v4602_v31  ;;  %v4800_v57 = vadd.f32 %v1488_v38, %v1398_v0  ;;  %v4810_v17 = vrot.slane %v5706_v43, %v3354_v2  ;;  %v1632_v4 = vmul.f32 %v1617_v22, %v5707_v45  ;;  %v5712_v38 = vld [vmem:[#allocation33_spill] sm:$0xff] }
 0x1c1   : > { %5703 = vst [vmem:[#allocation65_spill] sm:$0xff] %v4795_v55  ;;  %5705 = vst [vmem:[#allocation52_spill] sm:$0xff] %v4806_v30  ;;  %v4814_v55 = vmul.f32 %v1621_v53, %v5708_v40  ;;  %v1656_v31 = vrot.slane %v4646_v6, %v3357_v5  ;;  %v1508_v0 = vpop.permute.xlu1 %1507  ;;  %v4819_v34 = vadd.f32 %v5709_v58, %v2196_v51  ;;  %v1506_v47 = vpop.permute.xlu0 %1505  ;;  %v4832_v43 = vmin.f32 %v2184_v39, 6.0  ;;  %v5715_v58 = vld [vmem:[#allocation70_spill] sm:$0xff]  ;;  %v5719_v30 = vld [vmem:[#allocation35_spill] sm:$0xff] }
 0x1c2   : > { %v4823_v14 = vrot.slane %v4709_v19, %v3354_v2  ;;  %v1660_v26 = vrot.slane %v4646_v6, %v3362_v10  ;;  %v4828_v24 = vmul.f32 %v1617_v22, %v5712_v38  ;;  %v1522_v60 = vsel %vm419_vm7, %v1504_v49, %v1508_v0 }
 0x1c3   : > { %5710 = vst [vmem:[#allocation62_spill] sm:$0xff] %v4819_v34  ;;  %5713 = vst [vmem:[#allocation66_spill] sm:$0xff] %v4832_v43  ;;  %v4836_v51 = vrot.slane %v4711_v56, %v3354_v2  ;;  %v4840_v34 = vrot.slane %v5715_v58, %v3354_v2  ;;  %v1592_v6 = vmul.f32 %v4667_v25, %v1522_v60  ;;  %v5718_v56 = vld [vmem:[#allocation36_spill] sm:$0xff] }
 0x1c4   : > { %5711 = vst [vmem:[#allocation63_spill] sm:$0xff] %v4823_v14  ;;  %v1553_v14 = vmul.f32 %v4659_v37, %v1522_v60  ;;  %v1521_v22 = vsel %vm419_vm7, %v4785_v52, %v1506_v47  ;;  %v4849_v39 = vrot.slane %v4760_v46, %v3354_v2  ;;  %v4855_v58 = vmul.f32 %v5718_v56, %v4810_v17 }
 0x1c5   : > { %5714 = vst [vmem:[#allocation68_spill] sm:$0xff] %v4836_v51  ;;  %5716 = vst [vmem:[#allocation38_spill] sm:$0xff] %v4840_v34  ;;  %v1549_v43 = vmul.f32 %v4659_v37, %v1521_v22  ;;  %v1588_v51 = vmul.f32 %v4667_v25, %v1521_v22  ;;  %v1671_v34 = vmul.f32 %v1656_v31, %v5707_v45  ;;  %v1512_v18 = vpop.permute.xlu1 %1511  ;;  %v1510_v22 = vpop.permute.xlu0 %1509 }
 0x1c6   : > { %5717 = vst [vmem:[#allocation45_spill] sm:$0xff] %v4849_v39  ;;  %v1561_v60 = vadd.f32 %v1553_v14, %v4689_v20  ;;  %v1600_v10 = vadd.f32 %v1592_v6, %v4604_v41  ;;  %v1672_v12 = vmul.f32 %v1660_v26, %v5708_v40  ;;  %v1629_v46 = vmul.f32 %v1621_v53, %v5719_v30 }
 0x1c7   : > { %v1557_v39 = vadd.f32 %v1549_v43, %v4700_v48  ;;  %v1596_v37 = vadd.f32 %v1588_v51, %v4608_v35  ;;  %v1520_v25 = vsel %vm419_vm7, %v1508_v0, %v1512_v18  ;;  %v1667_v56 = vmul.f32 %v1656_v31, %v5712_v38 }
 0x1c8   : > { %v1554_v45 = vmul.f32 %v4682_v29, %v1520_v25  ;;  %v1593_v20 = vmul.f32 %v4685_v28, %v1520_v25  ;;  %v1519_v41 = vsel %vm419_vm7, %v1506_v47, %v1510_v22  ;;  %v4872_v40 = vadd.f32 %v4725_v13, %v1600_v10 }
 0x1c9   : > { %v1550_v48 = vmul.f32 %v4682_v29, %v1519_v41  ;;  %v1589_v35 = vmul.f32 %v4685_v28, %v1519_v41  ;;  %v4877_v53 = vadd.f32 %v4722_v63, %v1561_v60  ;;  %v4880_v43 = vadd.f32 %v4731_v42, %v1557_v39  ;;  %v1516_v14 = vpop.permute.xlu1 %1515  ;;  %v1514_v42 = vpop.permute.xlu0 %1513 }
 0x1ca   : > { %v1562_v31 = vadd.f32 %v1554_v45, %v4733_v9  ;;  %v1601_v0 = vadd.f32 %v1593_v20, %v4622_v15  ;;  %v4885_v47 = vadd.f32 %v4763_v1, %v1596_v37  ;;  %v1668_v10 = vmul.f32 %v1660_v26, %v5719_v30 }
 0x1cb   : > { %v1558_v29 = vadd.f32 %v1550_v48, %v4745_v27  ;;  %v1597_v28 = vadd.f32 %v1589_v35, %v4642_v61  ;;  %v1518_v63 = vsel %vm419_vm7, %v1512_v18, %v1516_v14  ;;  %v1524_v13 = vsel %vm419_vm7, %v1516_v14, %v1504_v49  ;;  %v5723_v48 = vld [vmem:[#allocation56_spill] sm:$0xff] }
 0x1cc   : > { %v1552_v9 = vmul.f32 %v4692_v11, %v1524_v13  ;;  %v1555_v15 = vmul.f32 %v4695_v23, %v1518_v63  ;;  %v1591_v1 = vmul.f32 %v4698_v50, %v1524_v13  ;;  %v1594_v38 = vmul.f32 %v4707_v36, %v1518_v63  ;;  %v5726_v13 = vld [vmem:[#allocation38_spill] sm:$0xff] }
 0x1cd   : > { %v1517_v27 = vsel %vm419_vm7, %v1510_v22, %v1514_v42  ;;  %v1523_v61 = vsel %vm419_vm7, %v1514_v42, %v4785_v52  ;;  %v4903_v18 = vadd.f32 %v1632_v4, %v1562_v31  ;;  %v4905_v30 = vadd.f32 %v1671_v34, %v1601_v0  ;;  %v4911_v39 = vpop.permute.xlu1 %1683  ;;  %v4917_v34 = vpop.permute.xlu0 %1681  ;;  %v5720_v22 = vld [vmem:[#allocation37_spill] sm:$0xff] }
 0x1ce   : > { %v1560_v49 = vadd.f32 %v1552_v9, %v4777_v59  ;;  %v1563_v26 = vadd.f32 %v1555_v15, %v4780_v54  ;;  %v1599_v51 = vadd.f32 %v1591_v1, %v4583_v44  ;;  %v1602_v6 = vadd.f32 %v1594_v38, %v4624_v33  ;;  %v5728_v1 = vld [vmem:[#allocation22_spill] sm:$0xff]  ;;  %v5729_v38 = vld [vmem:[#allocation69_spill] sm:$0xff] }
 0x1cf   : > { %v1548_v60 = vmul.f32 %v4692_v11, %v1523_v61  ;;  %v1551_v37 = vmul.f32 %v4695_v23, %v1517_v27  ;;  %v1587_v52 = vmul.f32 %v4698_v50, %v1523_v61  ;;  %v1590_v4 = vmul.f32 %v4707_v36, %v1517_v27 }
 0x1d0   : > { %v1677_v59 = vadd.f32 %v4791_v3, %v1599_v51  ;;  %v1638_v54 = vadd.f32 %v4788_v7, %v1560_v49  ;;  %v4921_v25 = vadd.f32 %v1672_v12, %v1602_v6  ;;  %v4924_v44 = vadd.f32 %v4814_v55, %v1563_v26  ;;  %v5730_v51 = vld [vmem:[#allocation23_spill] sm:$0xff] }
 0x1d1   : > { %v1556_v33 = vadd.f32 %v1548_v60, %v4798_v21  ;;  %v1559_v11 = vadd.f32 %v1551_v37, %v4800_v57  ;;  %v1595_v23 = vadd.f32 %v1587_v52, %v4587_v8  ;;  %v1598_v50 = vadd.f32 %v1590_v4, %v4644_v16  ;;  %v1688_v36 = vpop.permute.xlu1 %1687  ;;  %v5721_v16 = vld [vmem:[#allocation52_spill] sm:$0xff]  ;;  %v1686_v57 = vpop.permute.xlu0 %1685  ;;  %v5731_v60 = vld [vmem:[#allocation63_spill] sm:$0xff] }
 0x1d2   : > { %v2147_v45 = vmul.f32 %v5720_v22, %v4810_v17  ;;  %v4934_v7 = vrot.slane %v4709_v19, %v3357_v5  ;;  %v4937_v12 = vadd.f32 %v4828_v24, %v1558_v29  ;;  %v4939_v3 = vadd.f32 %v1667_v56, %v1597_v28  ;;  %v5722_v17 = vld [vmem:[#allocation54_spill] sm:$0xff]  ;;  %v5732_v37 = vld [vmem:[#allocation68_spill] sm:$0xff] }
 0x1d3   : > { %v1702_v55 = vsel %vm522_vm8, %v4911_v39, %v1688_v36  ;;  %v1634_v8 = vadd.f32 %v4803_v32, %v1556_v33  ;;  %v1673_v21 = vadd.f32 %v5721_v16, %v1595_v23  ;;  %v4946_v20 = vadd.f32 %v1629_v46, %v1559_v11  ;;  %v5724_v32 = vld [vmem:[#allocation27_spill] sm:$0xff] }
 0x1d4   : > { %v1732_v41 = vmul.f32 %v5722_v17, %v1702_v55  ;;  %v1771_v35 = vmul.f32 %v5723_v48, %v1702_v55  ;;  %v1701_v56 = vsel %vm522_vm8, %v4917_v34, %v1686_v57  ;;  %v4953_v24 = vadd.f32 %v1668_v10, %v1598_v50  ;;  %v5725_v46 = vld [vmem:[#allocation43_spill] sm:$0xff] }
 0x1d5   : > { %v1728_v31 = vmul.f32 %v5722_v17, %v1701_v56  ;;  %v1767_v0 = vmul.f32 %v5723_v48, %v1701_v56  ;;  %v1723_v14 = vrot.slane %v4709_v19, %v5724_v32  ;;  %v1758_v29 = vrot.slane %v5725_v46, %v3357_v5  ;;  %v1692_v9 = vpop.permute.xlu1 %1691  ;;  %v5727_v10 = vld [vmem:[#allocation67_spill] sm:$0xff]  ;;  %v1690_v26 = vpop.permute.xlu0 %1689  ;;  %v5734_v48 = vld [vmem:[#allocation70_spill] sm:$0xff] }
 0x1d6   : > { %v1740_v28 = vadd.f32 %v1732_v41, %v1638_v54  ;;  %v4961_v63 = vadd.f32 %v1771_v35, %v1677_v59  ;;  %v4965_v42 = vadd.f32 %v5726_v13, %v4855_v58  ;;  %v2137_v15 = vrot.slane %v5727_v10, %v3357_v5 }
 0x1d7   : > { %v1810_v27 = vmul.f32 %v5729_v38, %v5728_v1  ;;  %v1736_v61 = vadd.f32 %v1728_v31, %v1634_v8  ;;  %v4971_v49 = vadd.f32 %v1767_v0, %v1673_v21  ;;  %v1700_v19 = vsel %vm522_vm8, %v1688_v36, %v1692_v9  ;;  %v5735_v31 = vld [vmem:[#allocation58_spill] sm:$0xff] }
 0x1d8   : > { %v1806_v6 = vmul.f32 %v5729_v38, %v5730_v51  ;;  %v1733_v58 = vmul.f32 %v5731_v60, %v1700_v19  ;;  %v1772_v52 = vmul.f32 %v5732_v37, %v1700_v19  ;;  %v1699_v4 = vsel %vm522_vm8, %v1686_v57, %v1690_v26  ;;  %v5738_v51 = vld [vmem:[#allocation47_spill] sm:$0xff] }
 0x1d9   : > { %v1729_v59 = vmul.f32 %v5731_v60, %v1699_v4  ;;  %v1768_v54 = vmul.f32 %v5732_v37, %v1699_v4  ;;  %v2141_v33 = vrot.slane %v5727_v10, %v5724_v32  ;;  %v4985_v11 = vadd.f32 %v1810_v27, %v1740_v28  ;;  %v1696_v55 = vpop.permute.xlu1 %1695  ;;  %v1694_v17 = vpop.permute.xlu0 %1693  ;;  %v5736_v28 = vld [vmem:[#allocation66_spill] sm:$0xff]  ;;  %v5739_v4 = vld [vmem:[#allocation61_spill] sm:$0xff] }
 0x1da   : > { %v1741_v23 = vadd.f32 %v1733_v58, %v4877_v53  ;;  %v4989_v50 = vadd.f32 %v1772_v52, %v4872_v40  ;;  %v1762_v36 = vrot.slane %v5725_v46, %v5724_v32  ;;  %v4993_v8 = vadd.f32 %v1806_v6, %v1736_v61  ;;  %v5733_v40 = vld [vmem:[#allocation40_spill] sm:$0xff] }
 0x1db   : > { %v4996_v16 = vadd.f32 %v5726_v13, %v2147_v45  ;;  %v1737_v21 = vadd.f32 %v1729_v59, %v4880_v43  ;;  %v5000_v57 = vadd.f32 %v1768_v54, %v4885_v47  ;;  %v1698_v53 = vsel %vm522_vm8, %v1692_v9, %v1696_v55  ;;  %v5737_v13 = vld [vmem:[#allocation55_spill] sm:$0xff]  ;;  %v5740_v54 = vld [vmem:[#allocation42_spill] sm:$0xff] }
 0x1dc   : > { %v2152_v41 = vmul.f32 %v5733_v40, %v2137_v15  ;;  %v2167_v35 = vrot.slane %v5734_v48, %v3357_v5  ;;  %v1704_v56 = vsel %vm522_vm8, %v1696_v55, %v4911_v39  ;;  %v1734_v45 = vmul.f32 %v4934_v7, %v1698_v53  ;;  %v1882_v58 = vld [vmem:[#allocation8 + $0x80] ss:$8 sm:$0xf] }
 0x1dd   : > { %v2153_v43 = vmul.f32 %v5735_v31, %v2141_v33  ;;  %v2171_v47 = vrot.slane %v5734_v48, %v5724_v32  ;;  %v1735_v0 = vmul.f32 %v1723_v14, %v1704_v56  ;;  %v1773_v46 = vmul.f32 %v1758_v29, %v1698_v53  ;;  %v1860_v27 = vpop.permute.xlu1 %1859  ;;  %v5026_v60 = vpop.permute.xlu0 %1857  ;;  %v5741_v55 = vld [vmem:[#allocation71_spill] sm:$0xff] }
 0x1de   : > { %v5016_v9 = vadd.f32 %v5737_v13, %v5736_v28  ;;  %v2189_v10 = vmax.f32 %v4965_v42, 0.0  ;;  %v1742_v1 = vadd.f32 %v1734_v45, %v4903_v18  ;;  %v1774_v38 = vmul.f32 %v1762_v36, %v1704_v56  ;;  %v5742_v56 = vld [vmem:[#allocation24_spill] sm:$0xff]  ;;  %v5743_v13 = vld [vmem:[#allocation57_spill] sm:$0xff] }
 0x1df   : > { %v2185_v39 = vmax.f32 %v4996_v16, 0.0  ;;  %v1743_v61 = vadd.f32 %v1735_v0, %v4924_v44  ;;  %v5023_v19 = vadd.f32 %v1773_v46, %v4905_v30  ;;  %v2148_v6 = vmul.f32 %v5738_v51, %v2137_v15 }
 0x1e0   : > { %v2182_v37 = vadd.f32 %v2167_v35, %v2152_v41  ;;  %v5029_v52 = vadd.f32 %v1774_v38, %v4921_v25  ;;  %v1697_v18 = vsel %vm522_vm8, %v1690_v26, %v1694_v17  ;;  %v1703_v42 = vsel %vm522_vm8, %v1694_v17, %v4917_v34  ;;  %v5745_v38 = vld [vmem:[#allocation48_spill] sm:$0xff] }
 0x1e1   : > { %v2183_v44 = vadd.f32 %v2171_v47, %v2153_v43  ;;  %v2149_v30 = vmul.f32 %v5739_v4, %v2141_v33  ;;  %v1730_v59 = vmul.f32 %v4934_v7, %v1697_v18  ;;  %v1731_v15 = vmul.f32 %v1723_v14, %v1703_v42  ;;  %v1864_v48 = vpop.permute.xlu1 %1863  ;;  %v1862_v33 = vpop.permute.xlu0 %1861 }
 0x1e2   : > { %v1811_v16 = vmul.f32 %v5741_v55, %v5740_v54  ;;  %v1769_v53 = vmul.f32 %v1758_v29, %v1697_v18  ;;  %v1770_v41 = vmul.f32 %v1762_v36, %v1703_v42  ;;  %v1891_v25 = vrot.slane %v1882_v58, %v3354_v2  ;;  %v5746_v42 = vld [vmem:[#allocation60_spill] sm:$0xff] }
 0x1e3   : > { %v1807_v26 = vmul.f32 %v5741_v55, %v5742_v56  ;;  %v2178_v45 = vadd.f32 %v2167_v35, %v2148_v6  ;;  %v1738_v34 = vadd.f32 %v1730_v59, %v4937_v12  ;;  %v1739_v17 = vadd.f32 %v1731_v15, %v4946_v20  ;;  %v5747_v59 = vld [vmem:[#allocation21_spill] sm:$0xff]  ;;  %v5749_v56 = vld [vmem:[#allocation36_spill] sm:$0xff] }
 0x1e4   : > { %v2197_v43 = vmin.f32 %v2189_v10, 6.0  ;;  %v5046_v7 = vadd.f32 %v1769_v53, %v4939_v3  ;;  %v5049_v14 = vadd.f32 %v1770_v41, %v4953_v24  ;;  %v1819_v29 = vadd.f32 %v1811_v16, %v1741_v23  ;;  %v5744_v23 = vld [vmem:[#allocation41_spill] sm:$0xff] }
 0x1e5   : > { %v2190_v36 = vmax.f32 %v2182_v37, 0.0  ;;  %v5053_v0 = vsel %vm364_vm4, %v1860_v27, %v1864_v48  ;;  %v1815_v46 = vadd.f32 %v1807_v26, %v1737_v21  ;;  %v5058_v12 = vsel %vm364_vm4, %v5026_v60, %v1862_v33  ;;  %v1868_v24 = vpop.permute.xlu1 %1867  ;;  %v1866_v18 = vpop.permute.xlu0 %1865 }
 0x1e6   : > { %v2191_v20 = vmax.f32 %v2183_v44, 0.0  ;;  %v2179_v35 = vadd.f32 %v2171_v47, %v2149_v30  ;;  %v1909_v3 = vmul.f32 %v1891_v25, %v5053_v0  ;;  %v1895_v28 = vrot.slane %v1882_v58, %v3357_v5  ;;  %v5748_v47 = vld [vmem:[#allocation26_spill] sm:$0xff] }
 0x1e7   : > { %v1812_v10 = vmul.f32 %v5744_v23, %v5743_v13  ;;  %v1808_v6 = vmul.f32 %v5744_v23, %v5745_v38  ;;  %v2186_v37 = vmax.f32 %v2178_v45, 0.0  ;;  %v1905_v21 = vmul.f32 %v1891_v25, %v5058_v12  ;;  %v1945_v38 = vld [vmem:[#allocation8 + $0x81] ss:$8 sm:$0xf] }
 0x1e8   : > { %v1813_v15 = vmul.f32 %v5747_v59, %v5746_v42  ;;  %v5069_v44 = vadd.f32 %v1909_v3, %v1819_v29  ;;  %v1887_v30 = vrot.slane %v1882_v58, %v5748_v47  ;;  %v1899_v54 = vrot.slane %v1882_v58, %v5724_v32 }
 0x1e9   : > { %v5073_v55 = vadd.f32 %v1905_v21, %v1815_v46  ;;  %v1820_v16 = vadd.f32 %v1812_v10, %v1742_v1  ;;  %v5077_v53 = vsel %vm364_vm4, %v1864_v48, %v1868_v24  ;;  %v1816_v41 = vadd.f32 %v1808_v6, %v1738_v34  ;;  %v1872_v3 = vpop.permute.xlu1 %1871  ;;  %v1870_v34 = vpop.permute.xlu0 %1869 }
 0x1ea   : > { %v5080_v25 = vadd.f32 %v5749_v56, %v2197_v43  ;;  %v2193_v26 = vmin.f32 %v2185_v39, 6.0  ;;  %v2187_v45 = vmax.f32 %v2179_v35, 0.0  ;;  %v1910_v29 = vmul.f32 %v1895_v28, %v5077_v53  ;;  %v5750_v43 = vld [vmem:[#allocation64_spill] sm:$0xff] }
 0x1eb   : > { %v5085_v13 = vsel %vm364_vm4, %v1862_v33, %v1866_v18  ;;  %v1821_v58 = vadd.f32 %v1813_v15, %v1743_v61  ;;  %v5089_v1 = vsel %vm364_vm4, %v1868_v24, %v1872_v3  ;;  %v5093_v48 = vsel %vm364_vm4, %v1872_v3, %v1860_v27 }
 0x1ec   : > { %v1809_v39 = vmul.f32 %v5747_v59, %v5750_v43  ;;  %v2198_v46 = vmin.f32 %v2190_v36, 6.0  ;;  %v5097_v35 = vadd.f32 %v1910_v29, %v1820_v16  ;;  %v1906_v23 = vmul.f32 %v1895_v28, %v5085_v13  ;;  %v2086_v36 = vld [vmem:[#allocation8 + $0x84] ss:$8 sm:$0xf] }
 0x1ed   : > { %v2199_v33 = vmin.f32 %v2191_v20, 6.0  ;;  %v2194_v10 = vmin.f32 %v2186_v37, 6.0  ;;  %v1908_v61 = vmul.f32 %v1887_v30, %v5093_v48  ;;  %v1911_v24 = vmul.f32 %v1899_v54, %v5089_v1  ;;  %v1923_v59 = vpop.permute.xlu1 %1922  ;;  %v1921_v16 = vpop.permute.xlu0 %1920 }
 0x1ee   : > { %v2195_v6 = vmin.f32 %v2187_v45, 6.0  ;;  %v1914_v21 = vadd.f32 %v1906_v23, %v1816_v41  ;;  %v1817_v27 = vadd.f32 %v1809_v39, %v1739_v17  ;;  %v5104_v42 = vsel %vm364_vm4, %v1866_v18, %v1870_v34  ;;  %v5753_v18 = vld [vmem:[#allocation59_spill] sm:$0xff] }
 0x1ef   : > { %v5107_v15 = vadd.f32 %v1908_v61, %v4985_v11  ;;  %v5109_v28 = vadd.f32 %v1911_v24, %v1821_v58  ;;  %v5114_v20 = vsel %vm364_vm4, %v1870_v34, %v5026_v60  ;;  %v1907_v37 = vmul.f32 %v1899_v54, %v5104_v42  ;;  %v5162_v61 = vld [vmem:[#allocation10 + $0x2] ss:$4 sm:$0xf]  ;;  %v5760_v24 = vld [vmem:[#allocation65_spill] sm:$0xff] }
 0x1f0   : > { %5751 = vst [vmem:[#allocation30_spill] sm:$0xff] %v5114_v20  ;;  %v5118_v17 = vadd.f32 %v5720_v22, %v2193_v26  ;;  %v5122_v41 = vrot.slane %v5753_v18, %v3357_v5  ;;  %v1904_v11 = vmul.f32 %v1887_v30, %v5114_v20  ;;  %v1954_v56 = vrot.slane %v1945_v38, %v3354_v2 }
 0x1f1   : > { %v5128_v45 = vrot.slane %v5753_v18, %v5724_v32  ;;  %v5131_v60 = vadd.f32 %v5733_v40, %v2198_v46  ;;  %v5134_v54 = vadd.f32 %v5735_v31, %v2199_v33  ;;  %v5136_v22 = vadd.f32 %v1907_v37, %v1817_v27  ;;  %v1927_v58 = vpop.permute.xlu1 %1926  ;;  %v1925_v39 = vpop.permute.xlu0 %1924  ;;  %v2047_v33 = vld [vmem:[#allocation8 + $0x83] ss:$8 sm:$0xf] }
 0x1f2   : > { %5752 = vst [vmem:[#allocation31_spill] sm:$0xff] %v5118_v17  ;;  %v5139_v26 = vrot.slane %v2086_v36, %v5748_v47  ;;  %v5142_v29 = vrot.slane %v2086_v36, %v3354_v2  ;;  %v5145_v30 = vrot.slane %v2086_v36, %v3357_v5  ;;  %v1912_v3 = vadd.f32 %v1904_v11, %v4993_v8  ;;  %v5761_v11 = vld [vmem:[#allocation45_spill] sm:$0xff]  ;;  %v5768_v17 = vld [vmem:[#allocation16_spill] sm:$0xff] }
 0x1f3   : > { %5754 = vst [vmem:[#allocation28_spill] sm:$0xff] %v5131_v60  ;;  %5755 = vst [vmem:[#allocation29_spill] sm:$0xff] %v5134_v54  ;;  %v5149_v40 = vadd.f32 %v5738_v51, %v2194_v10  ;;  %v5152_v31 = vadd.f32 %v5739_v4, %v2195_v6  ;;  %v5155_v34 = vrot.slane %v2086_v36, %v5724_v32  ;;  %v5758_v51 = vld [vmem:[#allocation39_spill] sm:$0xff]  ;;  %v5762_v54 = vld [vmem:[#allocation46_spill] sm:$0xff] }
 0x1f4   : > { %v1941_v43 = vsel %vm419_vm7, %v1923_v59, %v1927_v58  ;;  %v1940_v23 = vsel %vm419_vm7, %v1921_v16, %v1925_v39  ;;  %v1958_v8 = vrot.slane %v1945_v38, %v3357_v5  ;;  %v5759_v10 = vld [vmem:[#allocation51_spill] sm:$0xff]  ;;  %v2227_v6 = vadd.f32 %v5760_v24, %v4961_v63  ;;  %v5763_v60 = vld [vmem:[#allocation50_spill] sm:$0xff] }
 0x1f5   : > { %5756 = vst [vmem:[#allocation32_spill] sm:$0xff] %v5149_v40  ;;  %5757 = vst [vmem:[#allocation34_spill] sm:$0xff] %v5152_v31  ;;  %v1972_v46 = vmul.f32 %v1954_v56, %v1941_v43  ;;  %v2011_v4 = vmul.f32 %v5759_v10, %v5758_v51  ;;  %v1968_v27 = vmul.f32 %v1954_v56, %v1940_v23  ;;  %v1931_v40 = vpop.permute.xlu1 %1930  ;;  %v1929_v56 = vpop.permute.xlu0 %1928 }
 0x1f6   : > { %v1950_v36 = vrot.slane %v1945_v38, %v5748_v47  ;;  %v1962_v37 = vrot.slane %v1945_v38, %v5724_v32  ;;  %v2223_v18 = vadd.f32 %v5760_v24, %v4971_v49  ;;  %v2228_v43 = vadd.f32 %v5761_v11, %v4989_v50 }
 0x1f7   : > { %v1980_v31 = vadd.f32 %v1972_v46, %v5069_v44  ;;  %v2010_v51 = vmul.f32 %v5763_v60, %v5762_v54  ;;  %v5178_v10 = vadd.f32 %v1968_v27, %v5073_v55  ;;  %v1939_v63 = vsel %vm419_vm7, %v1927_v58, %v1931_v40  ;;  %v5765_v60 = vld [vmem:[#allocation19_spill] sm:$0xff]  ;;  %v5766_v55 = vld [vmem:[#allocation20_spill] sm:$0xff]  ;;  %v5767_v27 = vld [vmem:[#allocation49_spill] sm:$0xff] }
 0x1f8   : > { %v5183_v38 = vrot.slane %v2047_v33, %v5748_v47  ;;  %v5187_v49 = vrot.slane %v5162_v61, %v5748_v47  ;;  %v1973_v50 = vmul.f32 %v1958_v8, %v1939_v63  ;;  %v1938_v44 = vsel %vm419_vm7, %v1925_v39, %v1929_v56 }
 0x1f9   : > { %5764 = vst [vmem:[#allocation53_spill] sm:$0xff] %v5178_v10  ;;  %v5191_v46 = vadd.f32 %v2011_v4, %v1980_v31  ;;  %v2012_v54 = vmul.f32 %v5766_v55, %v5765_v60  ;;  %v2235_v23 = vmax.f32 %v2227_v6, 0.0  ;;  %v1969_v24 = vmul.f32 %v1958_v8, %v1938_v44  ;;  %v1935_v31 = vpop.permute.xlu1 %1934 }
 0x1fa   : > { %v5196_v58 = vrot.slane %v2047_v33, %v3354_v2  ;;  %v2013_v10 = vmul.f32 %v5768_v17, %v5767_v27  ;;  %v2231_v20 = vmax.f32 %v2223_v18, 0.0  ;;  %v2236_v47 = vmax.f32 %v2228_v43, 0.0  ;;  %v1933_v17 = vpop.permute.xlu0 %1932 }
 0x1fb   : > { %v2224_v63 = vadd.f32 %v5761_v11, %v5000_v57  ;;  %v1981_v39 = vadd.f32 %v1973_v50, %v5097_v35  ;;  %v2229_v4 = vadd.f32 %v5122_v41, %v5023_v19  ;;  %v5205_v60 = vadd.f32 %v1969_v24, %v1914_v21 }
 0x1fc   : > { %v1937_v8 = vsel %vm419_vm7, %v1931_v40, %v1935_v31  ;;  %v1943_v6 = vsel %vm419_vm7, %v1935_v31, %v1923_v59  ;;  %v1936_v57 = vsel %vm419_vm7, %v1929_v56, %v1933_v17  ;;  %v1942_v35 = vsel %vm419_vm7, %v1933_v17, %v1921_v16 }
 0x1fd   : > { %v1971_v18 = vmul.f32 %v1950_v36, %v1943_v6  ;;  %v1974_v43 = vmul.f32 %v1962_v37, %v1937_v8  ;;  %v2243_v11 = vmin.f32 %v2235_v23, 6.0  ;;  %v1967_v50 = vmul.f32 %v1950_v36, %v1942_v35  ;;  %v2025_v24 = vpop.permute.xlu1 %2024 }
 0x1fe   : > { %v1970_v19 = vmul.f32 %v1962_v37, %v1936_v57  ;;  %v5215_v21 = vadd.f32 %v2012_v54, %v1981_v39  ;;  %v2239_v44 = vmin.f32 %v2231_v20, 6.0  ;;  %v2232_v55 = vmax.f32 %v2224_v63, 0.0  ;;  %v5224_v23 = vpop.permute.xlu0 %2022 }
 0x1ff   : > { %v1979_v40 = vadd.f32 %v1971_v18, %v5107_v15  ;;  %v1982_v59 = vadd.f32 %v1974_v43, %v5109_v28  ;;  %v2244_v27 = vmin.f32 %v2236_v47, 6.0  ;;  %v5221_v31 = vadd.f32 %v5128_v45, %v5029_v52 }
 0x200   : > { %v1975_v56 = vadd.f32 %v1967_v50, %v1912_v3  ;;  %v1978_v16 = vadd.f32 %v1970_v19, %v5136_v22  ;;  %v2237_v36 = vmax.f32 %v2229_v4, 0.0  ;;  %v5228_v20 = vrot.slane %v5162_v61, %v3354_v2  ;;  %v5769_v3 = vld [vmem:[#allocation62_spill] sm:$0xff]  ;;  %v5770_v4 = vld [vmem:[#allocation17_spill] sm:$0xff] }
 0x201   : > { %v2018_v37 = vadd.f32 %v2010_v51, %v1979_v40  ;;  %v2021_v15 = vadd.f32 %v2013_v10, %v1982_v59  ;;  %v5232_v28 = vadd.f32 %v5122_v41, %v5046_v7  ;;  %v5235_v54 = vrot.slane %v2047_v33, %v3357_v5  ;;  %v2029_v7 = vpop.permute.xlu1 %2028 }
 0x202   : > { %v5238_v52 = vrot.slane %v2047_v33, %v5724_v32  ;;  %v5242_v22 = vrot.slane %v5162_v61, %v3357_v5  ;;  %v2306_v51 = vadd.f32 %v5769_v3, %v2243_v11  ;;  %v5246_v2 = vadd.f32 %v5016_v9, %v2239_v44  ;;  %v2027_v63 = vpop.permute.xlu0 %2026 }
 0x203   : > { %v5250_v10 = vadd.f32 %v5128_v45, %v5049_v14  ;;  %v5254_v41 = vrot.slane %v5162_v61, %v5724_v32  ;;  %v5257_v33 = vadd.f32 %v5080_v25, %v2244_v27  ;;  %v5259_v47 = vmin.f32 %v2232_v55, 6.0  ;;  %v5772_v55 = vld [vmem:[#allocation53_spill] sm:$0xff] }
 0x204   : > { %v2238_v5 = vmax.f32 %v5221_v31, 0.0  ;;  %v2043_v9 = vsel %vm522_vm8, %v2025_v24, %v2029_v7  ;;  %v5264_v39 = vmin.f32 %v2237_v36, 6.0  ;;  %v2112_v14 = vmul.f32 %v5139_v26, %v5053_v0 }
 0x205   : > { %v2073_v45 = vmul.f32 %v5183_v38, %v2043_v9  ;;  %v2042_v32 = vsel %vm522_vm8, %v5224_v23, %v2027_v63  ;;  %v2233_v25 = vmax.f32 %v5232_v28, 0.0  ;;  %v2108_v61 = vmul.f32 %v5139_v26, %v5058_v12  ;;  %v2033_v57 = vpop.permute.xlu1 %2032 }
 0x206   : > { %v2014_v8 = vadd.f32 %v5770_v4, %v1975_v56  ;;  %v2069_v6 = vmul.f32 %v5183_v38, %v2042_v32  ;;  %v2234_v17 = vmax.f32 %v5250_v10, 0.0  ;;  %v2113_v0 = vmul.f32 %v5142_v29, %v5077_v53  ;;  %v2031_v11 = vpop.permute.xlu0 %2030 }
 0x207   : > { %v2109_v18 = vmul.f32 %v5142_v29, %v5085_v13  ;;  %v2081_v43 = vadd.f32 %v2073_v45, %v2018_v37  ;;  %v2114_v35 = vmul.f32 %v5145_v30, %v5089_v1  ;;  %v2115_v12 = vmul.f32 %v5155_v34, %v5093_v48  ;;  %v5771_v29 = vld [vmem:[#allocation30_spill] sm:$0xff]  ;;  %v5775_v37 = vld [vmem:[#allocation25_spill] sm:$0xff] }
 0x208   : > { %v2077_v26 = vadd.f32 %v2069_v6, %v2014_v8  ;;  %v2041_v38 = vsel %vm522_vm8, %v2029_v7, %v2033_v57  ;;  %v2110_v50 = vmul.f32 %v5145_v30, %v5104_v42  ;;  %v2040_v13 = vsel %vm522_vm8, %v2027_v63, %v2031_v11  ;;  %v5773_v48 = vld [vmem:[#allocation18_spill] sm:$0xff]  ;;  %v5774_v30 = vld [vmem:[#allocation44_spill] sm:$0xff] }
 0x209   : > { %v2120_v53 = vadd.f32 %v2112_v14, %v2081_v43  ;;  %v2074_v19 = vmul.f32 %v5196_v58, %v2041_v38  ;;  %v2111_v1 = vmul.f32 %v5155_v34, %v5771_v29  ;;  %v2015_v40 = vadd.f32 %v5773_v48, %v5772_v55  ;;  %v2037_v42 = vpop.permute.xlu1 %2036 }
 0x20a   : > { %v2116_v44 = vadd.f32 %v2108_v61, %v2077_v26  ;;  %v2070_v59 = vmul.f32 %v5196_v58, %v2040_v13  ;;  %v2016_v36 = vadd.f32 %v5774_v30, %v5205_v60  ;;  %v2017_v3 = vadd.f32 %v5775_v37, %v1978_v16  ;;  %v2035_v58 = vpop.permute.xlu0 %2034 }
 0x20b   : > { %v2274_v27 = vadd.f32 %v5187_v49, %v2120_v53  ;;  %v2082_v56 = vadd.f32 %v2074_v19, %v5191_v46  ;;  %v2039_v34 = vsel %vm522_vm8, %v2033_v57, %v2037_v42  ;;  %v2045_v63 = vsel %vm522_vm8, %v2037_v42, %v2025_v24 }
 0x20c   : > { %v2270_v7 = vadd.f32 %v5187_v49, %v2116_v44  ;;  %v2078_v9 = vadd.f32 %v2070_v59, %v2015_v40  ;;  %v2075_v46 = vmul.f32 %v5235_v54, %v2039_v34  ;;  %v2076_v32 = vmul.f32 %v5238_v52, %v2045_v63  ;;  %v5778_v59 = vld [vmem:[#allocation29_spill] sm:$0xff] }
 0x20d   : > { %v2282_v14 = vmax.f32 %v2274_v27, 0.0  ;;  %v2121_v45 = vadd.f32 %v2113_v0, %v2082_v56  ;;  %v2038_v16 = vsel %vm522_vm8, %v2031_v11, %v2035_v58  ;;  %v2044_v49 = vsel %vm522_vm8, %v2035_v58, %v5224_v23  ;;  %v5780_v56 = vld [vmem:[#allocation34_spill] sm:$0xff] }
 0x20e   : > { %v2278_v61 = vmax.f32 %v2270_v7, 0.0  ;;  %v2117_v60 = vadd.f32 %v2109_v18, %v2078_v9  ;;  %v2083_v24 = vadd.f32 %v2075_v46, %v5215_v21  ;;  %v2084_v6 = vadd.f32 %v2076_v32, %v2021_v15 }
 0x20f   : > { %v2290_v4 = vmin.f32 %v2282_v14, 6.0  ;;  %v2275_v8 = vadd.f32 %v5228_v20, %v2121_v45  ;;  %v2071_v57 = vmul.f32 %v5235_v54, %v2038_v16  ;;  %v2072_v18 = vmul.f32 %v5238_v52, %v2044_v49  ;;  %v5776_v52 = vld [vmem:[#allocation31_spill] sm:$0xff] }
 0x210   : > { %v2286_v0 = vmin.f32 %v2278_v61, 6.0  ;;  %v2271_v43 = vadd.f32 %v5228_v20, %v2117_v60  ;;  %v2122_v11 = vadd.f32 %v2114_v35, %v2083_v24  ;;  %v2123_v53 = vadd.f32 %v2115_v12, %v2084_v6 }
 0x211   : > { %v2314_v26 = vadd.f32 %v2306_v51, %v2290_v4  ;;  %v2283_v38 = vmax.f32 %v2275_v8, 0.0  ;;  %v2079_v19 = vadd.f32 %v2071_v57, %v2016_v36  ;;  %v2080_v13 = vadd.f32 %v2072_v18, %v2017_v3 }
 0x212   : > { %v2310_v62 = vadd.f32 %v5246_v2, %v2286_v0  ;;  %v2279_v23 = vmax.f32 %v2271_v43, 0.0  ;;  %v2246_v21 = vmin.f32 %v2238_v5, 6.0  ;;  %v2276_v15 = vadd.f32 %v5242_v22, %v2122_v11 }
 0x213   : > { %2322 = vst [vmem:[%s5325_s11 + $0x20] sm:$0xff] %v2314_v26  ;;  %v2291_v20 = vmin.f32 %v2283_v38, 6.0  ;;  %v2277_v54 = vadd.f32 %v5254_v41, %v2123_v53  ;;  %v2303_v51 = vadd.f32 %v5776_v52, %v5259_v47  ;;  %v2118_v31 = vadd.f32 %v2110_v50, %v2079_v19  ;;  %v5777_v50 = vld [vmem:[#allocation28_spill] sm:$0xff] }
 0x214   : > { %2318 = vst [vmem:[%s5325_s11] sm:$0xff] %v2310_v62  ;;  %v2287_v2 = vmin.f32 %v2279_v23, 6.0  ;;  %v2119_v5 = vadd.f32 %v2111_v1, %v2080_v13  ;;  %v2241_v35 = vmin.f32 %v2233_v25, 6.0  ;;  %v2284_v29 = vmax.f32 %v2276_v15, 0.0 }
 0x215   : > { %v2315_v12 = vadd.f32 %v5257_v33, %v2291_v20  ;;  %v2285_v44 = vmax.f32 %v2277_v54, 0.0  ;;  %v2242_v55 = vmin.f32 %v2234_v17, 6.0  ;;  %v2272_v47 = vadd.f32 %v5242_v22, %v2118_v31 }
 0x216   : > { %v2311_v48 = vadd.f32 %v2303_v51, %v2287_v2  ;;  %v2273_v40 = vadd.f32 %v5254_v41, %v2119_v5  ;;  %v2308_v1 = vadd.f32 %v5777_v50, %v5264_v39  ;;  %v2309_v28 = vadd.f32 %v5778_v59, %v2246_v21  ;;  %v5779_v41 = vld [vmem:[#allocation32_spill] sm:$0xff] }
 0x217   : > { %2323 = vst [vmem:[%s5325_s11 + $0x28] sm:$0xff] %v2315_v12  ;;  %v2292_v33 = vmin.f32 %v2284_v29, 6.0  ;;  %v2293_v25 = vmin.f32 %v2285_v44, 6.0  ;;  %v2280_v27 = vmax.f32 %v2272_v47, 0.0  ;;  %v2304_v39 = vadd.f32 %v5779_v41, %v2241_v35 }
 0x218   : > { %2319 = vst [vmem:[%s5325_s11 + $0x8] sm:$0xff] %v2311_v48  ;;  %v2281_v10 = vmax.f32 %v2273_v40, 0.0  ;;  %v2305_v42 = vadd.f32 %v5780_v56, %v2242_v55 }
 0x219   : > { %v2316_v22 = vadd.f32 %v2308_v1, %v2292_v33  ;;  %v2317_v17 = vadd.f32 %v2309_v28, %v2293_v25  ;;  %v2288_v30 = vmin.f32 %v2280_v27, 6.0 }
 0x21a   : > { %v2289_v36 = vmin.f32 %v2281_v10, 6.0 }
 0x21b   : > { %2324 = vst [vmem:[%s5325_s11 + $0x30] sm:$0xff] %v2316_v22  ;;  %2325 = vst [vmem:[%s5325_s11 + $0x38] sm:$0xff] %v2317_v17  ;;  %v2312_v37 = vadd.f32 %v2304_v39, %v2288_v30 }
 0x21c   : > { %v2313_v3 = vadd.f32 %v2305_v42, %v2289_v36 }
 0x21d   : > { %2320 = vst [vmem:[%s5325_s11 + $0x10] sm:$0xff] %v2312_v37 }
 0x21e   : > { %2321 = vst [vmem:[%s5325_s11 + $0x18] sm:$0xff] %v2313_v3 }
 0x21f   : > { %2759 = shalt.err (!%p2756_p13)
}
 0x220   : > { %s2760_s29 = scalar_lea.hbm %s5354_s10, 1024  ;;  %s2764_s16 = scalar_lea.hbm %s5408_s5, 2048 }
 0x221   : > { %p2761_p0 = scmp.ne.s32.totalorder %s5354_s10, %s2760_s29  ;;  %p2765_p9 = scmp.lt.u32.totalorder %s5354_s10, %s5408_s5 }
 0x222   : > { %p2766_p12 = scmp.lt.u32.totalorder %s2764_s16, %s2760_s29  ;;  %p2768_p4 = scmp.lt.u32.totalorder %s2760_s29, %s5354_s10 }
 0x223   : > { %p2762_p5 = pnand %p2761_p0, %p3022_p1 }
 0x224   : > { %p2767_p2 = por %p2766_p12, %p2765_p9 }
 0x225   : > { %p2763_p11 = pneg %p2762_p5 }
 0x226   : > { %p2769_p6 = por %p2768_p4, %p2767_p2 }
 0x228   : > { %p2770_p8 = pnand %p2769_p6, %p2763_p11 }
 0x22a   : > { %2773 = shalt.err (!%p2770_p8)
}
 0x22b   : > { %s2836_s9 = smov 512  }
 0x22c   : > { %2518 = dma.vmem_to_hbm [thread:$0]  (%p3022_p1), %s5356_s30, 1024, %s5354_s10, %s2327_s22, %s2836_s9, %s2836_s9, %s2833_s26  }
 0x22d PF: > { %s2356_s27 = sand.u32 1, %s2808_s18   ;;  %p5781_p3 = scmp.ne.s32.totalorder %s5525_s25, 0 }
 0x22e   : > { %p5782_p7 = scmp.ge.s32.totalorder %s2820_s21, 2  ;;  %s2357_s12 = scalar_lea.sflag [#allocation4], %s2356_s27 }
 0x230   : > { %p2538_p10 = pnand %p5782_p7, %p5781_p3 }
 0x232   : > { %2803 = dma.done.wait (!%p2538_p10), %s2357_s12, 1024  }
 0x233   : > { %2805 = vsyncadd (!%p2538_p10), %s2357_s12, 4294966272  ;;  %p20_p13 = scmp.ge.s32.totalorder %s3012_s14, 4   ;;  %s5783_s18 = smov %s2812_s19 }
 0x234   : > { %s5784_s19 = smov %s2816_s20  ;;  %s5785_s20 = smov %s3028_s23 }
 0x235   : > { %s5786_s21 = smov %s3012_s14  ;;  %22 = sbr.rel (!%p20_p13) target bundleno = 7 (0x7), region = 135 }
 0x23c   :  { %2362 = vsyncpa [#allocation3], 1 }
 0x23d   :  { %2364 = vsyncpa [#allocation3 + $0x1], 1 }
 0x23e   :  { %2365 = vsyncpa [#allocation6], 1 }
 0x23f   :  { %2366 = vsyncpa [#allocation9], 1 }
 0x240   :  { %2367 = vsyncpa [#allocation4], 1 }
 0x241   :  { %2369 = vsyncpa [#allocation4 + $0x1], 1 }

</bundles_post_ra>
